<compile_context>
chip_gen: v7x
topology: tpu7x:2x2x1
jax: 0.10.0
libtpu: 0.0.40
codegen_flags: <defaults>
</compile_context>

<pallas_src>
import math
import functools

import jax
import jax.numpy as jnp
from jax.experimental import pallas as pl
from jax.experimental.pallas import tpu as pltpu

F32 = jnp.float32
BF16 = jnp.bfloat16


# ----------------------------- in-kernel helpers -----------------------------

def _layer_norm(x, gamma, beta, eps=1e-5):
    # x: (T, E) f32, gamma/beta: (1, E) f32
    mean = jnp.mean(x, axis=-1, keepdims=True)
    var = jnp.mean((x - mean) ** 2, axis=-1, keepdims=True)
    return (x - mean) * jax.lax.rsqrt(var + eps) * gamma + beta


def _softmax(x):
    m = jnp.max(x, axis=-1, keepdims=True)
    e = jnp.exp(x - m)
    # approx reciprocal runs on the otherwise-idle EUP slot
    return e * pl.reciprocal(jnp.sum(e, axis=-1, keepdims=True), approx=True)


def _heads_attention(q, kv, wo, n_heads, mask, ctx_ref):
    """q: (Tq, E) f32 (scale already folded into the Q projection),
    kv: (Sk, 2E) bf16 precomputed K|V, wo: (E, E) bf16 -> (Tq, E) f32.

    Each head's context is stored into its column slice of a (Tq, E) VMEM
    scratch, then the output projection is a single MXU matmul with
    contraction depth K = E (instead of per-head K = E/H matmuls).
    """
    Tq, E = q.shape
    d = E // n_heads
    qb = q.astype(BF16)
    k = kv[:, :E]
    v = kv[:, E:]
    for h in range(n_heads):                      # static unroll over heads
        lo, hi = h * d, (h + 1) * d
        # scores = q_h @ k_h^T without materializing the transpose
        s = jax.lax.dot_general(qb[:, lo:hi], k[:, lo:hi],
                                (((1,), (1,)), ((), ())),
                                preferred_element_type=F32)
        if mask is not None:
            s = s + mask
        p = _softmax(s)
        ctx_ref[:, lo:hi] = jnp.dot(p.astype(BF16), v[:, lo:hi],
                                    preferred_element_type=F32)
    return jnp.dot(ctx_ref[...].astype(BF16), wo, preferred_element_type=F32)


# --------------------------------- kernel ------------------------------------

def decoder_block_kernel(
    # activations
    xq_ref, kv1_ref, kv2_ref, mask_ref,
    # masked self-attention (Q proj, scale folded) + LN1
    wq1_ref, bq1_ref, wo1_ref, bo1_ref, g1_ref, be1_ref,
    # cross-attention (Q proj, scale folded) + LN2
    wq2_ref, bq2_ref, wo2_ref, bo2_ref, g2_ref, be2_ref,
    # feed-forward + LN3
    wf1_ref, bf1_ref, wf2_ref, bf2_ref, g3_ref, be3_ref,
    # output + scratch
    out_ref, ctx_ref,
    *, n_heads):
    E = xq_ref.shape[-1]

    x_q = xq_ref[0]                     # (TQ, E)      query/residual rows (f32)
    kv1 = kv1_ref[0]                    # (S, 2E)      self-attn K|V (bf16)
    kv2 = kv2_ref[0]                    # (S_enc, 2E)  cross-attn K|V (bf16)
    mask = mask_ref[...].astype(F32)    # (TQ, S)      additive mask rows

    # ---- masked multi-head self-attention + residual + LN -------------------
    q1 = jnp.dot(x_q.astype(BF16), wq1_ref[...],
                 preferred_element_type=F32) + bq1_ref[...]
    attn = _heads_attention(q1, kv1, wo1_ref[...], n_heads, mask,
                            ctx_ref) + bo1_ref[...]
    x1 = _layer_norm(attn + x_q, g1_ref[...], be1_ref[...])

    # ---- cross multi-head attention (K, V from encoder) + residual + LN -----
    q2 = jnp.dot(x1.astype(BF16), wq2_ref[...],
                 preferred_element_type=F32) + bq2_ref[...]
    cross = _heads_attention(q2, kv2, wo2_ref[...], n_heads, None,
                             ctx_ref) + bo2_ref[...]
    x2 = _layer_norm(cross + x1, g2_ref[...], be2_ref[...])

    # ---- feed-forward (Linear -> ReLU -> Linear), hidden dim K-tiled --------
    FF = wf1_ref.shape[1]
    CH = 512 if FF % 512 == 0 else FF
    x2b = x2.astype(BF16)
    ff = jnp.zeros((x2.shape[0], E), F32)
    for c in range(FF // CH):                     # static unroll over chunks
        lo, hi = c * CH, (c + 1) * CH
        h = jnp.maximum(jnp.dot(x2b, wf1_ref[:, lo:hi],
                                preferred_element_type=F32) + bf1_ref[:, lo:hi],
                        0.0)
        ff = ff + jnp.dot(h.astype(BF16), wf2_ref[lo:hi, :],
                          preferred_element_type=F32)
    ff = ff + bf2_ref[...]
    out_ref[0] = _layer_norm(ff + x2, g3_ref[...], be3_ref[...]).astype(out_ref.dtype)


# --------------------------------- wrapper -----------------------------------

def decoder_block(x, encoder_output, mask, p, n_heads, *, q_tile=256):
    B, S, E = x.shape
    _, S_enc, _ = encoder_output.shape
    TQ = min(q_tile, S)
    assert S % TQ == 0, "sequence length must be divisible by the query tile"
    QT = S // TQ
    d = E // n_heads
    scale = 1.0 / math.sqrt(d)

    # ---- precompute fused K|V projections ONCE (wrapper-side XLA) -----------
    kv1 = jnp.concatenate([x @ p['wk1'] + p['bk1'],
                           x @ p['wv1'] + p['bv1']], axis=-1).astype(BF16)
    kv2 = jnp.concatenate([encoder_output @ p['wk2'] + p['bk2'],
                           encoder_output @ p['wv2'] + p['bv2']],
                          axis=-1).astype(BF16)
    mask_bf = mask.astype(BF16)

    # ---- pack parameters (weights bf16 for the MXU, 1/sqrt(d) folded into Q)
    param_list = [
        (p['wq1'] * scale).astype(BF16), p['bq1'] * scale,
        p['wo1'].astype(BF16), p['bo1'], p['g1'], p['be1'],
        (p['wq2'] * scale).astype(BF16), p['bq2'] * scale,
        p['wo2'].astype(BF16), p['bo2'], p['g2'], p['be2'],
        p['wf1'].astype(BF16), p['bf1'], p['wf2'].astype(BF16), p['bf2'],
        p['g3'], p['be3'],
    ]

    act_specs = [
        pl.BlockSpec((1, TQ, E), lambda b, q: (b, q, 0)),         # x query rows
        pl.BlockSpec((1, S, 2 * E), lambda b, q: (b, 0, 0)),      # self K|V
        pl.BlockSpec((1, S_enc, 2 * E), lambda b, q: (b, 0, 0)),  # cross K|V
        pl.BlockSpec((TQ, S), lambda b, q: (q, 0)),               # mask rows
    ]
    out_spec = pl.BlockSpec((1, TQ, E), lambda b, q: (b, q, 0))

    def weight_spec(arr, single_buffer):
        nd = arr.ndim
        idx = lambda b, q, _n=nd: (0,) * _n
        if single_buffer:
            # constant block index -> no benefit from double-buffering
            return pl.BlockSpec(arr.shape, idx, pipeline_mode=pl.Buffered(1))
        return pl.BlockSpec(arr.shape, idx)

    # generation-aware VMEM budget (cap well below physical; v7x is 64 MiB)
    try:
        vmem_cap = int(pltpu.get_tpu_info().vmem_capacity_bytes)
    except Exception:
        vmem_cap = 128 * 1024 * 1024

    act_bytes = (4 * TQ * E          # x tile (f32)
                 + 2 * S * 2 * E     # kv1 (bf16)
                 + 2 * S_enc * 2 * E # kv2 (bf16)
                 + 2 * TQ * S        # mask (bf16)
                 + 4 * TQ * E)       # output tile (f32)
    prm_bytes = sum(int(t.size) * t.dtype.itemsize for t in param_list)

    def build(single_buffer_weights):
        prm_mult = 1 if single_buffer_weights else 2
        need = (2 * act_bytes + prm_mult * prm_bytes
                + 4 * TQ * E           # ctx scratch
                + (4 << 20))           # headroom
        vmem_limit = min(max(need, 32 << 20), int(0.75 * vmem_cap))
        in_specs = act_specs + [weight_spec(t, single_buffer_weights)
                                for t in param_list]
        return pl.pallas_call(
            functools.partial(decoder_block_kernel, n_heads=n_heads),
            out_shape=jax.ShapeDtypeStruct((B, S, E), jnp.float32),
            grid_spec=pltpu.PrefetchScalarGridSpec(
                num_scalar_prefetch=0,
                grid=(B, QT),
                in_specs=in_specs,
                out_specs=out_spec,
                scratch_shapes=[pltpu.VMEM((TQ, E), F32)]),
            compiler_params=pltpu.CompilerParams(
                dimension_semantics=("parallel", "parallel"),
                vmem_limit_bytes=vmem_limit))

    args = (x, kv1, kv2, mask_bf, *param_list)
    try:
        return build(True)(*args)
    except Exception:
        # TODO(synk): this JAX/Mosaic build rejected pl.Buffered(1) weight
        # single-buffering; falling back to default double-buffered specs.
        return build(False)(*args)


# -------------------------- deterministic init -------------------------------

def make_params(key, E, ff_hidden):
    ks = iter(jax.random.split(key, 16))

    def lin(kin, kout):
        w = jax.random.normal(next(ks), (kin, kout), F32) * 0.02
        b = jnp.zeros((1, kout), F32)
        return w, b

    p = {}
    for name in ('q1', 'k1', 'v1', 'o1'):
        p['w' + name], p['b' + name] = lin(E, E)
    p['g1'], p['be1'] = jnp.ones((1, E), F32), jnp.zeros((1, E), F32)
    for name in ('q2', 'k2', 'v2', 'o2'):
        p['w' + name], p['b' + name] = lin(E, E)
    p['g2'], p['be2'] = jnp.ones((1, E), F32), jnp.zeros((1, E), F32)
    p['wf1'], p['bf1'] = lin(E, ff_hidden)
    p['wf2'], p['bf2'] = lin(ff_hidden, E)
    p['g3'], p['be3'] = jnp.ones((1, E), F32), jnp.zeros((1, E), F32)
    return p


# --------------------------- pure-JAX reference -------------------------------

def reference(x, enc, mask, p, n_heads):
    def ln(t, g, b, eps=1e-5):
        mu = t.mean(-1, keepdims=True)
        var = ((t - mu) ** 2).mean(-1, keepdims=True)
        return (t - mu) / jnp.sqrt(var + eps) * g + b

    def mha(q, k, v, wq, bq, wk, bk, wv, bv, wo, bo, msk):
        B, Sq, E = q.shape
        Sk = k.shape[1]
        d = E // n_heads
        Q = (q @ wq + bq).reshape(B, Sq, n_heads, d).transpose(0, 2, 1, 3)
        K = (k @ wk + bk).reshape(B, Sk, n_heads, d).transpose(0, 2, 1, 3)
        V = (v @ wv + bv).reshape(B, Sk, n_heads, d).transpose(0, 2, 1, 3)
        s = jnp.einsum('bhqd,bhkd->bhqk', Q, K) / math.sqrt(d)
        if msk is not None:
            s = s + msk
        pr = jax.nn.softmax(s, axis=-1)
        o = jnp.einsum('bhqk,bhkd->bhqd', pr, V).transpose(0, 2, 1, 3).reshape(B, Sq, E)
        return o @ wo + bo

    a = mha(x, x, x, p['wq1'], p['bq1'], p['wk1'], p['bk1'], p['wv1'], p['bv1'],
            p['wo1'], p['bo1'], mask)
    x1 = ln(a + x, p['g1'], p['be1'])
    c = mha(x1, enc, enc, p['wq2'], p['bq2'], p['wk2'], p['bk2'], p['wv2'], p['bv2'],
            p['wo2'], p['bo2'], None)
    x2 = ln(c + x1, p['g2'], p['be2'])
    ff = jnp.maximum(x2 @ p['wf1'] + p['bf1'], 0.0) @ p['wf2'] + p['bf2']
    return ln(ff + x2, p['g3'], p['be3'])


# ----------------------------------- main -------------------------------------

if __name__ == "__main__":
    B, S, S_ENC, E, N_HEADS = 2, 8, 8, 32, 4
    FF_HIDDEN = 4 * E  # TODO(synk): FF_network hidden size not given; using the standard 4*E.

    key = jax.random.PRNGKey(0)
    kx, kenc, kp = jax.random.split(key, 3)
    x = jax.random.normal(kx, (B, S, E), F32)
    encoder_output = jax.random.normal(kenc, (B, S_ENC, E), F32)

    # causal additive mask: 0 on/below diagonal, -1e9 above
    row = jnp.arange(S)[:, None]
    col = jnp.arange(S)[None, :]
    mask = jnp.where(col > row, -1e9, 0.0).astype(F32)

    params = make_params(kp, E, FF_HIDDEN)

    out = decoder_block(x, encoder_output, mask, params, N_HEADS)
    out = jax.block_until_ready(out)

    ref = reference(x, encoder_output, mask, params, N_HEADS)
    assert out.shape == (B, S, E)
    err = jnp.max(jnp.abs(out - ref))
    # bf16 MXU operands (f32 accumulation / f32 softmax & LN statistics) give
    # ~1e-3..1e-2 absolute error vs the pure-f32 reference.
    assert jnp.allclose(out, ref, atol=2e-2, rtol=2e-2), f"max err {err}"

    print("KERNEL_OK")
</pallas_src>

<mosaic_0001>
module attributes {stable_mosaic.version = 11 : i64} {
  func.func @decoder_block_kernel(%arg0: i32, %arg1: i32, %arg2: memref<1x8x32xf32, #tpu.memory_space<vmem>>, %arg3: memref<1x8x64xbf16, #tpu.memory_space<vmem>>, %arg4: memref<1x8x64xbf16, #tpu.memory_space<vmem>>, %arg5: memref<8x8xbf16, #tpu.memory_space<vmem>>, %arg6: memref<32x32xbf16, #tpu.memory_space<vmem>>, %arg7: memref<1x32xf32, #tpu.memory_space<vmem>>, %arg8: memref<32x32xbf16, #tpu.memory_space<vmem>>, %arg9: memref<1x32xf32, #tpu.memory_space<vmem>>, %arg10: memref<1x32xf32, #tpu.memory_space<vmem>>, %arg11: memref<1x32xf32, #tpu.memory_space<vmem>>, %arg12: memref<32x32xbf16, #tpu.memory_space<vmem>>, %arg13: memref<1x32xf32, #tpu.memory_space<vmem>>, %arg14: memref<32x32xbf16, #tpu.memory_space<vmem>>, %arg15: memref<1x32xf32, #tpu.memory_space<vmem>>, %arg16: memref<1x32xf32, #tpu.memory_space<vmem>>, %arg17: memref<1x32xf32, #tpu.memory_space<vmem>>, %arg18: memref<32x128xbf16, #tpu.memory_space<vmem>>, %arg19: memref<1x128xf32, #tpu.memory_space<vmem>>, %arg20: memref<128x32xbf16, #tpu.memory_space<vmem>>, %arg21: memref<1x32xf32, #tpu.memory_space<vmem>>, %arg22: memref<1x32xf32, #tpu.memory_space<vmem>>, %arg23: memref<1x32xf32, #tpu.memory_space<vmem>>, %arg24: memref<1x8x32xf32, #tpu.memory_space<vmem>>, %arg25: memref<8x32xf32, #tpu.memory_space<vmem>>) attributes {dimension_semantics = [#tpu.dimension_semantics<parallel>, #tpu.dimension_semantics<parallel>], iteration_bounds = array<i64: 2, 1>, scalar_prefetch = 0 : i64, scratch_operands = 1 : i64, tpu.core_type = #tpu.core_type<tc>, window_params = [{transform_indices = @transform_0, window_bounds = array<i64: 1, 8, 32>}, {transform_indices = @transform_1, window_bounds = array<i64: 1, 8, 64>}, {transform_indices = @transform_2, window_bounds = array<i64: 1, 8, 64>}, {transform_indices = @transform_3, window_bounds = array<i64: 8, 8>}, {pipeline_mode = #tpu.pipeline_mode<synchronous>, transform_indices = @transform_4, window_bounds = array<i64: 32, 32>}, {pipeline_mode = #tpu.pipeline_mode<synchronous>, transform_indices = @transform_5, window_bounds = array<i64: 1, 32>}, {pipeline_mode = #tpu.pipeline_mode<synchronous>, transform_indices = @transform_6, window_bounds = array<i64: 32, 32>}, {pipeline_mode = #tpu.pipeline_mode<synchronous>, transform_indices = @transform_7, window_bounds = array<i64: 1, 32>}, {pipeline_mode = #tpu.pipeline_mode<synchronous>, transform_indices = @transform_8, window_bounds = array<i64: 1, 32>}, {pipeline_mode = #tpu.pipeline_mode<synchronous>, transform_indices = @transform_9, window_bounds = array<i64: 1, 32>}, {pipeline_mode = #tpu.pipeline_mode<synchronous>, transform_indices = @transform_10, window_bounds = array<i64: 32, 32>}, {pipeline_mode = #tpu.pipeline_mode<synchronous>, transform_indices = @transform_11, window_bounds = array<i64: 1, 32>}, {pipeline_mode = #tpu.pipeline_mode<synchronous>, transform_indices = @transform_12, window_bounds = array<i64: 32, 32>}, {pipeline_mode = #tpu.pipeline_mode<synchronous>, transform_indices = @transform_13, window_bounds = array<i64: 1, 32>}, {pipeline_mode = #tpu.pipeline_mode<synchronous>, transform_indices = @transform_14, window_bounds = array<i64: 1, 32>}, {pipeline_mode = #tpu.pipeline_mode<synchronous>, transform_indices = @transform_15, window_bounds = array<i64: 1, 32>}, {pipeline_mode = #tpu.pipeline_mode<synchronous>, transform_indices = @transform_16, window_bounds = array<i64: 32, 128>}, {pipeline_mode = #tpu.pipeline_mode<synchronous>, transform_indices = @transform_17, window_bounds = array<i64: 1, 128>}, {pipeline_mode = #tpu.pipeline_mode<synchronous>, transform_indices = @transform_18, window_bounds = array<i64: 128, 32>}, {pipeline_mode = #tpu.pipeline_mode<synchronous>, transform_indices = @transform_19, window_bounds = array<i64: 1, 32>}, {pipeline_mode = #tpu.pipeline_mode<synchronous>, transform_indices = @transform_20, window_bounds = array<i64: 1, 32>}, {pipeline_mode = #tpu.pipeline_mode<synchronous>, transform_indices = @transform_21, window_bounds = array<i64: 1, 32>}, {transform_indices = @transform_22, window_bounds = array<i64: 1, 8, 32>}]} {
    %c0 = arith.constant 0 : index
    %c0_0 = arith.constant 0 : index
    %c0_1 = arith.constant 0 : index
    %0 = vector.load %arg2[%c0, %c0_0, %c0_1] : memref<1x8x32xf32, #tpu.memory_space<vmem>>, vector<1x8x32xf32>
    %1 = vector.shape_cast %0 : vector<1x8x32xf32> to vector<8x32xf32>
    %c0_2 = arith.constant 0 : index
    %c0_3 = arith.constant 0 : index
    %c0_4 = arith.constant 0 : index
    %2 = vector.load %arg3[%c0_2, %c0_3, %c0_4] : memref<1x8x64xbf16, #tpu.memory_space<vmem>>, vector<1x8x64xbf16>
    %3 = vector.shape_cast %2 : vector<1x8x64xbf16> to vector<8x64xbf16>
    %c0_5 = arith.constant 0 : index
    %c0_6 = arith.constant 0 : index
    %c0_7 = arith.constant 0 : index
    %4 = vector.load %arg4[%c0_5, %c0_6, %c0_7] : memref<1x8x64xbf16, #tpu.memory_space<vmem>>, vector<1x8x64xbf16>
    %5 = vector.shape_cast %4 : vector<1x8x64xbf16> to vector<8x64xbf16>
    %c0_8 = arith.constant 0 : index
    %c0_9 = arith.constant 0 : index
    %6 = vector.load %arg5[%c0_8, %c0_9] : memref<8x8xbf16, #tpu.memory_space<vmem>>, vector<8x8xbf16>
    %7 = arith.extf %6 : vector<8x8xbf16> to vector<8x8xf32>
    %8 = arith.truncf %1 : vector<8x32xf32> to vector<8x32xbf16>
    %c0_10 = arith.constant 0 : index
    %c0_11 = arith.constant 0 : index
    %9 = vector.load %arg6[%c0_10, %c0_11] : memref<32x32xbf16, #tpu.memory_space<vmem>>, vector<32x32xbf16>
    %cst = arith.constant dense<0.000000e+00> : vector<8x32xf32>
    %10 = tpu.matmul %8, %9, %cst {dimension_numbers = #tpu.dot_dimension_numbers<[1], [0], [0], [1], [0, 0, 1, 1], [], []>} : vector<8x32xbf16>, vector<32x32xbf16>, vector<8x32xf32> -> vector<8x32xf32>
    %c0_12 = arith.constant 0 : index
    %c0_13 = arith.constant 0 : index
    %11 = vector.load %arg7[%c0_12, %c0_13] : memref<1x32xf32, #tpu.memory_space<vmem>>, vector<1x32xf32>
    %12 = vector.broadcast %11 : vector<1x32xf32> to vector<8x32xf32>
    %13 = arith.addf %10, %12 : vector<8x32xf32>
    %c0_14 = arith.constant 0 : index
    %c0_15 = arith.constant 0 : index
    %14 = vector.load %arg8[%c0_14, %c0_15] : memref<32x32xbf16, #tpu.memory_space<vmem>>, vector<32x32xbf16>
    %15 = arith.truncf %13 : vector<8x32xf32> to vector<8x32xbf16>
    %16 = vector.extract_strided_slice %3 {offsets = [0, 0], sizes = [8, 32], strides = [1, 1]} : vector<8x64xbf16> to vector<8x32xbf16>
    %17 = vector.extract_strided_slice %3 {offsets = [0, 32], sizes = [8, 32], strides = [1, 1]} : vector<8x64xbf16> to vector<8x32xbf16>
    %18 = vector.extract_strided_slice %15 {offsets = [0, 0], sizes = [8, 8], strides = [1, 1]} : vector<8x32xbf16> to vector<8x8xbf16>
    %19 = vector.extract_strided_slice %16 {offsets = [0, 0], sizes = [8, 8], strides = [1, 1]} : vector<8x32xbf16> to vector<8x8xbf16>
    %cst_16 = arith.constant dense<0.000000e+00> : vector<8x8xf32>
    %20 = tpu.matmul %18, %19, %cst_16 {dimension_numbers = #tpu.dot_dimension_numbers<[1], [1], [0], [0], [0, 0, 1, 0], [], []>} : vector<8x8xbf16>, vector<8x8xbf16>, vector<8x8xf32> -> vector<8x8xf32>
    %21 = arith.addf %20, %7 : vector<8x8xf32>
    %cst_17 = arith.constant dense<0xFF800000> : vector<8xf32>
    %22 = vector.multi_reduction <maximumf>, %21, %cst_17 [1] : vector<8x8xf32> to vector<8xf32>
    %23 = vector.shape_cast %22 : vector<8xf32> to vector<8x1xf32>
    %24 = vector.broadcast %23 : vector<8x1xf32> to vector<8x8xf32>
    %25 = arith.subf %21, %24 : vector<8x8xf32>
    %26 = math.exp %25 : vector<8x8xf32>
    %cst_18 = arith.constant dense<0.000000e+00> : vector<8xf32>
    %27 = vector.multi_reduction <add>, %26, %cst_18 [1] : vector<8x8xf32> to vector<8xf32>
    %28 = vector.shape_cast %27 : vector<8xf32> to vector<8x1xf32>
    %29 = tpu.reciprocal %28 {approx = true} : vector<8x1xf32> -> vector<8x1xf32>
    %30 = vector.broadcast %29 : vector<8x1xf32> to vector<8x8xf32>
    %31 = arith.mulf %26, %30 : vector<8x8xf32>
    %32 = arith.truncf %31 : vector<8x8xf32> to vector<8x8xbf16>
    %33 = vector.extract_strided_slice %17 {offsets = [0, 0], sizes = [8, 8], strides = [1, 1]} : vector<8x32xbf16> to vector<8x8xbf16>
    %cst_19 = arith.constant dense<0.000000e+00> : vector<8x8xf32>
    %34 = tpu.matmul %32, %33, %cst_19 {dimension_numbers = #tpu.dot_dimension_numbers<[1], [0], [0], [1], [0, 0, 1, 1], [], []>} : vector<8x8xbf16>, vector<8x8xbf16>, vector<8x8xf32> -> vector<8x8xf32>
    %c0_20 = arith.constant 0 : index
    %c0_21 = arith.constant 0 : index
    %35 = vector.load %arg25[%c0_20, %c0_21] : memref<8x32xf32, #tpu.memory_space<vmem>>, vector<8x8xf32>
    tpu.vector_store %arg25[%c0_20, %c0_21], %34 {strides = array<i32>} : memref<8x32xf32, #tpu.memory_space<vmem>>, vector<8x8xf32>,
    %36 = vector.extract_strided_slice %15 {offsets = [0, 8], sizes = [8, 8], strides = [1, 1]} : vector<8x32xbf16> to vector<8x8xbf16>
    %37 = vector.extract_strided_slice %16 {offsets = [0, 8], sizes = [8, 8], strides = [1, 1]} : vector<8x32xbf16> to vector<8x8xbf16>
    %cst_22 = arith.constant dense<0.000000e+00> : vector<8x8xf32>
    %38 = tpu.matmul %36, %37, %cst_22 {dimension_numbers = #tpu.dot_dimension_numbers<[1], [1], [0], [0], [0, 0, 1, 0], [], []>} : vector<8x8xbf16>, vector<8x8xbf16>, vector<8x8xf32> -> vector<8x8xf32>
    %39 = arith.addf %38, %7 : vector<8x8xf32>
    %cst_23 = arith.constant dense<0xFF800000> : vector<8xf32>
    %40 = vector.multi_reduction <maximumf>, %39, %cst_23 [1] : vector<8x8xf32> to vector<8xf32>
    %41 = vector.shape_cast %40 : vector<8xf32> to vector<8x1xf32>
    %42 = vector.broadcast %41 : vector<8x1xf32> to vector<8x8xf32>
    %43 = arith.subf %39, %42 : vector<8x8xf32>
    %44 = math.exp %43 : vector<8x8xf32>
    %cst_24 = arith.constant dense<0.000000e+00> : vector<8xf32>
    %45 = vector.multi_reduction <add>, %44, %cst_24 [1] : vector<8x8xf32> to vector<8xf32>
    %46 = vector.shape_cast %45 : vector<8xf32> to vector<8x1xf32>
    %47 = tpu.reciprocal %46 {approx = true} : vector<8x1xf32> -> vector<8x1xf32>
    %48 = vector.broadcast %47 : vector<8x1xf32> to vector<8x8xf32>
    %49 = arith.mulf %44, %48 : vector<8x8xf32>
    %50 = arith.truncf %49 : vector<8x8xf32> to vector<8x8xbf16>
    %51 = vector.extract_strided_slice %17 {offsets = [0, 8], sizes = [8, 8], strides = [1, 1]} : vector<8x32xbf16> to vector<8x8xbf16>
    %cst_25 = arith.constant dense<0.000000e+00> : vector<8x8xf32>
    %52 = tpu.matmul %50, %51, %cst_25 {dimension_numbers = #tpu.dot_dimension_numbers<[1], [0], [0], [1], [0, 0, 1, 1], [], []>} : vector<8x8xbf16>, vector<8x8xbf16>, vector<8x8xf32> -> vector<8x8xf32>
    %c0_26 = arith.constant 0 : index
    %c8 = arith.constant 8 : index
    %53 = vector.load %arg25[%c0_26, %c8] : memref<8x32xf32, #tpu.memory_space<vmem>>, vector<8x8xf32>
    tpu.vector_store %arg25[%c0_26, %c8], %52 {strides = array<i32>} : memref<8x32xf32, #tpu.memory_space<vmem>>, vector<8x8xf32>,
    %54 = vector.extract_strided_slice %15 {offsets = [0, 16], sizes = [8, 8], strides = [1, 1]} : vector<8x32xbf16> to vector<8x8xbf16>
    %55 = vector.extract_strided_slice %16 {offsets = [0, 16], sizes = [8, 8], strides = [1, 1]} : vector<8x32xbf16> to vector<8x8xbf16>
    %cst_27 = arith.constant dense<0.000000e+00> : vector<8x8xf32>
    %56 = tpu.matmul %54, %55, %cst_27 {dimension_numbers = #tpu.dot_dimension_numbers<[1], [1], [0], [0], [0, 0, 1, 0], [], []>} : vector<8x8xbf16>, vector<8x8xbf16>, vector<8x8xf32> -> vector<8x8xf32>
    %57 = arith.addf %56, %7 : vector<8x8xf32>
    %cst_28 = arith.constant dense<0xFF800000> : vector<8xf32>
    %58 = vector.multi_reduction <maximumf>, %57, %cst_28 [1] : vector<8x8xf32> to vector<8xf32>
    %59 = vector.shape_cast %58 : vector<8xf32> to vector<8x1xf32>
    %60 = vector.broadcast %59 : vector<8x1xf32> to vector<8x8xf32>
    %61 = arith.subf %57, %60 : vector<8x8xf32>
    %62 = math.exp %61 : vector<8x8xf32>
    %cst_29 = arith.constant dense<0.000000e+00> : vector<8xf32>
    %63 = vector.multi_reduction <add>, %62, %cst_29 [1] : vector<8x8xf32> to vector<8xf32>
    %64 = vector.shape_cast %63 : vector<8xf32> to vector<8x1xf32>
    %65 = tpu.reciprocal %64 {approx = true} : vector<8x1xf32> -> vector<8x1xf32>
    %66 = vector.broadcast %65 : vector<8x1xf32> to vector<8x8xf32>
    %67 = arith.mulf %62, %66 : vector<8x8xf32>
    %68 = arith.truncf %67 : vector<8x8xf32> to vector<8x8xbf16>
    %69 = vector.extract_strided_slice %17 {offsets = [0, 16], sizes = [8, 8], strides = [1, 1]} : vector<8x32xbf16> to vector<8x8xbf16>
    %cst_30 = arith.constant dense<0.000000e+00> : vector<8x8xf32>
    %70 = tpu.matmul %68, %69, %cst_30 {dimension_numbers = #tpu.dot_dimension_numbers<[1], [0], [0], [1], [0, 0, 1, 1], [], []>} : vector<8x8xbf16>, vector<8x8xbf16>, vector<8x8xf32> -> vector<8x8xf32>
    %c0_31 = arith.constant 0 : index
    %c16 = arith.constant 16 : index
    %71 = vector.load %arg25[%c0_31, %c16] : memref<8x32xf32, #tpu.memory_space<vmem>>, vector<8x8xf32>
    tpu.vector_store %arg25[%c0_31, %c16], %70 {strides = array<i32>} : memref<8x32xf32, #tpu.memory_space<vmem>>, vector<8x8xf32>,
    %72 = vector.extract_strided_slice %15 {offsets = [0, 24], sizes = [8, 8], strides = [1, 1]} : vector<8x32xbf16> to vector<8x8xbf16>
    %73 = vector.extract_strided_slice %16 {offsets = [0, 24], sizes = [8, 8], strides = [1, 1]} : vector<8x32xbf16> to vector<8x8xbf16>
    %cst_32 = arith.constant dense<0.000000e+00> : vector<8x8xf32>
    %74 = tpu.matmul %72, %73, %cst_32 {dimension_numbers = #tpu.dot_dimension_numbers<[1], [1], [0], [0], [0, 0, 1, 0], [], []>} : vector<8x8xbf16>, vector<8x8xbf16>, vector<8x8xf32> -> vector<8x8xf32>
    %75 = arith.addf %74, %7 : vector<8x8xf32>
    %cst_33 = arith.constant dense<0xFF800000> : vector<8xf32>
    %76 = vector.multi_reduction <maximumf>, %75, %cst_33 [1] : vector<8x8xf32> to vector<8xf32>
    %77 = vector.shape_cast %76 : vector<8xf32> to vector<8x1xf32>
    %78 = vector.broadcast %77 : vector<8x1xf32> to vector<8x8xf32>
    %79 = arith.subf %75, %78 : vector<8x8xf32>
    %80 = math.exp %79 : vector<8x8xf32>
    %cst_34 = arith.constant dense<0.000000e+00> : vector<8xf32>
    %81 = vector.multi_reduction <add>, %80, %cst_34 [1] : vector<8x8xf32> to vector<8xf32>
    %82 = vector.shape_cast %81 : vector<8xf32> to vector<8x1xf32>
    %83 = tpu.reciprocal %82 {approx = true} : vector<8x1xf32> -> vector<8x1xf32>
    %84 = vector.broadcast %83 : vector<8x1xf32> to vector<8x8xf32>
    %85 = arith.mulf %80, %84 : vector<8x8xf32>
    %86 = arith.truncf %85 : vector<8x8xf32> to vector<8x8xbf16>
    %87 = vector.extract_strided_slice %17 {offsets = [0, 24], sizes = [8, 8], strides = [1, 1]} : vector<8x32xbf16> to vector<8x8xbf16>
    %cst_35 = arith.constant dense<0.000000e+00> : vector<8x8xf32>
    %88 = tpu.matmul %86, %87, %cst_35 {dimension_numbers = #tpu.dot_dimension_numbers<[1], [0], [0], [1], [0, 0, 1, 1], [], []>} : vector<8x8xbf16>, vector<8x8xbf16>, vector<8x8xf32> -> vector<8x8xf32>
    %c0_36 = arith.constant 0 : index
    %c24 = arith.constant 24 : index
    %89 = vector.load %arg25[%c0_36, %c24] : memref<8x32xf32, #tpu.memory_space<vmem>>, vector<8x8xf32>
    tpu.vector_store %arg25[%c0_36, %c24], %88 {strides = array<i32>} : memref<8x32xf32, #tpu.memory_space<vmem>>, vector<8x8xf32>,
    %c0_37 = arith.constant 0 : index
    %c0_38 = arith.constant 0 : index
    %90 = vector.load %arg25[%c0_37, %c0_38] : memref<8x32xf32, #tpu.memory_space<vmem>>, vector<8x32xf32>
    %91 = arith.truncf %90 : vector<8x32xf32> to vector<8x32xbf16>
    %cst_39 = arith.constant dense<0.000000e+00> : vector<8x32xf32>
    %92 = tpu.matmul %91, %14, %cst_39 {dimension_numbers = #tpu.dot_dimension_numbers<[1], [0], [0], [1], [0, 0, 1, 1], [], []>} : vector<8x32xbf16>, vector<32x32xbf16>, vector<8x32xf32> -> vector<8x32xf32>
    %c0_40 = arith.constant 0 : index
    %c0_41 = arith.constant 0 : index
    %93 = vector.load %arg9[%c0_40, %c0_41] : memref<1x32xf32, #tpu.memory_space<vmem>>, vector<1x32xf32>
    %94 = vector.broadcast %93 : vector<1x32xf32> to vector<8x32xf32>
    %95 = arith.addf %92, %94 : vector<8x32xf32>
    %96 = arith.addf %95, %1 : vector<8x32xf32>
    %c0_42 = arith.constant 0 : index
    %c0_43 = arith.constant 0 : index
    %97 = vector.load %arg10[%c0_42, %c0_43] : memref<1x32xf32, #tpu.memory_space<vmem>>, vector<1x32xf32>
    %c0_44 = arith.constant 0 : index
    %c0_45 = arith.constant 0 : index
    %98 = vector.load %arg11[%c0_44, %c0_45] : memref<1x32xf32, #tpu.memory_space<vmem>>, vector<1x32xf32>
    %cst_46 = arith.constant dense<0.000000e+00> : vector<8xf32>
    %99 = vector.multi_reduction <add>, %96, %cst_46 [1] : vector<8x32xf32> to vector<8xf32>
    %100 = vector.shape_cast %99 : vector<8xf32> to vector<8x1xf32>
    %cst_47 = arith.constant 3.200000e+01 : f32
    %101 = vector.broadcast %cst_47 : f32 to vector<8x1xf32>
    %102 = arith.divf %100, %101 : vector<8x1xf32>
    %103 = vector.broadcast %102 : vector<8x1xf32> to vector<8x32xf32>
    %104 = arith.subf %96, %103 : vector<8x32xf32>
    %105 = arith.mulf %104, %104 : vector<8x32xf32>
    %cst_48 = arith.constant dense<0.000000e+00> : vector<8xf32>
    %106 = vector.multi_reduction <add>, %105, %cst_48 [1] : vector<8x32xf32> to vector<8xf32>
    %107 = vector.shape_cast %106 : vector<8xf32> to vector<8x1xf32>
    %cst_49 = arith.constant 3.200000e+01 : f32
    %108 = vector.broadcast %cst_49 : f32 to vector<8x1xf32>
    %109 = arith.divf %107, %108 : vector<8x1xf32>
    %110 = vector.broadcast %102 : vector<8x1xf32> to vector<8x32xf32>
    %111 = arith.subf %96, %110 : vector<8x32xf32>
    %cst_50 = arith.constant 9.99999974E-6 : f32
    %112 = vector.broadcast %cst_50 : f32 to vector<8x1xf32>
    %113 = arith.addf %109, %112 : vector<8x1xf32>
    %114 = math.rsqrt %113 : vector<8x1xf32>
    %115 = vector.broadcast %114 : vector<8x1xf32> to vector<8x32xf32>
    %116 = arith.mulf %111, %115 : vector<8x32xf32>
    %117 = vector.broadcast %97 : vector<1x32xf32> to vector<8x32xf32>
    %118 = arith.mulf %116, %117 : vector<8x32xf32>
    %119 = vector.broadcast %98 : vector<1x32xf32> to vector<8x32xf32>
    %120 = arith.addf %118, %119 : vector<8x32xf32>
    %121 = arith.truncf %120 : vector<8x32xf32> to vector<8x32xbf16>
    %c0_51 = arith.constant 0 : index
    %c0_52 = arith.constant 0 : index
    %122 = vector.load %arg12[%c0_51, %c0_52] : memref<32x32xbf16, #tpu.memory_space<vmem>>, vector<32x32xbf16>
    %cst_53 = arith.constant dense<0.000000e+00> : vector<8x32xf32>
    %123 = tpu.matmul %121, %122, %cst_53 {dimension_numbers = #tpu.dot_dimension_numbers<[1], [0], [0], [1], [0, 0, 1, 1], [], []>} : vector<8x32xbf16>, vector<32x32xbf16>, vector<8x32xf32> -> vector<8x32xf32>
    %c0_54 = arith.constant 0 : index
    %c0_55 = arith.constant 0 : index
    %124 = vector.load %arg13[%c0_54, %c0_55] : memref<1x32xf32, #tpu.memory_space<vmem>>, vector<1x32xf32>
    %125 = vector.broadcast %124 : vector<1x32xf32> to vector<8x32xf32>
    %126 = arith.addf %123, %125 : vector<8x32xf32>
    %c0_56 = arith.constant 0 : index
    %c0_57 = arith.constant 0 : index
    %127 = vector.load %arg14[%c0_56, %c0_57] : memref<32x32xbf16, #tpu.memory_space<vmem>>, vector<32x32xbf16>
    %128 = arith.truncf %126 : vector<8x32xf32> to vector<8x32xbf16>
    %129 = vector.extract_strided_slice %5 {offsets = [0, 0], sizes = [8, 32], strides = [1, 1]} : vector<8x64xbf16> to vector<8x32xbf16>
    %130 = vector.extract_strided_slice %5 {offsets = [0, 32], sizes = [8, 32], strides = [1, 1]} : vector<8x64xbf16> to vector<8x32xbf16>
    %131 = vector.extract_strided_slice %128 {offsets = [0, 0], sizes = [8, 8], strides = [1, 1]} : vector<8x32xbf16> to vector<8x8xbf16>
    %132 = vector.extract_strided_slice %129 {offsets = [0, 0], sizes = [8, 8], strides = [1, 1]} : vector<8x32xbf16> to vector<8x8xbf16>
    %cst_58 = arith.constant dense<0.000000e+00> : vector<8x8xf32>
    %133 = tpu.matmul %131, %132, %cst_58 {dimension_numbers = #tpu.dot_dimension_numbers<[1], [1], [0], [0], [0, 0, 1, 0], [], []>} : vector<8x8xbf16>, vector<8x8xbf16>, vector<8x8xf32> -> vector<8x8xf32>
    %cst_59 = arith.constant dense<0xFF800000> : vector<8xf32>
    %134 = vector.multi_reduction <maximumf>, %133, %cst_59 [1] : vector<8x8xf32> to vector<8xf32>
    %135 = vector.shape_cast %134 : vector<8xf32> to vector<8x1xf32>
    %136 = vector.broadcast %135 : vector<8x1xf32> to vector<8x8xf32>
    %137 = arith.subf %133, %136 : vector<8x8xf32>
    %138 = math.exp %137 : vector<8x8xf32>
    %cst_60 = arith.constant dense<0.000000e+00> : vector<8xf32>
    %139 = vector.multi_reduction <add>, %138, %cst_60 [1] : vector<8x8xf32> to vector<8xf32>
    %140 = vector.shape_cast %139 : vector<8xf32> to vector<8x1xf32>
    %141 = tpu.reciprocal %140 {approx = true} : vector<8x1xf32> -> vector<8x1xf32>
    %142 = vector.broadcast %141 : vector<8x1xf32> to vector<8x8xf32>
    %143 = arith.mulf %138, %142 : vector<8x8xf32>
    %144 = arith.truncf %143 : vector<8x8xf32> to vector<8x8xbf16>
    %145 = vector.extract_strided_slice %130 {offsets = [0, 0], sizes = [8, 8], strides = [1, 1]} : vector<8x32xbf16> to vector<8x8xbf16>
    %cst_61 = arith.constant dense<0.000000e+00> : vector<8x8xf32>
    %146 = tpu.matmul %144, %145, %cst_61 {dimension_numbers = #tpu.dot_dimension_numbers<[1], [0], [0], [1], [0, 0, 1, 1], [], []>} : vector<8x8xbf16>, vector<8x8xbf16>, vector<8x8xf32> -> vector<8x8xf32>
    %c0_62 = arith.constant 0 : index
    %c0_63 = arith.constant 0 : index
    %147 = vector.load %arg25[%c0_62, %c0_63] : memref<8x32xf32, #tpu.memory_space<vmem>>, vector<8x8xf32>
    tpu.vector_store %arg25[%c0_62, %c0_63], %146 {strides = array<i32>} : memref<8x32xf32, #tpu.memory_space<vmem>>, vector<8x8xf32>,
    %148 = vector.extract_strided_slice %128 {offsets = [0, 8], sizes = [8, 8], strides = [1, 1]} : vector<8x32xbf16> to vector<8x8xbf16>
    %149 = vector.extract_strided_slice %129 {offsets = [0, 8], sizes = [8, 8], strides = [1, 1]} : vector<8x32xbf16> to vector<8x8xbf16>
    %cst_64 = arith.constant dense<0.000000e+00> : vector<8x8xf32>
    %150 = tpu.matmul %148, %149, %cst_64 {dimension_numbers = #tpu.dot_dimension_numbers<[1], [1], [0], [0], [0, 0, 1, 0], [], []>} : vector<8x8xbf16>, vector<8x8xbf16>, vector<8x8xf32> -> vector<8x8xf32>
    %cst_65 = arith.constant dense<0xFF800000> : vector<8xf32>
    %151 = vector.multi_reduction <maximumf>, %150, %cst_65 [1] : vector<8x8xf32> to vector<8xf32>
    %152 = vector.shape_cast %151 : vector<8xf32> to vector<8x1xf32>
    %153 = vector.broadcast %152 : vector<8x1xf32> to vector<8x8xf32>
    %154 = arith.subf %150, %153 : vector<8x8xf32>
    %155 = math.exp %154 : vector<8x8xf32>
    %cst_66 = arith.constant dense<0.000000e+00> : vector<8xf32>
    %156 = vector.multi_reduction <add>, %155, %cst_66 [1] : vector<8x8xf32> to vector<8xf32>
    %157 = vector.shape_cast %156 : vector<8xf32> to vector<8x1xf32>
    %158 = tpu.reciprocal %157 {approx = true} : vector<8x1xf32> -> vector<8x1xf32>
    %159 = vector.broadcast %158 : vector<8x1xf32> to vector<8x8xf32>
    %160 = arith.mulf %155, %159 : vector<8x8xf32>
    %161 = arith.truncf %160 : vector<8x8xf32> to vector<8x8xbf16>
    %162 = vector.extract_strided_slice %130 {offsets = [0, 8], sizes = [8, 8], strides = [1, 1]} : vector<8x32xbf16> to vector<8x8xbf16>
    %cst_67 = arith.constant dense<0.000000e+00> : vector<8x8xf32>
    %163 = tpu.matmul %161, %162, %cst_67 {dimension_numbers = #tpu.dot_dimension_numbers<[1], [0], [0], [1], [0, 0, 1, 1], [], []>} : vector<8x8xbf16>, vector<8x8xbf16>, vector<8x8xf32> -> vector<8x8xf32>
    %c0_68 = arith.constant 0 : index
    %c8_69 = arith.constant 8 : index
    %164 = vector.load %arg25[%c0_68, %c8_69] : memref<8x32xf32, #tpu.memory_space<vmem>>, vector<8x8xf32>
    tpu.vector_store %arg25[%c0_68, %c8_69], %163 {strides = array<i32>} : memref<8x32xf32, #tpu.memory_space<vmem>>, vector<8x8xf32>,
    %165 = vector.extract_strided_slice %128 {offsets = [0, 16], sizes = [8, 8], strides = [1, 1]} : vector<8x32xbf16> to vector<8x8xbf16>
    %166 = vector.extract_strided_slice %129 {offsets = [0, 16], sizes = [8, 8], strides = [1, 1]} : vector<8x32xbf16> to vector<8x8xbf16>
    %cst_70 = arith.constant dense<0.000000e+00> : vector<8x8xf32>
    %167 = tpu.matmul %165, %166, %cst_70 {dimension_numbers = #tpu.dot_dimension_numbers<[1], [1], [0], [0], [0, 0, 1, 0], [], []>} : vector<8x8xbf16>, vector<8x8xbf16>, vector<8x8xf32> -> vector<8x8xf32>
    %cst_71 = arith.constant dense<0xFF800000> : vector<8xf32>
    %168 = vector.multi_reduction <maximumf>, %167, %cst_71 [1] : vector<8x8xf32> to vector<8xf32>
    %169 = vector.shape_cast %168 : vector<8xf32> to vector<8x1xf32>
    %170 = vector.broadcast %169 : vector<8x1xf32> to vector<8x8xf32>
    %171 = arith.subf %167, %170 : vector<8x8xf32>
    %172 = math.exp %171 : vector<8x8xf32>
    %cst_72 = arith.constant dense<0.000000e+00> : vector<8xf32>
    %173 = vector.multi_reduction <add>, %172, %cst_72 [1] : vector<8x8xf32> to vector<8xf32>
    %174 = vector.shape_cast %173 : vector<8xf32> to vector<8x1xf32>
    %175 = tpu.reciprocal %174 {approx = true} : vector<8x1xf32> -> vector<8x1xf32>
    %176 = vector.broadcast %175 : vector<8x1xf32> to vector<8x8xf32>
    %177 = arith.mulf %172, %176 : vector<8x8xf32>
    %178 = arith.truncf %177 : vector<8x8xf32> to vector<8x8xbf16>
    %179 = vector.extract_strided_slice %130 {offsets = [0, 16], sizes = [8, 8], strides = [1, 1]} : vector<8x32xbf16> to vector<8x8xbf16>
    %cst_73 = arith.constant dense<0.000000e+00> : vector<8x8xf32>
    %180 = tpu.matmul %178, %179, %cst_73 {dimension_numbers = #tpu.dot_dimension_numbers<[1], [0], [0], [1], [0, 0, 1, 1], [], []>} : vector<8x8xbf16>, vector<8x8xbf16>, vector<8x8xf32> -> vector<8x8xf32>
    %c0_74 = arith.constant 0 : index
    %c16_75 = arith.constant 16 : index
    %181 = vector.load %arg25[%c0_74, %c16_75] : memref<8x32xf32, #tpu.memory_space<vmem>>, vector<8x8xf32>
    tpu.vector_store %arg25[%c0_74, %c16_75], %180 {strides = array<i32>} : memref<8x32xf32, #tpu.memory_space<vmem>>, vector<8x8xf32>,
    %182 = vector.extract_strided_slice %128 {offsets = [0, 24], sizes = [8, 8], strides = [1, 1]} : vector<8x32xbf16> to vector<8x8xbf16>
    %183 = vector.extract_strided_slice %129 {offsets = [0, 24], sizes = [8, 8], strides = [1, 1]} : vector<8x32xbf16> to vector<8x8xbf16>
    %cst_76 = arith.constant dense<0.000000e+00> : vector<8x8xf32>
    %184 = tpu.matmul %182, %183, %cst_76 {dimension_numbers = #tpu.dot_dimension_numbers<[1], [1], [0], [0], [0, 0, 1, 0], [], []>} : vector<8x8xbf16>, vector<8x8xbf16>, vector<8x8xf32> -> vector<8x8xf32>
    %cst_77 = arith.constant dense<0xFF800000> : vector<8xf32>
    %185 = vector.multi_reduction <maximumf>, %184, %cst_77 [1] : vector<8x8xf32> to vector<8xf32>
    %186 = vector.shape_cast %185 : vector<8xf32> to vector<8x1xf32>
    %187 = vector.broadcast %186 : vector<8x1xf32> to vector<8x8xf32>
    %188 = arith.subf %184, %187 : vector<8x8xf32>
    %189 = math.exp %188 : vector<8x8xf32>
    %cst_78 = arith.constant dense<0.000000e+00> : vector<8xf32>
    %190 = vector.multi_reduction <add>, %189, %cst_78 [1] : vector<8x8xf32> to vector<8xf32>
    %191 = vector.shape_cast %190 : vector<8xf32> to vector<8x1xf32>
    %192 = tpu.reciprocal %191 {approx = true} : vector<8x1xf32> -> vector<8x1xf32>
    %193 = vector.broadcast %192 : vector<8x1xf32> to vector<8x8xf32>
    %194 = arith.mulf %189, %193 : vector<8x8xf32>
    %195 = arith.truncf %194 : vector<8x8xf32> to vector<8x8xbf16>
    %196 = vector.extract_strided_slice %130 {offsets = [0, 24], sizes = [8, 8], strides = [1, 1]} : vector<8x32xbf16> to vector<8x8xbf16>
    %cst_79 = arith.constant dense<0.000000e+00> : vector<8x8xf32>
    %197 = tpu.matmul %195, %196, %cst_79 {dimension_numbers = #tpu.dot_dimension_numbers<[1], [0], [0], [1], [0, 0, 1, 1], [], []>} : vector<8x8xbf16>, vector<8x8xbf16>, vector<8x8xf32> -> vector<8x8xf32>
    %c0_80 = arith.constant 0 : index
    %c24_81 = arith.constant 24 : index
    %198 = vector.load %arg25[%c0_80, %c24_81] : memref<8x32xf32, #tpu.memory_space<vmem>>, vector<8x8xf32>
    tpu.vector_store %arg25[%c0_80, %c24_81], %197 {strides = array<i32>} : memref<8x32xf32, #tpu.memory_space<vmem>>, vector<8x8xf32>,
    %c0_82 = arith.constant 0 : index
    %c0_83 = arith.constant 0 : index
    %199 = vector.load %arg25[%c0_82, %c0_83] : memref<8x32xf32, #tpu.memory_space<vmem>>, vector<8x32xf32>
    %200 = arith.truncf %199 : vector<8x32xf32> to vector<8x32xbf16>
    %cst_84 = arith.constant dense<0.000000e+00> : vector<8x32xf32>
    %201 = tpu.matmul %200, %127, %cst_84 {dimension_numbers = #tpu.dot_dimension_numbers<[1], [0], [0], [1], [0, 0, 1, 1], [], []>} : vector<8x32xbf16>, vector<32x32xbf16>, vector<8x32xf32> -> vector<8x32xf32>
    %c0_85 = arith.constant 0 : index
    %c0_86 = arith.constant 0 : index
    %202 = vector.load %arg15[%c0_85, %c0_86] : memref<1x32xf32, #tpu.memory_space<vmem>>, vector<1x32xf32>
    %203 = vector.broadcast %202 : vector<1x32xf32> to vector<8x32xf32>
    %204 = arith.addf %201, %203 : vector<8x32xf32>
    %205 = arith.addf %204, %120 : vector<8x32xf32>
    %c0_87 = arith.constant 0 : index
    %c0_88 = arith.constant 0 : index
    %206 = vector.load %arg16[%c0_87, %c0_88] : memref<1x32xf32, #tpu.memory_space<vmem>>, vector<1x32xf32>
    %c0_89 = arith.constant 0 : index
    %c0_90 = arith.constant 0 : index
    %207 = vector.load %arg17[%c0_89, %c0_90] : memref<1x32xf32, #tpu.memory_space<vmem>>, vector<1x32xf32>
    %cst_91 = arith.constant dense<0.000000e+00> : vector<8xf32>
    %208 = vector.multi_reduction <add>, %205, %cst_91 [1] : vector<8x32xf32> to vector<8xf32>
    %209 = vector.shape_cast %208 : vector<8xf32> to vector<8x1xf32>
    %cst_92 = arith.constant 3.200000e+01 : f32
    %210 = vector.broadcast %cst_92 : f32 to vector<8x1xf32>
    %211 = arith.divf %209, %210 : vector<8x1xf32>
    %212 = vector.broadcast %211 : vector<8x1xf32> to vector<8x32xf32>
    %213 = arith.subf %205, %212 : vector<8x32xf32>
    %214 = arith.mulf %213, %213 : vector<8x32xf32>
    %cst_93 = arith.constant dense<0.000000e+00> : vector<8xf32>
    %215 = vector.multi_reduction <add>, %214, %cst_93 [1] : vector<8x32xf32> to vector<8xf32>
    %216 = vector.shape_cast %215 : vector<8xf32> to vector<8x1xf32>
    %cst_94 = arith.constant 3.200000e+01 : f32
    %217 = vector.broadcast %cst_94 : f32 to vector<8x1xf32>
    %218 = arith.divf %216, %217 : vector<8x1xf32>
    %219 = vector.broadcast %211 : vector<8x1xf32> to vector<8x32xf32>
    %220 = arith.subf %205, %219 : vector<8x32xf32>
    %cst_95 = arith.constant 9.99999974E-6 : f32
    %221 = vector.broadcast %cst_95 : f32 to vector<8x1xf32>
    %222 = arith.addf %218, %221 : vector<8x1xf32>
    %223 = math.rsqrt %222 : vector<8x1xf32>
    %224 = vector.broadcast %223 : vector<8x1xf32> to vector<8x32xf32>
    %225 = arith.mulf %220, %224 : vector<8x32xf32>
    %226 = vector.broadcast %206 : vector<1x32xf32> to vector<8x32xf32>
    %227 = arith.mulf %225, %226 : vector<8x32xf32>
    %228 = vector.broadcast %207 : vector<1x32xf32> to vector<8x32xf32>
    %229 = arith.addf %227, %228 : vector<8x32xf32>
    %230 = arith.truncf %229 : vector<8x32xf32> to vector<8x32xbf16>
    %cst_96 = arith.constant 0.000000e+00 : f32
    %231 = vector.broadcast %cst_96 : f32 to vector<8x32xf32>
    %c0_97 = arith.constant 0 : index
    %c0_98 = arith.constant 0 : index
    %232 = vector.load %arg18[%c0_97, %c0_98] : memref<32x128xbf16, #tpu.memory_space<vmem>>, vector<32x128xbf16>
    %cst_99 = arith.constant dense<0.000000e+00> : vector<8x128xf32>
    %233 = tpu.matmul %230, %232, %cst_99 {dimension_numbers = #tpu.dot_dimension_numbers<[1], [0], [0], [1], [0, 0, 1, 1], [], []>} : vector<8x32xbf16>, vector<32x128xbf16>, vector<8x128xf32> -> vector<8x128xf32>
    %c0_100 = arith.constant 0 : index
    %c0_101 = arith.constant 0 : index
    %234 = vector.load %arg19[%c0_100, %c0_101] : memref<1x128xf32, #tpu.memory_space<vmem>>, vector<1x128xf32>
    %235 = vector.broadcast %234 : vector<1x128xf32> to vector<8x128xf32>
    %236 = arith.addf %233, %235 : vector<8x128xf32>
    %cst_102 = arith.constant 0.000000e+00 : f32
    %237 = vector.broadcast %cst_102 : f32 to vector<8x128xf32>
    %238 = arith.maximumf %236, %237 : vector<8x128xf32>
    %239 = arith.truncf %238 : vector<8x128xf32> to vector<8x128xbf16>
    %c0_103 = arith.constant 0 : index
    %c0_104 = arith.constant 0 : index
    %240 = vector.load %arg20[%c0_103, %c0_104] : memref<128x32xbf16, #tpu.memory_space<vmem>>, vector<128x32xbf16>
    %cst_105 = arith.constant dense<0.000000e+00> : vector<8x32xf32>
    %241 = tpu.matmul %239, %240, %cst_105 {dimension_numbers = #tpu.dot_dimension_numbers<[1], [0], [0], [1], [0, 0, 1, 1], [], []>} : vector<8x128xbf16>, vector<128x32xbf16>, vector<8x32xf32> -> vector<8x32xf32>
    %242 = arith.addf %231, %241 : vector<8x32xf32>
    %c0_106 = arith.constant 0 : index
    %c0_107 = arith.constant 0 : index
    %243 = vector.load %arg21[%c0_106, %c0_107] : memref<1x32xf32, #tpu.memory_space<vmem>>, vector<1x32xf32>
    %244 = vector.broadcast %243 : vector<1x32xf32> to vector<8x32xf32>
    %245 = arith.addf %242, %244 : vector<8x32xf32>
    %246 = arith.addf %245, %229 : vector<8x32xf32>
    %c0_108 = arith.constant 0 : index
    %c0_109 = arith.constant 0 : index
    %247 = vector.load %arg22[%c0_108, %c0_109] : memref<1x32xf32, #tpu.memory_space<vmem>>, vector<1x32xf32>
    %c0_110 = arith.constant 0 : index
    %c0_111 = arith.constant 0 : index
    %248 = vector.load %arg23[%c0_110, %c0_111] : memref<1x32xf32, #tpu.memory_space<vmem>>, vector<1x32xf32>
    %cst_112 = arith.constant dense<0.000000e+00> : vector<8xf32>
    %249 = vector.multi_reduction <add>, %246, %cst_112 [1] : vector<8x32xf32> to vector<8xf32>
    %250 = vector.shape_cast %249 : vector<8xf32> to vector<8x1xf32>
    %cst_113 = arith.constant 3.200000e+01 : f32
    %251 = vector.broadcast %cst_113 : f32 to vector<8x1xf32>
    %252 = arith.divf %250, %251 : vector<8x1xf32>
    %253 = vector.broadcast %252 : vector<8x1xf32> to vector<8x32xf32>
    %254 = arith.subf %246, %253 : vector<8x32xf32>
    %255 = arith.mulf %254, %254 : vector<8x32xf32>
    %cst_114 = arith.constant dense<0.000000e+00> : vector<8xf32>
    %256 = vector.multi_reduction <add>, %255, %cst_114 [1] : vector<8x32xf32> to vector<8xf32>
    %257 = vector.shape_cast %256 : vector<8xf32> to vector<8x1xf32>
    %cst_115 = arith.constant 3.200000e+01 : f32
    %258 = vector.broadcast %cst_115 : f32 to vector<8x1xf32>
    %259 = arith.divf %257, %258 : vector<8x1xf32>
    %260 = vector.broadcast %252 : vector<8x1xf32> to vector<8x32xf32>
    %261 = arith.subf %246, %260 : vector<8x32xf32>
    %cst_116 = arith.constant 9.99999974E-6 : f32
    %262 = vector.broadcast %cst_116 : f32 to vector<8x1xf32>
    %263 = arith.addf %259, %262 : vector<8x1xf32>
    %264 = math.rsqrt %263 : vector<8x1xf32>
    %265 = vector.broadcast %264 : vector<8x1xf32> to vector<8x32xf32>
    %266 = arith.mulf %261, %265 : vector<8x32xf32>
    %267 = vector.broadcast %247 : vector<1x32xf32> to vector<8x32xf32>
    %268 = arith.mulf %266, %267 : vector<8x32xf32>
    %269 = vector.broadcast %248 : vector<1x32xf32> to vector<8x32xf32>
    %270 = arith.addf %268, %269 : vector<8x32xf32>
    %c0_117 = arith.constant 0 : index
    %c0_118 = arith.constant 0 : index
    %c0_119 = arith.constant 0 : index
    %271 = vector.load %arg24[%c0_117, %c0_118, %c0_119] : memref<1x8x32xf32, #tpu.memory_space<vmem>>, vector<1x8x32xf32>
    %272 = vector.shape_cast %271 : vector<1x8x32xf32> to vector<8x32xf32>
    %273 = vector.shape_cast %270 : vector<8x32xf32> to vector<1x8x32xf32>
    tpu.vector_store %arg24[%c0_117, %c0_118, %c0_119], %273 {strides = array<i32>} : memref<1x8x32xf32, #tpu.memory_space<vmem>>, vector<1x8x32xf32>,
    return
  }
  func.func @transform_0(%arg0: i32, %arg1: i32) -> (i32, i32, i32) {
    %c0_i32 = arith.constant 0 : i32
    %c0_i32_0 = arith.constant 0 : i32
    return %arg0, %arg1, %c0_i32 : i32, i32, i32
  }
  func.func @transform_1(%arg0: i32, %arg1: i32) -> (i32, i32, i32) {
    %c0_i32 = arith.constant 0 : i32
    %c0_i32_0 = arith.constant 0 : i32
    %c0_i32_1 = arith.constant 0 : i32
    return %arg0, %c0_i32, %c0_i32_0 : i32, i32, i32
  }
  func.func @transform_2(%arg0: i32, %arg1: i32) -> (i32, i32, i32) {
    %c0_i32 = arith.constant 0 : i32
    %c0_i32_0 = arith.constant 0 : i32
    %c0_i32_1 = arith.constant 0 : i32
    return %arg0, %c0_i32, %c0_i32_0 : i32, i32, i32
  }
  func.func @transform_3(%arg0: i32, %arg1: i32) -> (i32, i32) {
    %c0_i32 = arith.constant 0 : i32
    %c0_i32_0 = arith.constant 0 : i32
    return %arg1, %c0_i32 : i32, i32
  }
  func.func @transform_4(%arg0: i32, %arg1: i32) -> (i32, i32) {
    %c0_i32 = arith.constant 0 : i32
    %c0_i32_0 = arith.constant 0 : i32
    %c0_i32_1 = arith.constant 0 : i32
    return %c0_i32, %c0_i32_0 : i32, i32
  }
  func.func @transform_5(%arg0: i32, %arg1: i32) -> (i32, i32) {
    %c0_i32 = arith.constant 0 : i32
    %c0_i32_0 = arith.constant 0 : i32
    %c0_i32_1 = arith.constant 0 : i32
    return %c0_i32, %c0_i32_0 : i32, i32
  }
  func.func @transform_6(%arg0: i32, %arg1: i32) -> (i32, i32) {
    %c0_i32 = arith.constant 0 : i32
    %c0_i32_0 = arith.constant 0 : i32
    %c0_i32_1 = arith.constant 0 : i32
    return %c0_i32, %c0_i32_0 : i32, i32
  }
  func.func @transform_7(%arg0: i32, %arg1: i32) -> (i32, i32) {
    %c0_i32 = arith.constant 0 : i32
    %c0_i32_0 = arith.constant 0 : i32
    %c0_i32_1 = arith.constant 0 : i32
    return %c0_i32, %c0_i32_0 : i32, i32
  }
  func.func @transform_8(%arg0: i32, %arg1: i32) -> (i32, i32) {
    %c0_i32 = arith.constant 0 : i32
    %c0_i32_0 = arith.constant 0 : i32
    %c0_i32_1 = arith.constant 0 : i32
    return %c0_i32, %c0_i32_0 : i32, i32
  }
  func.func @transform_9(%arg0: i32, %arg1: i32) -> (i32, i32) {
    %c0_i32 = arith.constant 0 : i32
    %c0_i32_0 = arith.constant 0 : i32
    %c0_i32_1 = arith.constant 0 : i32
    return %c0_i32, %c0_i32_0 : i32, i32
  }
  func.func @transform_10(%arg0: i32, %arg1: i32) -> (i32, i32) {
    %c0_i32 = arith.constant 0 : i32
    %c0_i32_0 = arith.constant 0 : i32
    %c0_i32_1 = arith.constant 0 : i32
    return %c0_i32, %c0_i32_0 : i32, i32
  }
  func.func @transform_11(%arg0: i32, %arg1: i32) -> (i32, i32) {
    %c0_i32 = arith.constant 0 : i32
    %c0_i32_0 = arith.constant 0 : i32
    %c0_i32_1 = arith.constant 0 : i32
    return %c0_i32, %c0_i32_0 : i32, i32
  }
  func.func @transform_12(%arg0: i32, %arg1: i32) -> (i32, i32) {
    %c0_i32 = arith.constant 0 : i32
    %c0_i32_0 = arith.constant 0 : i32
    %c0_i32_1 = arith.constant 0 : i32
    return %c0_i32, %c0_i32_0 : i32, i32
  }
  func.func @transform_13(%arg0: i32, %arg1: i32) -> (i32, i32) {
    %c0_i32 = arith.constant 0 : i32
    %c0_i32_0 = arith.constant 0 : i32
    %c0_i32_1 = arith.constant 0 : i32
    return %c0_i32, %c0_i32_0 : i32, i32
  }
  func.func @transform_14(%arg0: i32, %arg1: i32) -> (i32, i32) {
    %c0_i32 = arith.constant 0 : i32
    %c0_i32_0 = arith.constant 0 : i32
    %c0_i32_1 = arith.constant 0 : i32
    return %c0_i32, %c0_i32_0 : i32, i32
  }
  func.func @transform_15(%arg0: i32, %arg1: i32) -> (i32, i32) {
    %c0_i32 = arith.constant 0 : i32
    %c0_i32_0 = arith.constant 0 : i32
    %c0_i32_1 = arith.constant 0 : i32
    return %c0_i32, %c0_i32_0 : i32, i32
  }
  func.func @transform_16(%arg0: i32, %arg1: i32) -> (i32, i32) {
    %c0_i32 = arith.constant 0 : i32
    %c0_i32_0 = arith.constant 0 : i32
    %c0_i32_1 = arith.constant 0 : i32
    return %c0_i32, %c0_i32_0 : i32, i32
  }
  func.func @transform_17(%arg0: i32, %arg1: i32) -> (i32, i32) {
    %c0_i32 = arith.constant 0 : i32
    %c0_i32_0 = arith.constant 0 : i32
    %c0_i32_1 = arith.constant 0 : i32
    return %c0_i32, %c0_i32_0 : i32, i32
  }
  func.func @transform_18(%arg0: i32, %arg1: i32) -> (i32, i32) {
    %c0_i32 = arith.constant 0 : i32
    %c0_i32_0 = arith.constant 0 : i32
    %c0_i32_1 = arith.constant 0 : i32
    return %c0_i32, %c0_i32_0 : i32, i32
  }
  func.func @transform_19(%arg0: i32, %arg1: i32) -> (i32, i32) {
    %c0_i32 = arith.constant 0 : i32
    %c0_i32_0 = arith.constant 0 : i32
    %c0_i32_1 = arith.constant 0 : i32
    return %c0_i32, %c0_i32_0 : i32, i32
  }
  func.func @transform_20(%arg0: i32, %arg1: i32) -> (i32, i32) {
    %c0_i32 = arith.constant 0 : i32
    %c0_i32_0 = arith.constant 0 : i32
    %c0_i32_1 = arith.constant 0 : i32
    return %c0_i32, %c0_i32_0 : i32, i32
  }
  func.func @transform_21(%arg0: i32, %arg1: i32) -> (i32, i32) {
    %c0_i32 = arith.constant 0 : i32
    %c0_i32_0 = arith.constant 0 : i32
    %c0_i32_1 = arith.constant 0 : i32
    return %c0_i32, %c0_i32_0 : i32, i32
  }
  func.func @transform_22(%arg0: i32, %arg1: i32) -> (i32, i32, i32) {
    %c0_i32 = arith.constant 0 : i32
    %c0_i32_0 = arith.constant 0 : i32
    return %arg0, %arg1, %c0_i32 : i32, i32, i32
  }
}

module attributes {stable_mosaic.version = 11 : i64} {
  func.func @decoder_block_kernel(%arg0: i32, %arg1: i32, %arg2: memref<1x8x32xf32, #tpu.memory_space<vmem>>, %arg3: memref<1x8x64xbf16, #tpu.memory_space<vmem>>, %arg4: memref<1x8x64xbf16, #tpu.memory_space<vmem>>, %arg5: memref<8x8xbf16, #tpu.memory_space<vmem>>, %arg6: memref<32x32xbf16, #tpu.memory_space<vmem>>, %arg7: memref<1x32xf32, #tpu.memory_space<vmem>>, %arg8: memref<32x32xbf16, #tpu.memory_space<vmem>>, %arg9: memref<1x32xf32, #tpu.memory_space<vmem>>, %arg10: memref<1x32xf32, #tpu.memory_space<vmem>>, %arg11: memref<1x32xf32, #tpu.memory_space<vmem>>, %arg12: memref<32x32xbf16, #tpu.memory_space<vmem>>, %arg13: memref<1x32xf32, #tpu.memory_space<vmem>>, %arg14: memref<32x32xbf16, #tpu.memory_space<vmem>>, %arg15: memref<1x32xf32, #tpu.memory_space<vmem>>, %arg16: memref<1x32xf32, #tpu.memory_space<vmem>>, %arg17: memref<1x32xf32, #tpu.memory_space<vmem>>, %arg18: memref<32x128xbf16, #tpu.memory_space<vmem>>, %arg19: memref<1x128xf32, #tpu.memory_space<vmem>>, %arg20: memref<128x32xbf16, #tpu.memory_space<vmem>>, %arg21: memref<1x32xf32, #tpu.memory_space<vmem>>, %arg22: memref<1x32xf32, #tpu.memory_space<vmem>>, %arg23: memref<1x32xf32, #tpu.memory_space<vmem>>, %arg24: memref<1x8x32xf32, #tpu.memory_space<vmem>>, %arg25: memref<8x32xf32, #tpu.memory_space<vmem>>) attributes {dimension_semantics = [#tpu.dimension_semantics<parallel>, #tpu.dimension_semantics<parallel>], iteration_bounds = array<i64: 2, 1>, scalar_prefetch = 0 : i64, scratch_operands = 1 : i64, tpu.core_type = #tpu.core_type<tc>, window_params = [{transform_indices = @transform_0, window_bounds = array<i64: 1, 8, 32>}, {transform_indices = @transform_1, window_bounds = array<i64: 1, 8, 64>}, {transform_indices = @transform_2, window_bounds = array<i64: 1, 8, 64>}, {transform_indices = @transform_3, window_bounds = array<i64: 8, 8>}, {pipeline_mode = #tpu.pipeline_mode<synchronous>, transform_indices = @transform_4, window_bounds = array<i64: 32, 32>}, {pipeline_mode = #tpu.pipeline_mode<synchronous>, transform_indices = @transform_5, window_bounds = array<i64: 1, 32>}, {pipeline_mode = #tpu.pipeline_mode<synchronous>, transform_indices = @transform_6, window_bounds = array<i64: 32, 32>}, {pipeline_mode = #tpu.pipeline_mode<synchronous>, transform_indices = @transform_7, window_bounds = array<i64: 1, 32>}, {pipeline_mode = #tpu.pipeline_mode<synchronous>, transform_indices = @transform_8, window_bounds = array<i64: 1, 32>}, {pipeline_mode = #tpu.pipeline_mode<synchronous>, transform_indices = @transform_9, window_bounds = array<i64: 1, 32>}, {pipeline_mode = #tpu.pipeline_mode<synchronous>, transform_indices = @transform_10, window_bounds = array<i64: 32, 32>}, {pipeline_mode = #tpu.pipeline_mode<synchronous>, transform_indices = @transform_11, window_bounds = array<i64: 1, 32>}, {pipeline_mode = #tpu.pipeline_mode<synchronous>, transform_indices = @transform_12, window_bounds = array<i64: 32, 32>}, {pipeline_mode = #tpu.pipeline_mode<synchronous>, transform_indices = @transform_13, window_bounds = array<i64: 1, 32>}, {pipeline_mode = #tpu.pipeline_mode<synchronous>, transform_indices = @transform_14, window_bounds = array<i64: 1, 32>}, {pipeline_mode = #tpu.pipeline_mode<synchronous>, transform_indices = @transform_15, window_bounds = array<i64: 1, 32>}, {pipeline_mode = #tpu.pipeline_mode<synchronous>, transform_indices = @transform_16, window_bounds = array<i64: 32, 128>}, {pipeline_mode = #tpu.pipeline_mode<synchronous>, transform_indices = @transform_17, window_bounds = array<i64: 1, 128>}, {pipeline_mode = #tpu.pipeline_mode<synchronous>, transform_indices = @transform_18, window_bounds = array<i64: 128, 32>}, {pipeline_mode = #tpu.pipeline_mode<synchronous>, transform_indices = @transform_19, window_bounds = array<i64: 1, 32>}, {pipeline_mode = #tpu.pipeline_mode<synchronous>, transform_indices = @transform_20, window_bounds = array<i64: 1, 32>}, {pipeline_mode = #tpu.pipeline_mode<synchronous>, transform_indices = @transform_21, window_bounds = array<i64: 1, 32>}, {transform_indices = @transform_22, window_bounds = array<i64: 1, 8, 32>}]} {
    %c0 = arith.constant 0 : index
    %c0_0 = arith.constant 0 : index
    %c0_1 = arith.constant 0 : index
    %0 = vector.load %arg2[%c0, %c0_0, %c0_1] : memref<1x8x32xf32, #tpu.memory_space<vmem>>, vector<1x8x32xf32>
    %1 = vector.shape_cast %0 : vector<1x8x32xf32> to vector<8x32xf32>
    %c0_2 = arith.constant 0 : index
    %c0_3 = arith.constant 0 : index
    %c0_4 = arith.constant 0 : index
    %2 = vector.load %arg3[%c0_2, %c0_3, %c0_4] : memref<1x8x64xbf16, #tpu.memory_space<vmem>>, vector<1x8x64xbf16>
    %3 = vector.shape_cast %2 : vector<1x8x64xbf16> to vector<8x64xbf16>
    %c0_5 = arith.constant 0 : index
    %c0_6 = arith.constant 0 : index
    %c0_7 = arith.constant 0 : index
    %4 = vector.load %arg4[%c0_5, %c0_6, %c0_7] : memref<1x8x64xbf16, #tpu.memory_space<vmem>>, vector<1x8x64xbf16>
    %5 = vector.shape_cast %4 : vector<1x8x64xbf16> to vector<8x64xbf16>
    %c0_8 = arith.constant 0 : index
    %c0_9 = arith.constant 0 : index
    %6 = vector.load %arg5[%c0_8, %c0_9] : memref<8x8xbf16, #tpu.memory_space<vmem>>, vector<8x8xbf16>
    %7 = arith.extf %6 : vector<8x8xbf16> to vector<8x8xf32>
    %8 = arith.truncf %1 : vector<8x32xf32> to vector<8x32xbf16>
    %c0_10 = arith.constant 0 : index
    %c0_11 = arith.constant 0 : index
    %9 = vector.load %arg6[%c0_10, %c0_11] : memref<32x32xbf16, #tpu.memory_space<vmem>>, vector<32x32xbf16>
    %cst = arith.constant dense<0.000000e+00> : vector<8x32xf32>
    %10 = tpu.matmul %8, %9, %cst {dimension_numbers = #tpu.dot_dimension_numbers<[1], [0], [0], [1], [0, 0, 1, 1], [], []>} : vector<8x32xbf16>, vector<32x32xbf16>, vector<8x32xf32> -> vector<8x32xf32>
    %c0_12 = arith.constant 0 : index
    %c0_13 = arith.constant 0 : index
    %11 = vector.load %arg7[%c0_12, %c0_13] : memref<1x32xf32, #tpu.memory_space<vmem>>, vector<1x32xf32>
    %12 = vector.broadcast %11 : vector<1x32xf32> to vector<8x32xf32>
    %13 = arith.addf %10, %12 : vector<8x32xf32>
    %c0_14 = arith.constant 0 : index
    %c0_15 = arith.constant 0 : index
    %14 = vector.load %arg8[%c0_14, %c0_15] : memref<32x32xbf16, #tpu.memory_space<vmem>>, vector<32x32xbf16>
    %15 = arith.truncf %13 : vector<8x32xf32> to vector<8x32xbf16>
    %16 = vector.extract_strided_slice %3 {offsets = [0, 0], sizes = [8, 32], strides = [1, 1]} : vector<8x64xbf16> to vector<8x32xbf16>
    %17 = vector.extract_strided_slice %3 {offsets = [0, 32], sizes = [8, 32], strides = [1, 1]} : vector<8x64xbf16> to vector<8x32xbf16>
    %18 = vector.extract_strided_slice %15 {offsets = [0, 0], sizes = [8, 8], strides = [1, 1]} : vector<8x32xbf16> to vector<8x8xbf16>
    %19 = vector.extract_strided_slice %16 {offsets = [0, 0], sizes = [8, 8], strides = [1, 1]} : vector<8x32xbf16> to vector<8x8xbf16>
    %cst_16 = arith.constant dense<0.000000e+00> : vector<8x8xf32>
    %20 = tpu.matmul %18, %19, %cst_16 {dimension_numbers = #tpu.dot_dimension_numbers<[1], [1], [0], [0], [0, 0, 1, 0], [], []>} : vector<8x8xbf16>, vector<8x8xbf16>, vector<8x8xf32> -> vector<8x8xf32>
    %21 = arith.addf %20, %7 : vector<8x8xf32>
    %cst_17 = arith.constant dense<0xFF800000> : vector<8xf32>
    %22 = vector.multi_reduction <maximumf>, %21, %cst_17 [1] : vector<8x8xf32> to vector<8xf32>
    %23 = vector.shape_cast %22 : vector<8xf32> to vector<8x1xf32>
    %24 = vector.broadcast %23 : vector<8x1xf32> to vector<8x8xf32>
    %25 = arith.subf %21, %24 : vector<8x8xf32>
    %26 = math.exp %25 : vector<8x8xf32>
    %cst_18 = arith.constant dense<0.000000e+00> : vector<8xf32>
    %27 = vector.multi_reduction <add>, %26, %cst_18 [1] : vector<8x8xf32> to vector<8xf32>
    %28 = vector.shape_cast %27 : vector<8xf32> to vector<8x1xf32>
    %29 = tpu.reciprocal %28 {approx = true} : vector<8x1xf32> -> vector<8x1xf32>
    %30 = vector.broadcast %29 : vector<8x1xf32> to vector<8x8xf32>
    %31 = arith.mulf %26, %30 : vector<8x8xf32>
    %32 = arith.truncf %31 : vector<8x8xf32> to vector<8x8xbf16>
    %33 = vector.extract_strided_slice %17 {offsets = [0, 0], sizes = [8, 8], strides = [1, 1]} : vector<8x32xbf16> to vector<8x8xbf16>
    %cst_19 = arith.constant dense<0.000000e+00> : vector<8x8xf32>
    %34 = tpu.matmul %32, %33, %cst_19 {dimension_numbers = #tpu.dot_dimension_numbers<[1], [0], [0], [1], [0, 0, 1, 1], [], []>} : vector<8x8xbf16>, vector<8x8xbf16>, vector<8x8xf32> -> vector<8x8xf32>
    %c0_20 = arith.constant 0 : index
    %c0_21 = arith.constant 0 : index
    %35 = vector.load %arg25[%c0_20, %c0_21] : memref<8x32xf32, #tpu.memory_space<vmem>>, vector<8x8xf32>
    tpu.vector_store %arg25[%c0_20, %c0_21], %34 {strides = array<i32>} : memref<8x32xf32, #tpu.memory_space<vmem>>, vector<8x8xf32>,
    %36 = vector.extract_strided_slice %15 {offsets = [0, 8], sizes = [8, 8], strides = [1, 1]} : vector<8x32xbf16> to vector<8x8xbf16>
    %37 = vector.extract_strided_slice %16 {offsets = [0, 8], sizes = [8, 8], strides = [1, 1]} : vector<8x32xbf16> to vector<8x8xbf16>
    %cst_22 = arith.constant dense<0.000000e+00> : vector<8x8xf32>
    %38 = tpu.matmul %36, %37, %cst_22 {dimension_numbers = #tpu.dot_dimension_numbers<[1], [1], [0], [0], [0, 0, 1, 0], [], []>} : vector<8x8xbf16>, vector<8x8xbf16>, vector<8x8xf32> -> vector<8x8xf32>
    %39 = arith.addf %38, %7 : vector<8x8xf32>
    %cst_23 = arith.constant dense<0xFF800000> : vector<8xf32>
    %40 = vector.multi_reduction <maximumf>, %39, %cst_23 [1] : vector<8x8xf32> to vector<8xf32>
    %41 = vector.shape_cast %40 : vector<8xf32> to vector<8x1xf32>
    %42 = vector.broadcast %41 : vector<8x1xf32> to vector<8x8xf32>
    %43 = arith.subf %39, %42 : vector<8x8xf32>
    %44 = math.exp %43 : vector<8x8xf32>
    %cst_24 = arith.constant dense<0.000000e+00> : vector<8xf32>
    %45 = vector.multi_reduction <add>, %44, %cst_24 [1] : vector<8x8xf32> to vector<8xf32>
    %46 = vector.shape_cast %45 : vector<8xf32> to vector<8x1xf32>
    %47 = tpu.reciprocal %46 {approx = true} : vector<8x1xf32> -> vector<8x1xf32>
    %48 = vector.broadcast %47 : vector<8x1xf32> to vector<8x8xf32>
    %49 = arith.mulf %44, %48 : vector<8x8xf32>
    %50 = arith.truncf %49 : vector<8x8xf32> to vector<8x8xbf16>
    %51 = vector.extract_strided_slice %17 {offsets = [0, 8], sizes = [8, 8], strides = [1, 1]} : vector<8x32xbf16> to vector<8x8xbf16>
    %cst_25 = arith.constant dense<0.000000e+00> : vector<8x8xf32>
    %52 = tpu.matmul %50, %51, %cst_25 {dimension_numbers = #tpu.dot_dimension_numbers<[1], [0], [0], [1], [0, 0, 1, 1], [], []>} : vector<8x8xbf16>, vector<8x8xbf16>, vector<8x8xf32> -> vector<8x8xf32>
    %c0_26 = arith.constant 0 : index
    %c8 = arith.constant 8 : index
    %53 = vector.load %arg25[%c0_26, %c8] : memref<8x32xf32, #tpu.memory_space<vmem>>, vector<8x8xf32>
    tpu.vector_store %arg25[%c0_26, %c8], %52 {strides = array<i32>} : memref<8x32xf32, #tpu.memory_space<vmem>>, vector<8x8xf32>,
    %54 = vector.extract_strided_slice %15 {offsets = [0, 16], sizes = [8, 8], strides = [1, 1]} : vector<8x32xbf16> to vector<8x8xbf16>
    %55 = vector.extract_strided_slice %16 {offsets = [0, 16], sizes = [8, 8], strides = [1, 1]} : vector<8x32xbf16> to vector<8x8xbf16>
    %cst_27 = arith.constant dense<0.000000e+00> : vector<8x8xf32>
    %56 = tpu.matmul %54, %55, %cst_27 {dimension_numbers = #tpu.dot_dimension_numbers<[1], [1], [0], [0], [0, 0, 1, 0], [], []>} : vector<8x8xbf16>, vector<8x8xbf16>, vector<8x8xf32> -> vector<8x8xf32>
    %57 = arith.addf %56, %7 : vector<8x8xf32>
    %cst_28 = arith.constant dense<0xFF800000> : vector<8xf32>
    %58 = vector.multi_reduction <maximumf>, %57, %cst_28 [1] : vector<8x8xf32> to vector<8xf32>
    %59 = vector.shape_cast %58 : vector<8xf32> to vector<8x1xf32>
    %60 = vector.broadcast %59 : vector<8x1xf32> to vector<8x8xf32>
    %61 = arith.subf %57, %60 : vector<8x8xf32>
    %62 = math.exp %61 : vector<8x8xf32>
    %cst_29 = arith.constant dense<0.000000e+00> : vector<8xf32>
    %63 = vector.multi_reduction <add>, %62, %cst_29 [1] : vector<8x8xf32> to vector<8xf32>
    %64 = vector.shape_cast %63 : vector<8xf32> to vector<8x1xf32>
    %65 = tpu.reciprocal %64 {approx = true} : vector<8x1xf32> -> vector<8x1xf32>
    %66 = vector.broadcast %65 : vector<8x1xf32> to vector<8x8xf32>
    %67 = arith.mulf %62, %66 : vector<8x8xf32>
    %68 = arith.truncf %67 : vector<8x8xf32> to vector<8x8xbf16>
    %69 = vector.extract_strided_slice %17 {offsets = [0, 16], sizes = [8, 8], strides = [1, 1]} : vector<8x32xbf16> to vector<8x8xbf16>
    %cst_30 = arith.constant dense<0.000000e+00> : vector<8x8xf32>
    %70 = tpu.matmul %68, %69, %cst_30 {dimension_numbers = #tpu.dot_dimension_numbers<[1], [0], [0], [1], [0, 0, 1, 1], [], []>} : vector<8x8xbf16>, vector<8x8xbf16>, vector<8x8xf32> -> vector<8x8xf32>
    %c0_31 = arith.constant 0 : index
    %c16 = arith.constant 16 : index
    %71 = vector.load %arg25[%c0_31, %c16] : memref<8x32xf32, #tpu.memory_space<vmem>>, vector<8x8xf32>
    tpu.vector_store %arg25[%c0_31, %c16], %70 {strides = array<i32>} : memref<8x32xf32, #tpu.memory_space<vmem>>, vector<8x8xf32>,
    %72 = vector.extract_strided_slice %15 {offsets = [0, 24], sizes = [8, 8], strides = [1, 1]} : vector<8x32xbf16> to vector<8x8xbf16>
    %73 = vector.extract_strided_slice %16 {offsets = [0, 24], sizes = [8, 8], strides = [1, 1]} : vector<8x32xbf16> to vector<8x8xbf16>
    %cst_32 = arith.constant dense<0.000000e+00> : vector<8x8xf32>
    %74 = tpu.matmul %72, %73, %cst_32 {dimension_numbers = #tpu.dot_dimension_numbers<[1], [1], [0], [0], [0, 0, 1, 0], [], []>} : vector<8x8xbf16>, vector<8x8xbf16>, vector<8x8xf32> -> vector<8x8xf32>
    %75 = arith.addf %74, %7 : vector<8x8xf32>
    %cst_33 = arith.constant dense<0xFF800000> : vector<8xf32>
    %76 = vector.multi_reduction <maximumf>, %75, %cst_33 [1] : vector<8x8xf32> to vector<8xf32>
    %77 = vector.shape_cast %76 : vector<8xf32> to vector<8x1xf32>
    %78 = vector.broadcast %77 : vector<8x1xf32> to vector<8x8xf32>
    %79 = arith.subf %75, %78 : vector<8x8xf32>
    %80 = math.exp %79 : vector<8x8xf32>
    %cst_34 = arith.constant dense<0.000000e+00> : vector<8xf32>
    %81 = vector.multi_reduction <add>, %80, %cst_34 [1] : vector<8x8xf32> to vector<8xf32>
    %82 = vector.shape_cast %81 : vector<8xf32> to vector<8x1xf32>
    %83 = tpu.reciprocal %82 {approx = true} : vector<8x1xf32> -> vector<8x1xf32>
    %84 = vector.broadcast %83 : vector<8x1xf32> to vector<8x8xf32>
    %85 = arith.mulf %80, %84 : vector<8x8xf32>
    %86 = arith.truncf %85 : vector<8x8xf32> to vector<8x8xbf16>
    %87 = vector.extract_strided_slice %17 {offsets = [0, 24], sizes = [8, 8], strides = [1, 1]} : vector<8x32xbf16> to vector<8x8xbf16>
    %cst_35 = arith.constant dense<0.000000e+00> : vector<8x8xf32>
    %88 = tpu.matmul %86, %87, %cst_35 {dimension_numbers = #tpu.dot_dimension_numbers<[1], [0], [0], [1], [0, 0, 1, 1], [], []>} : vector<8x8xbf16>, vector<8x8xbf16>, vector<8x8xf32> -> vector<8x8xf32>
    %c0_36 = arith.constant 0 : index
    %c24 = arith.constant 24 : index
    %89 = vector.load %arg25[%c0_36, %c24] : memref<8x32xf32, #tpu.memory_space<vmem>>, vector<8x8xf32>
    tpu.vector_store %arg25[%c0_36, %c24], %88 {strides = array<i32>} : memref<8x32xf32, #tpu.memory_space<vmem>>, vector<8x8xf32>,
    %c0_37 = arith.constant 0 : index
    %c0_38 = arith.constant 0 : index
    %90 = vector.load %arg25[%c0_37, %c0_38] : memref<8x32xf32, #tpu.memory_space<vmem>>, vector<8x32xf32>
    %91 = arith.truncf %90 : vector<8x32xf32> to vector<8x32xbf16>
    %cst_39 = arith.constant dense<0.000000e+00> : vector<8x32xf32>
    %92 = tpu.matmul %91, %14, %cst_39 {dimension_numbers = #tpu.dot_dimension_numbers<[1], [0], [0], [1], [0, 0, 1, 1], [], []>} : vector<8x32xbf16>, vector<32x32xbf16>, vector<8x32xf32> -> vector<8x32xf32>
    %c0_40 = arith.constant 0 : index
    %c0_41 = arith.constant 0 : index
    %93 = vector.load %arg9[%c0_40, %c0_41] : memref<1x32xf32, #tpu.memory_space<vmem>>, vector<1x32xf32>
    %94 = vector.broadcast %93 : vector<1x32xf32> to vector<8x32xf32>
    %95 = arith.addf %92, %94 : vector<8x32xf32>
    %96 = arith.addf %95, %1 : vector<8x32xf32>
    %c0_42 = arith.constant 0 : index
    %c0_43 = arith.constant 0 : index
    %97 = vector.load %arg10[%c0_42, %c0_43] : memref<1x32xf32, #tpu.memory_space<vmem>>, vector<1x32xf32>
    %c0_44 = arith.constant 0 : index
    %c0_45 = arith.constant 0 : index
    %98 = vector.load %arg11[%c0_44, %c0_45] : memref<1x32xf32, #tpu.memory_space<vmem>>, vector<1x32xf32>
    %cst_46 = arith.constant dense<0.000000e+00> : vector<8xf32>
    %99 = vector.multi_reduction <add>, %96, %cst_46 [1] : vector<8x32xf32> to vector<8xf32>
    %100 = vector.shape_cast %99 : vector<8xf32> to vector<8x1xf32>
    %cst_47 = arith.constant 3.200000e+01 : f32
    %101 = vector.broadcast %cst_47 : f32 to vector<8x1xf32>
    %102 = arith.divf %100, %101 : vector<8x1xf32>
    %103 = vector.broadcast %102 : vector<8x1xf32> to vector<8x32xf32>
    %104 = arith.subf %96, %103 : vector<8x32xf32>
    %105 = arith.mulf %104, %104 : vector<8x32xf32>
    %cst_48 = arith.constant dense<0.000000e+00> : vector<8xf32>
    %106 = vector.multi_reduction <add>, %105, %cst_48 [1] : vector<8x32xf32> to vector<8xf32>
    %107 = vector.shape_cast %106 : vector<8xf32> to vector<8x1xf32>
    %cst_49 = arith.constant 3.200000e+01 : f32
    %108 = vector.broadcast %cst_49 : f32 to vector<8x1xf32>
    %109 = arith.divf %107, %108 : vector<8x1xf32>
    %110 = vector.broadcast %102 : vector<8x1xf32> to vector<8x32xf32>
    %111 = arith.subf %96, %110 : vector<8x32xf32>
    %cst_50 = arith.constant 9.99999974E-6 : f32
    %112 = vector.broadcast %cst_50 : f32 to vector<8x1xf32>
    %113 = arith.addf %109, %112 : vector<8x1xf32>
    %114 = math.rsqrt %113 : vector<8x1xf32>
    %115 = vector.broadcast %114 : vector<8x1xf32> to vector<8x32xf32>
    %116 = arith.mulf %111, %115 : vector<8x32xf32>
    %117 = vector.broadcast %97 : vector<1x32xf32> to vector<8x32xf32>
    %118 = arith.mulf %116, %117 : vector<8x32xf32>
    %119 = vector.broadcast %98 : vector<1x32xf32> to vector<8x32xf32>
    %120 = arith.addf %118, %119 : vector<8x32xf32>
    %121 = arith.truncf %120 : vector<8x32xf32> to vector<8x32xbf16>
    %c0_51 = arith.constant 0 : index
    %c0_52 = arith.constant 0 : index
    %122 = vector.load %arg12[%c0_51, %c0_52] : memref<32x32xbf16, #tpu.memory_space<vmem>>, vector<32x32xbf16>
    %cst_53 = arith.constant dense<0.000000e+00> : vector<8x32xf32>
    %123 = tpu.matmul %121, %122, %cst_53 {dimension_numbers = #tpu.dot_dimension_numbers<[1], [0], [0], [1], [0, 0, 1, 1], [], []>} : vector<8x32xbf16>, vector<32x32xbf16>, vector<8x32xf32> -> vector<8x32xf32>
    %c0_54 = arith.constant 0 : index
    %c0_55 = arith.constant 0 : index
    %124 = vector.load %arg13[%c0_54, %c0_55] : memref<1x32xf32, #tpu.memory_space<vmem>>, vector<1x32xf32>
    %125 = vector.broadcast %124 : vector<1x32xf32> to vector<8x32xf32>
    %126 = arith.addf %123, %125 : vector<8x32xf32>
    %c0_56 = arith.constant 0 : index
    %c0_57 = arith.constant 0 : index
    %127 = vector.load %arg14[%c0_56, %c0_57] : memref<32x32xbf16, #tpu.memory_space<vmem>>, vector<32x32xbf16>
    %128 = arith.truncf %126 : vector<8x32xf32> to vector<8x32xbf16>
    %129 = vector.extract_strided_slice %5 {offsets = [0, 0], sizes = [8, 32], strides = [1, 1]} : vector<8x64xbf16> to vector<8x32xbf16>
    %130 = vector.extract_strided_slice %5 {offsets = [0, 32], sizes = [8, 32], strides = [1, 1]} : vector<8x64xbf16> to vector<8x32xbf16>
    %131 = vector.extract_strided_slice %128 {offsets = [0, 0], sizes = [8, 8], strides = [1, 1]} : vector<8x32xbf16> to vector<8x8xbf16>
    %132 = vector.extract_strided_slice %129 {offsets = [0, 0], sizes = [8, 8], strides = [1, 1]} : vector<8x32xbf16> to vector<8x8xbf16>
    %cst_58 = arith.constant dense<0.000000e+00> : vector<8x8xf32>
    %133 = tpu.matmul %131, %132, %cst_58 {dimension_numbers = #tpu.dot_dimension_numbers<[1], [1], [0], [0], [0, 0, 1, 0], [], []>} : vector<8x8xbf16>, vector<8x8xbf16>, vector<8x8xf32> -> vector<8x8xf32>
    %cst_59 = arith.constant dense<0xFF800000> : vector<8xf32>
    %134 = vector.multi_reduction <maximumf>, %133, %cst_59 [1] : vector<8x8xf32> to vector<8xf32>
    %135 = vector.shape_cast %134 : vector<8xf32> to vector<8x1xf32>
    %136 = vector.broadcast %135 : vector<8x1xf32> to vector<8x8xf32>
    %137 = arith.subf %133, %136 : vector<8x8xf32>
    %138 = math.exp %137 : vector<8x8xf32>
    %cst_60 = arith.constant dense<0.000000e+00> : vector<8xf32>
    %139 = vector.multi_reduction <add>, %138, %cst_60 [1] : vector<8x8xf32> to vector<8xf32>
    %140 = vector.shape_cast %139 : vector<8xf32> to vector<8x1xf32>
    %141 = tpu.reciprocal %140 {approx = true} : vector<8x1xf32> -> vector<8x1xf32>
    %142 = vector.broadcast %141 : vector<8x1xf32> to vector<8x8xf32>
    %143 = arith.mulf %138, %142 : vector<8x8xf32>
    %144 = arith.truncf %143 : vector<8x8xf32> to vector<8x8xbf16>
    %145 = vector.extract_strided_slice %130 {offsets = [0, 0], sizes = [8, 8], strides = [1, 1]} : vector<8x32xbf16> to vector<8x8xbf16>
    %cst_61 = arith.constant dense<0.000000e+00> : vector<8x8xf32>
    %146 = tpu.matmul %144, %145, %cst_61 {dimension_numbers = #tpu.dot_dimension_numbers<[1], [0], [0], [1], [0, 0, 1, 1], [], []>} : vector<8x8xbf16>, vector<8x8xbf16>, vector<8x8xf32> -> vector<8x8xf32>
    %c0_62 = arith.constant 0 : index
    %c0_63 = arith.constant 0 : index
    %147 = vector.load %arg25[%c0_62, %c0_63] : memref<8x32xf32, #tpu.memory_space<vmem>>, vector<8x8xf32>
    tpu.vector_store %arg25[%c0_62, %c0_63], %146 {strides = array<i32>} : memref<8x32xf32, #tpu.memory_space<vmem>>, vector<8x8xf32>,
    %148 = vector.extract_strided_slice %128 {offsets = [0, 8], sizes = [8, 8], strides = [1, 1]} : vector<8x32xbf16> to vector<8x8xbf16>
    %149 = vector.extract_strided_slice %129 {offsets = [0, 8], sizes = [8, 8], strides = [1, 1]} : vector<8x32xbf16> to vector<8x8xbf16>
    %cst_64 = arith.constant dense<0.000000e+00> : vector<8x8xf32>
    %150 = tpu.matmul %148, %149, %cst_64 {dimension_numbers = #tpu.dot_dimension_numbers<[1], [1], [0], [0], [0, 0, 1, 0], [], []>} : vector<8x8xbf16>, vector<8x8xbf16>, vector<8x8xf32> -> vector<8x8xf32>
    %cst_65 = arith.constant dense<0xFF800000> : vector<8xf32>
    %151 = vector.multi_reduction <maximumf>, %150, %cst_65 [1] : vector<8x8xf32> to vector<8xf32>
    %152 = vector.shape_cast %151 : vector<8xf32> to vector<8x1xf32>
    %153 = vector.broadcast %152 : vector<8x1xf32> to vector<8x8xf32>
    %154 = arith.subf %150, %153 : vector<8x8xf32>
    %155 = math.exp %154 : vector<8x8xf32>
    %cst_66 = arith.constant dense<0.000000e+00> : vector<8xf32>
    %156 = vector.multi_reduction <add>, %155, %cst_66 [1] : vector<8x8xf32> to vector<8xf32>
    %157 = vector.shape_cast %156 : vector<8xf32> to vector<8x1xf32>
    %158 = tpu.reciprocal %157 {approx = true} : vector<8x1xf32> -> vector<8x1xf32>
    %159 = vector.broadcast %158 : vector<8x1xf32> to vector<8x8xf32>
    %160 = arith.mulf %155, %159 : vector<8x8xf32>
    %161 = arith.truncf %160 : vector<8x8xf32> to vector<8x8xbf16>
    %162 = vector.extract_strided_slice %130 {offsets = [0, 8], sizes = [8, 8], strides = [1, 1]} : vector<8x32xbf16> to vector<8x8xbf16>
    %cst_67 = arith.constant dense<0.000000e+00> : vector<8x8xf32>
    %163 = tpu.matmul %161, %162, %cst_67 {dimension_numbers = #tpu.dot_dimension_numbers<[1], [0], [0], [1], [0, 0, 1, 1], [], []>} : vector<8x8xbf16>, vector<8x8xbf16>, vector<8x8xf32> -> vector<8x8xf32>
    %c0_68 = arith.constant 0 : index
    %c8_69 = arith.constant 8 : index
    %164 = vector.load %arg25[%c0_68, %c8_69] : memref<8x32xf32, #tpu.memory_space<vmem>>, vector<8x8xf32>
    tpu.vector_store %arg25[%c0_68, %c8_69], %163 {strides = array<i32>} : memref<8x32xf32, #tpu.memory_space<vmem>>, vector<8x8xf32>,
    %165 = vector.extract_strided_slice %128 {offsets = [0, 16], sizes = [8, 8], strides = [1, 1]} : vector<8x32xbf16> to vector<8x8xbf16>
    %166 = vector.extract_strided_slice %129 {offsets = [0, 16], sizes = [8, 8], strides = [1, 1]} : vector<8x32xbf16> to vector<8x8xbf16>
    %cst_70 = arith.constant dense<0.000000e+00> : vector<8x8xf32>
    %167 = tpu.matmul %165, %166, %cst_70 {dimension_numbers = #tpu.dot_dimension_numbers<[1], [1], [0], [0], [0, 0, 1, 0], [], []>} : vector<8x8xbf16>, vector<8x8xbf16>, vector<8x8xf32> -> vector<8x8xf32>
    %cst_71 = arith.constant dense<0xFF800000> : vector<8xf32>
    %168 = vector.multi_reduction <maximumf>, %167, %cst_71 [1] : vector<8x8xf32> to vector<8xf32>
    %169 = vector.shape_cast %168 : vector<8xf32> to vector<8x1xf32>
    %170 = vector.broadcast %169 : vector<8x1xf32> to vector<8x8xf32>
    %171 = arith.subf %167, %170 : vector<8x8xf32>
    %172 = math.exp %171 : vector<8x8xf32>
    %cst_72 = arith.constant dense<0.000000e+00> : vector<8xf32>
    %173 = vector.multi_reduction <add>, %172, %cst_72 [1] : vector<8x8xf32> to vector<8xf32>
    %174 = vector.shape_cast %173 : vector<8xf32> to vector<8x1xf32>
    %175 = tpu.reciprocal %174 {approx = true} : vector<8x1xf32> -> vector<8x1xf32>
    %176 = vector.broadcast %175 : vector<8x1xf32> to vector<8x8xf32>
    %177 = arith.mulf %172, %176 : vector<8x8xf32>
    %178 = arith.truncf %177 : vector<8x8xf32> to vector<8x8xbf16>
    %179 = vector.extract_strided_slice %130 {offsets = [0, 16], sizes = [8, 8], strides = [1, 1]} : vector<8x32xbf16> to vector<8x8xbf16>
    %cst_73 = arith.constant dense<0.000000e+00> : vector<8x8xf32>
    %180 = tpu.matmul %178, %179, %cst_73 {dimension_numbers = #tpu.dot_dimension_numbers<[1], [0], [0], [1], [0, 0, 1, 1], [], []>} : vector<8x8xbf16>, vector<8x8xbf16>, vector<8x8xf32> -> vector<8x8xf32>
    %c0_74 = arith.constant 0 : index
    %c16_75 = arith.constant 16 : index
    %181 = vector.load %arg25[%c0_74, %c16_75] : memref<8x32xf32, #tpu.memory_space<vmem>>, vector<8x8xf32>
    tpu.vector_store %arg25[%c0_74, %c16_75], %180 {strides = array<i32>} : memref<8x32xf32, #tpu.memory_space<vmem>>, vector<8x8xf32>,
    %182 = vector.extract_strided_slice %128 {offsets = [0, 24], sizes = [8, 8], strides = [1, 1]} : vector<8x32xbf16> to vector<8x8xbf16>
    %183 = vector.extract_strided_slice %129 {offsets = [0, 24], sizes = [8, 8], strides = [1, 1]} : vector<8x32xbf16> to vector<8x8xbf16>
    %cst_76 = arith.constant dense<0.000000e+00> : vector<8x8xf32>
    %184 = tpu.matmul %182, %183, %cst_76 {dimension_numbers = #tpu.dot_dimension_numbers<[1], [1], [0], [0], [0, 0, 1, 0], [], []>} : vector<8x8xbf16>, vector<8x8xbf16>, vector<8x8xf32> -> vector<8x8xf32>
    %cst_77 = arith.constant dense<0xFF800000> : vector<8xf32>
    %185 = vector.multi_reduction <maximumf>, %184, %cst_77 [1] : vector<8x8xf32> to vector<8xf32>
    %186 = vector.shape_cast %185 : vector<8xf32> to vector<8x1xf32>
    %187 = vector.broadcast %186 : vector<8x1xf32> to vector<8x8xf32>
    %188 = arith.subf %184, %187 : vector<8x8xf32>
    %189 = math.exp %188 : vector<8x8xf32>
    %cst_78 = arith.constant dense<0.000000e+00> : vector<8xf32>
    %190 = vector.multi_reduction <add>, %189, %cst_78 [1] : vector<8x8xf32> to vector<8xf32>
    %191 = vector.shape_cast %190 : vector<8xf32> to vector<8x1xf32>
    %192 = tpu.reciprocal %191 {approx = true} : vector<8x1xf32> -> vector<8x1xf32>
    %193 = vector.broadcast %192 : vector<8x1xf32> to vector<8x8xf32>
    %194 = arith.mulf %189, %193 : vector<8x8xf32>
    %195 = arith.truncf %194 : vector<8x8xf32> to vector<8x8xbf16>
    %196 = vector.extract_strided_slice %130 {offsets = [0, 24], sizes = [8, 8], strides = [1, 1]} : vector<8x32xbf16> to vector<8x8xbf16>
    %cst_79 = arith.constant dense<0.000000e+00> : vector<8x8xf32>
    %197 = tpu.matmul %195, %196, %cst_79 {dimension_numbers = #tpu.dot_dimension_numbers<[1], [0], [0], [1], [0, 0, 1, 1], [], []>} : vector<8x8xbf16>, vector<8x8xbf16>, vector<8x8xf32> -> vector<8x8xf32>
    %c0_80 = arith.constant 0 : index
    %c24_81 = arith.constant 24 : index
    %198 = vector.load %arg25[%c0_80, %c24_81] : memref<8x32xf32, #tpu.memory_space<vmem>>, vector<8x8xf32>
    tpu.vector_store %arg25[%c0_80, %c24_81], %197 {strides = array<i32>} : memref<8x32xf32, #tpu.memory_space<vmem>>, vector<8x8xf32>,
    %c0_82 = arith.constant 0 : index
    %c0_83 = arith.constant 0 : index
    %199 = vector.load %arg25[%c0_82, %c0_83] : memref<8x32xf32, #tpu.memory_space<vmem>>, vector<8x32xf32>
    %200 = arith.truncf %199 : vector<8x32xf32> to vector<8x32xbf16>
    %cst_84 = arith.constant dense<0.000000e+00> : vector<8x32xf32>
    %201 = tpu.matmul %200, %127, %cst_84 {dimension_numbers = #tpu.dot_dimension_numbers<[1], [0], [0], [1], [0, 0, 1, 1], [], []>} : vector<8x32xbf16>, vector<32x32xbf16>, vector<8x32xf32> -> vector<8x32xf32>
    %c0_85 = arith.constant 0 : index
    %c0_86 = arith.constant 0 : index
    %202 = vector.load %arg15[%c0_85, %c0_86] : memref<1x32xf32, #tpu.memory_space<vmem>>, vector<1x32xf32>
    %203 = vector.broadcast %202 : vector<1x32xf32> to vector<8x32xf32>
    %204 = arith.addf %201, %203 : vector<8x32xf32>
    %205 = arith.addf %204, %120 : vector<8x32xf32>
    %c0_87 = arith.constant 0 : index
    %c0_88 = arith.constant 0 : index
    %206 = vector.load %arg16[%c0_87, %c0_88] : memref<1x32xf32, #tpu.memory_space<vmem>>, vector<1x32xf32>
    %c0_89 = arith.constant 0 : index
    %c0_90 = arith.constant 0 : index
    %207 = vector.load %arg17[%c0_89, %c0_90] : memref<1x32xf32, #tpu.memory_space<vmem>>, vector<1x32xf32>
    %cst_91 = arith.constant dense<0.000000e+00> : vector<8xf32>
    %208 = vector.multi_reduction <add>, %205, %cst_91 [1] : vector<8x32xf32> to vector<8xf32>
    %209 = vector.shape_cast %208 : vector<8xf32> to vector<8x1xf32>
    %cst_92 = arith.constant 3.200000e+01 : f32
    %210 = vector.broadcast %cst_92 : f32 to vector<8x1xf32>
    %211 = arith.divf %209, %210 : vector<8x1xf32>
    %212 = vector.broadcast %211 : vector<8x1xf32> to vector<8x32xf32>
    %213 = arith.subf %205, %212 : vector<8x32xf32>
    %214 = arith.mulf %213, %213 : vector<8x32xf32>
    %cst_93 = arith.constant dense<0.000000e+00> : vector<8xf32>
    %215 = vector.multi_reduction <add>, %214, %cst_93 [1] : vector<8x32xf32> to vector<8xf32>
    %216 = vector.shape_cast %215 : vector<8xf32> to vector<8x1xf32>
    %cst_94 = arith.constant 3.200000e+01 : f32
    %217 = vector.broadcast %cst_94 : f32 to vector<8x1xf32>
    %218 = arith.divf %216, %217 : vector<8x1xf32>
    %219 = vector.broadcast %211 : vector<8x1xf32> to vector<8x32xf32>
    %220 = arith.subf %205, %219 : vector<8x32xf32>
    %cst_95 = arith.constant 9.99999974E-6 : f32
    %221 = vector.broadcast %cst_95 : f32 to vector<8x1xf32>
    %222 = arith.addf %218, %221 : vector<8x1xf32>
    %223 = math.rsqrt %222 : vector<8x1xf32>
    %224 = vector.broadcast %223 : vector<8x1xf32> to vector<8x32xf32>
    %225 = arith.mulf %220, %224 : vector<8x32xf32>
    %226 = vector.broadcast %206 : vector<1x32xf32> to vector<8x32xf32>
    %227 = arith.mulf %225, %226 : vector<8x32xf32>
    %228 = vector.broadcast %207 : vector<1x32xf32> to vector<8x32xf32>
    %229 = arith.addf %227, %228 : vector<8x32xf32>
    %230 = arith.truncf %229 : vector<8x32xf32> to vector<8x32xbf16>
    %cst_96 = arith.constant 0.000000e+00 : f32
    %231 = vector.broadcast %cst_96 : f32 to vector<8x32xf32>
    %c0_97 = arith.constant 0 : index
    %c0_98 = arith.constant 0 : index
    %232 = vector.load %arg18[%c0_97, %c0_98] : memref<32x128xbf16, #tpu.memory_space<vmem>>, vector<32x128xbf16>
    %cst_99 = arith.constant dense<0.000000e+00> : vector<8x128xf32>
    %233 = tpu.matmul %230, %232, %cst_99 {dimension_numbers = #tpu.dot_dimension_numbers<[1], [0], [0], [1], [0, 0, 1, 1], [], []>} : vector<8x32xbf16>, vector<32x128xbf16>, vector<8x128xf32> -> vector<8x128xf32>
    %c0_100 = arith.constant 0 : index
    %c0_101 = arith.constant 0 : index
    %234 = vector.load %arg19[%c0_100, %c0_101] : memref<1x128xf32, #tpu.memory_space<vmem>>, vector<1x128xf32>
    %235 = vector.broadcast %234 : vector<1x128xf32> to vector<8x128xf32>
    %236 = arith.addf %233, %235 : vector<8x128xf32>
    %cst_102 = arith.constant 0.000000e+00 : f32
    %237 = vector.broadcast %cst_102 : f32 to vector<8x128xf32>
    %238 = arith.maximumf %236, %237 : vector<8x128xf32>
    %239 = arith.truncf %238 : vector<8x128xf32> to vector<8x128xbf16>
    %c0_103 = arith.constant 0 : index
    %c0_104 = arith.constant 0 : index
    %240 = vector.load %arg20[%c0_103, %c0_104] : memref<128x32xbf16, #tpu.memory_space<vmem>>, vector<128x32xbf16>
    %cst_105 = arith.constant dense<0.000000e+00> : vector<8x32xf32>
    %241 = tpu.matmul %239, %240, %cst_105 {dimension_numbers = #tpu.dot_dimension_numbers<[1], [0], [0], [1], [0, 0, 1, 1], [], []>} : vector<8x128xbf16>, vector<128x32xbf16>, vector<8x32xf32> -> vector<8x32xf32>
    %242 = arith.addf %231, %241 : vector<8x32xf32>
    %c0_106 = arith.constant 0 : index
    %c0_107 = arith.constant 0 : index
    %243 = vector.load %arg21[%c0_106, %c0_107] : memref<1x32xf32, #tpu.memory_space<vmem>>, vector<1x32xf32>
    %244 = vector.broadcast %243 : vector<1x32xf32> to vector<8x32xf32>
    %245 = arith.addf %242, %244 : vector<8x32xf32>
    %246 = arith.addf %245, %229 : vector<8x32xf32>
    %c0_108 = arith.constant 0 : index
    %c0_109 = arith.constant 0 : index
    %247 = vector.load %arg22[%c0_108, %c0_109] : memref<1x32xf32, #tpu.memory_space<vmem>>, vector<1x32xf32>
    %c0_110 = arith.constant 0 : index
    %c0_111 = arith.constant 0 : index
    %248 = vector.load %arg23[%c0_110, %c0_111] : memref<1x32xf32, #tpu.memory_space<vmem>>, vector<1x32xf32>
    %cst_112 = arith.constant dense<0.000000e+00> : vector<8xf32>
    %249 = vector.multi_reduction <add>, %246, %cst_112 [1] : vector<8x32xf32> to vector<8xf32>
    %250 = vector.shape_cast %249 : vector<8xf32> to vector<8x1xf32>
    %cst_113 = arith.constant 3.200000e+01 : f32
    %251 = vector.broadcast %cst_113 : f32 to vector<8x1xf32>
    %252 = arith.divf %250, %251 : vector<8x1xf32>
    %253 = vector.broadcast %252 : vector<8x1xf32> to vector<8x32xf32>
    %254 = arith.subf %246, %253 : vector<8x32xf32>
    %255 = arith.mulf %254, %254 : vector<8x32xf32>
    %cst_114 = arith.constant dense<0.000000e+00> : vector<8xf32>
    %256 = vector.multi_reduction <add>, %255, %cst_114 [1] : vector<8x32xf32> to vector<8xf32>
    %257 = vector.shape_cast %256 : vector<8xf32> to vector<8x1xf32>
    %cst_115 = arith.constant 3.200000e+01 : f32
    %258 = vector.broadcast %cst_115 : f32 to vector<8x1xf32>
    %259 = arith.divf %257, %258 : vector<8x1xf32>
    %260 = vector.broadcast %252 : vector<8x1xf32> to vector<8x32xf32>
    %261 = arith.subf %246, %260 : vector<8x32xf32>
    %cst_116 = arith.constant 9.99999974E-6 : f32
    %262 = vector.broadcast %cst_116 : f32 to vector<8x1xf32>
    %263 = arith.addf %259, %262 : vector<8x1xf32>
    %264 = math.rsqrt %263 : vector<8x1xf32>
    %265 = vector.broadcast %264 : vector<8x1xf32> to vector<8x32xf32>
    %266 = arith.mulf %261, %265 : vector<8x32xf32>
    %267 = vector.broadcast %247 : vector<1x32xf32> to vector<8x32xf32>
    %268 = arith.mulf %266, %267 : vector<8x32xf32>
    %269 = vector.broadcast %248 : vector<1x32xf32> to vector<8x32xf32>
    %270 = arith.addf %268, %269 : vector<8x32xf32>
    %c0_117 = arith.constant 0 : index
    %c0_118 = arith.constant 0 : index
    %c0_119 = arith.constant 0 : index
    %271 = vector.load %arg24[%c0_117, %c0_118, %c0_119] : memref<1x8x32xf32, #tpu.memory_space<vmem>>, vector<1x8x32xf32>
    %272 = vector.shape_cast %271 : vector<1x8x32xf32> to vector<8x32xf32>
    %273 = vector.shape_cast %270 : vector<8x32xf32> to vector<1x8x32xf32>
    tpu.vector_store %arg24[%c0_117, %c0_118, %c0_119], %273 {strides = array<i32>} : memref<1x8x32xf32, #tpu.memory_space<vmem>>, vector<1x8x32xf32>,
    return
  }
  func.func @transform_0(%arg0: i32, %arg1: i32) -> (i32, i32, i32) {
    %c0_i32 = arith.constant 0 : i32
    %c0_i32_0 = arith.constant 0 : i32
    return %arg0, %arg1, %c0_i32 : i32, i32, i32
  }
  func.func @transform_1(%arg0: i32, %arg1: i32) -> (i32, i32, i32) {
    %c0_i32 = arith.constant 0 : i32
    %c0_i32_0 = arith.constant 0 : i32
    %c0_i32_1 = arith.constant 0 : i32
    return %arg0, %c0_i32, %c0_i32_0 : i32, i32, i32
  }
  func.func @transform_2(%arg0: i32, %arg1: i32) -> (i32, i32, i32) {
    %c0_i32 = arith.constant 0 : i32
    %c0_i32_0 = arith.constant 0 : i32
    %c0_i32_1 = arith.constant 0 : i32
    return %arg0, %c0_i32, %c0_i32_0 : i32, i32, i32
  }
  func.func @transform_3(%arg0: i32, %arg1: i32) -> (i32, i32) {
    %c0_i32 = arith.constant 0 : i32
    %c0_i32_0 = arith.constant 0 : i32
    return %arg1, %c0_i32 : i32, i32
  }
  func.func @transform_4(%arg0: i32, %arg1: i32) -> (i32, i32) {
    %c0_i32 = arith.constant 0 : i32
    %c0_i32_0 = arith.constant 0 : i32
    %c0_i32_1 = arith.constant 0 : i32
    return %c0_i32, %c0_i32_0 : i32, i32
  }
  func.func @transform_5(%arg0: i32, %arg1: i32) -> (i32, i32) {
    %c0_i32 = arith.constant 0 : i32
    %c0_i32_0 = arith.constant 0 : i32
    %c0_i32_1 = arith.constant 0 : i32
    return %c0_i32, %c0_i32_0 : i32, i32
  }
  func.func @transform_6(%arg0: i32, %arg1: i32) -> (i32, i32) {
    %c0_i32 = arith.constant 0 : i32
    %c0_i32_0 = arith.constant 0 : i32
    %c0_i32_1 = arith.constant 0 : i32
    return %c0_i32, %c0_i32_0 : i32, i32
  }
  func.func @transform_7(%arg0: i32, %arg1: i32) -> (i32, i32) {
    %c0_i32 = arith.constant 0 : i32
    %c0_i32_0 = arith.constant 0 : i32
    %c0_i32_1 = arith.constant 0 : i32
    return %c0_i32, %c0_i32_0 : i32, i32
  }
  func.func @transform_8(%arg0: i32, %arg1: i32) -> (i32, i32) {
    %c0_i32 = arith.constant 0 : i32
    %c0_i32_0 = arith.constant 0 : i32
    %c0_i32_1 = arith.constant 0 : i32
    return %c0_i32, %c0_i32_0 : i32, i32
  }
  func.func @transform_9(%arg0: i32, %arg1: i32) -> (i32, i32) {
    %c0_i32 = arith.constant 0 : i32
    %c0_i32_0 = arith.constant 0 : i32
    %c0_i32_1 = arith.constant 0 : i32
    return %c0_i32, %c0_i32_0 : i32, i32
  }
  func.func @transform_10(%arg0: i32, %arg1: i32) -> (i32, i32) {
    %c0_i32 = arith.constant 0 : i32
    %c0_i32_0 = arith.constant 0 : i32
    %c0_i32_1 = arith.constant 0 : i32
    return %c0_i32, %c0_i32_0 : i32, i32
  }
  func.func @transform_11(%arg0: i32, %arg1: i32) -> (i32, i32) {
    %c0_i32 = arith.constant 0 : i32
    %c0_i32_0 = arith.constant 0 : i32
    %c0_i32_1 = arith.constant 0 : i32
    return %c0_i32, %c0_i32_0 : i32, i32
  }
  func.func @transform_12(%arg0: i32, %arg1: i32) -> (i32, i32) {
    %c0_i32 = arith.constant 0 : i32
    %c0_i32_0 = arith.constant 0 : i32
    %c0_i32_1 = arith.constant 0 : i32
    return %c0_i32, %c0_i32_0 : i32, i32
  }
  func.func @transform_13(%arg0: i32, %arg1: i32) -> (i32, i32) {
    %c0_i32 = arith.constant 0 : i32
    %c0_i32_0 = arith.constant 0 : i32
    %c0_i32_1 = arith.constant 0 : i32
    return %c0_i32, %c0_i32_0 : i32, i32
  }
  func.func @transform_14(%arg0: i32, %arg1: i32) -> (i32, i32) {
    %c0_i32 = arith.constant 0 : i32
    %c0_i32_0 = arith.constant 0 : i32
    %c0_i32_1 = arith.constant 0 : i32
    return %c0_i32, %c0_i32_0 : i32, i32
  }
  func.func @transform_15(%arg0: i32, %arg1: i32) -> (i32, i32) {
    %c0_i32 = arith.constant 0 : i32
    %c0_i32_0 = arith.constant 0 : i32
    %c0_i32_1 = arith.constant 0 : i32
    return %c0_i32, %c0_i32_0 : i32, i32
  }
  func.func @transform_16(%arg0: i32, %arg1: i32) -> (i32, i32) {
    %c0_i32 = arith.constant 0 : i32
    %c0_i32_0 = arith.constant 0 : i32
    %c0_i32_1 = arith.constant 0 : i32
    return %c0_i32, %c0_i32_0 : i32, i32
  }
  func.func @transform_17(%arg0: i32, %arg1: i32) -> (i32, i32) {
    %c0_i32 = arith.constant 0 : i32
    %c0_i32_0 = arith.constant 0 : i32
    %c0_i32_1 = arith.constant 0 : i32
    return %c0_i32, %c0_i32_0 : i32, i32
  }
  func.func @transform_18(%arg0: i32, %arg1: i32) -> (i32, i32) {
    %c0_i32 = arith.constant 0 : i32
    %c0_i32_0 = arith.constant 0 : i32
    %c0_i32_1 = arith.constant 0 : i32
    return %c0_i32, %c0_i32_0 : i32, i32
  }
  func.func @transform_19(%arg0: i32, %arg1: i32) -> (i32, i32) {
    %c0_i32 = arith.constant 0 : i32
    %c0_i32_0 = arith.constant 0 : i32
    %c0_i32_1 = arith.constant 0 : i32
    return %c0_i32, %c0_i32_0 : i32, i32
  }
  func.func @transform_20(%arg0: i32, %arg1: i32) -> (i32, i32) {
    %c0_i32 = arith.constant 0 : i32
    %c0_i32_0 = arith.constant 0 : i32
    %c0_i32_1 = arith.constant 0 : i32
    return %c0_i32, %c0_i32_0 : i32, i32
  }
  func.func @transform_21(%arg0: i32, %arg1: i32) -> (i32, i32) {
    %c0_i32 = arith.constant 0 : i32
    %c0_i32_0 = arith.constant 0 : i32
    %c0_i32_1 = arith.constant 0 : i32
    return %c0_i32, %c0_i32_0 : i32, i32
  }
  func.func @transform_22(%arg0: i32, %arg1: i32) -> (i32, i32, i32) {
    %c0_i32 = arith.constant 0 : i32
    %c0_i32_0 = arith.constant 0 : i32
    return %arg0, %arg1, %c0_i32 : i32, i32, i32
  }
}

</mosaic_0001>

<bundles_post_ra>
// kernel: tpu_custom_call.1
= control target key start
LH: loop header
LB: loop body
LE: loop exit
PB: predicated region body
PF: predicated region fallthrough
CT: control target
= control target key end

     0   :  { %s3880_s0 = inlined_call_operand.vmem [shape: f32[2,8,32], index: 0, kind: input, shape index: {}]   ;;  %s3881_s1 = inlined_call_operand.hbm [shape: bf16[2,8,64], index: 1, kind: input, shape index: {}]   ;;  %s3882_s2 = inlined_call_operand.hbm [shape: bf16[2,8,64], index: 2, kind: input, shape index: {}]   ;;  %s3883_s3 = inlined_call_operand.hbm [shape: bf16[8,8], index: 3, kind: input, shape index: {}]   ;;  %s3884_s4 = inlined_call_operand.vmem [shape: bf16[32,32], index: 4, kind: input, shape index: {}]   ;;  %s3885_s5 = inlined_call_operand.vmem [shape: f32[1,32], index: 5, kind: input, shape index: {}]   ;;  %s3886_s6 = inlined_call_operand.vmem [shape: bf16[32,32], index: 6, kind: input, shape index: {}]   ;;  %s3887_s7 = inlined_call_operand.vmem [shape: f32[1,32], index: 7, kind: input, shape index: {}]   ;;  %s3888_s8 = inlined_call_operand.hbm [shape: f32[1,32], index: 8, kind: input, shape index: {}]   ;;  %s3889_s9 = inlined_call_operand.hbm [shape: f32[1,32], index: 9, kind: input, shape index: {}]   ;;  %s3890_s10 = inlined_call_operand.vmem [shape: bf16[32,32], index: 10, kind: input, shape index: {}]   ;;  %s3891_s11 = inlined_call_operand.vmem [shape: f32[1,32], index: 11, kind: input, shape index: {}]   ;;  %s3892_s12 = inlined_call_operand.vmem [shape: bf16[32,32], index: 12, kind: input, shape index: {}]   ;;  %s3893_s13 = inlined_call_operand.vmem [shape: f32[1,32], index: 13, kind: input, shape index: {}]   ;;  %s3894_s14 = inlined_call_operand.vmem [shape: f32[1,32], index: 14, kind: input, shape index: {}]   ;;  %s3895_s15 = inlined_call_operand.vmem [shape: f32[1,32], index: 15, kind: input, shape index: {}]   ;;  %s3896_s16 = inlined_call_operand.vmem [shape: bf16[32,128], index: 16, kind: input, shape index: {}]   ;;  %s3897_s17 = inlined_call_operand.vmem [shape: f32[1,128], index: 17, kind: input, shape index: {}]   ;;  %s3898_s18 = inlined_call_operand.vmem [shape: bf16[128,32], index: 18, kind: input, shape index: {}]   ;;  %s3899_s19 = inlined_call_operand.vmem [shape: f32[1,32], index: 19, kind: input, shape index: {}]   ;;  %s3900_s20 = inlined_call_operand.vmem [shape: f32[1,32], index: 20, kind: input, shape index: {}]   ;;  %s3901_s21 = inlined_call_operand.vmem [shape: f32[1,32], index: 21, kind: input, shape index: {}]   ;;  %s3902_s22 = inlined_call_operand.hbm [shape: f32[2,8,32], index: 22, kind: output, shape index: {}]  }
   0x1   :  { %3920 = sst [smem:[#allocation24_spill]] %s3880_s0 }
   0x2   :  { %3921 = sst [smem:[#allocation25_spill]] %s3881_s1 }
   0x3   :  { %3922 = sst [smem:[#allocation26_spill]] %s3882_s2 }
   0x4   :  { %3923 = sst [smem:[#allocation27_spill]] %s3883_s3 }
   0x5   :  { %3924 = sst [smem:[#allocation28_spill]] %s3884_s4 }
   0x6   :  { %3925 = sst [smem:[#allocation29_spill]] %s3885_s5 }
   0x7   :  { %3926 = sst [smem:[#allocation30_spill]] %s3886_s6 }
   0x8   :  { %3927 = sst [smem:[#allocation31_spill]] %s3888_s8 }
   0x9   :  { %3928 = sst [smem:[#allocation32_spill]] %s3889_s9 }
   0xa   :  { %3929 = sst [smem:[#allocation33_spill]] %s3894_s14 }
   0xb   :  { %3930 = sst [smem:[#allocation34_spill]] %s3895_s15 }
   0xc   :  { %3931 = sst [smem:[#allocation35_spill]] %s3897_s17 }
   0xd   :  { %3932 = sst [smem:[#allocation36_spill]] %s3898_s18 }
   0xe   :  { %3933 = sst [smem:[#allocation37_spill]] %s3899_s19 }
   0xf   :  { %3934 = sst [smem:[#allocation38_spill]] %s3900_s20 }
  0x10   :  { %3935 = sst [smem:[#allocation39_spill]] %s3901_s21 }
  0x11   :  { %3936 = sst [smem:[#allocation40_spill]] %s3902_s22 }
  0x12   :  { %27 = vsyncpa [#allocation4], 0 }
  0x13   :  { %29 = vsyncpa [#allocation4 + $0x1], 0 }
  0x14   :  { %30 = vsyncpa [#allocation7], 0 }
  0x15   :  { %32 = vsyncpa [#allocation7 + $0x1], 0 }
  0x16   :  { %33 = vsyncpa [#allocation10], 0 }
  0x17   :  { %34 = vsyncpa [#allocation5], 0 }
  0x18   :  { %36 = vsyncpa [#allocation5 + $0x1], 0  ;;  %s3281_s3 = smov 0   ;;  %s3283_s28 = smov 0  }
  0x19   :  { %s3285_s29 = smov 0   ;;  %s3287_s30 = smov 0  }
  0x1a   :  { %s3289_s4 = smov 0   ;;  %s3291_s0 = smov 0  }
  0x1b LB: > { %3937 = sst [smem:[#allocation18_spill]] %s3126_s3  ;;  %s3312_s23 = sadd.s32 4294967295, %s3146_s0   ;;  %s3146_s0 = sphi %s3291_s0, %s42_s0   ;;  %s3142_s4 = sphi %s3289_s4, %s3983_s4   ;;  %s3138_s30 = sphi %s3287_s30, %s3986_s30   ;;  %s3134_s29 = sphi %s3285_s29, %s3981_s29   ;;  %s3130_s28 = sphi %s3283_s28, %s3985_s28   ;;  %s3126_s3 = sphi %s3281_s3, %s3984_s3  }
  0x1c   : > { %3938 = sst [smem:[#allocation19_spill]] %s3134_s29  ;;  %s2453_s1 = sadd.s32 4294967294, %s3146_s0  }
  0x1d   : > { %3939 = sst [smem:[#allocation20_spill]] %s3142_s4  ;;  %p102_p0 = scmp.ne.s32.totalorder %s3130_s28, %s3126_s3 }
  0x1e   : > { %p3911_p1 = scmp.eq.s32.totalorder %s3312_s23, 0  ;;  %p564_p3 = scmp.eq.s32.totalorder %s2453_s1, 1 }
  0x1f   : > { %p2454_p5 = scmp.ge.s32.totalorder %s3146_s0, 1  ;;  %p571_p7 = scmp.lt.s32.totalorder %s3146_s0, 3 }
  0x20   : > { %p3321_p4 = por %p3911_p1, %p102_p0  ;;  %p3326_p6 = por %p564_p3, %p102_p0 }
  0x21   : > { %p3331_p8 = pnand %p2454_p5, %p571_p7  ;;  %s3148_s25 = smov [#allocation8]  }
  0x22   : > { %s3940_s5 = scalar_select %p3321_p4, 1, 0 }
  0x23   : > { %s3941_s24 = scalar_select %p3326_p6, 1, 0 }
  0x24   : > { %s3943_s6 = scalar_select %p3331_p8, 1, 0 }
  0x25   : > { %3942 = sst [smem:[#allocation21_spill]] %s3941_s24  ;;  %s586_s26 = sshll.u32 %s3148_s25, 4  ;;  %s587_s26 = int_to_ptr.vmem [resolvable:$true] %s586_s26 }
  0x26   : > { %p2758_p10 = pneg %p3331_p8  ;;  %s3149_s2 = smov [#allocation9]  }
  0x27   : > { %s609_s27 = sshll.u32 %s3149_s2, 4  ;;  %s3150_s24 = smov [#allocation11]   ;;  %s3344_s27 = int_to_ptr.vmem [resolvable:$true] %s609_s27 }
  0x28   : > { %p3340_p11 = pnand %p2758_p10, %p3911_p1  ;;  %s620_s3 = sshll.u32 %s3150_s24, 4  ;;  %s3346_s3 = int_to_ptr.vmem [resolvable:$true] %s620_s3 }
  0x29   : > { %s3945_s21 = sld [smem:[#allocation27_spill]] }
  0x2a   : > { %p3356_p13 = pneg %p3340_p11 }
  0x2f   : > { %s2908_s20 = scalar_lea.hbm %s3945_s21, 64 }
  0x30   : > { %p2909_p12 = scmp.ne.s32.totalorder %s3945_s21, %s2908_s20  ;;  %p2915_p5 = scmp.lt.u32.totalorder %s2908_s20, %s3945_s21 }
  0x32   : > { %p2911_p0 = pnand %p3356_p13, %p2909_p12 }
  0x34   : > { %p2912_p3 = pneg %p2911_p0 }
  0x36   : > { %p2917_p7 = pnand %p2915_p5, %p2912_p3 }
  0x38   : > { %2920 = shalt.err (!%p2917_p7)
}
  0x39   : > { %s2921_s22 = scalar_lea.vmem %s587_s26, 64  ;;  %p2929_p2 = scmp.lt.s32.totalorder %s587_s26, %s587_s26 }
  0x3a   : > { %p2922_p10 = scmp.ne.s32.totalorder %s587_s26, %s2921_s22  ;;  %p2930_p6 = scmp.lt.s32.totalorder %s2921_s22, %s2921_s22 }
  0x3c   : > { %p2924_p9 = pnand %p2922_p10, %p3356_p13  ;;  %p2931_p4 = por %p2930_p6, %p2929_p2 }
  0x3e   : > { %p2925_p1 = pneg %p2924_p9 }
  0x40   : > { %p2932_p8 = pnand %p2931_p4, %p2925_p1 }
  0x42   : > { %2935 = shalt.err (!%p2932_p8)
}
  0x43   : > { %2761 = dma.hbm_to_vmem [thread:$0]  (!%p3340_p11), %s3945_s21, 64, %s587_s26, [#allocation7]  }
  0x44   : > { %s3947_s8 = sld [smem:[#allocation31_spill]] }
  0x4a   : > { %s2936_s25 = scalar_lea.hbm %s3947_s8, 16 }
  0x4b   : > { %p2937_p9 = scmp.ne.s32.totalorder %s3947_s8, %s2936_s25  ;;  %p2943_p1 = scmp.lt.u32.totalorder %s2936_s25, %s3947_s8 }
  0x4d   : > { %p2939_p12 = pnand %p2937_p9, %p3356_p13 }
  0x4f   : > { %p2940_p2 = pneg %p2939_p12 }
  0x51   : > { %p2945_p4 = pnand %p2943_p1, %p2940_p2 }
  0x53   : > { %2948 = shalt.err (!%p2945_p4)
}
  0x54   : > { %s2949_s26 = scalar_lea.vmem %s3344_s27, 16  ;;  %s2956_s14 = scalar_lea.vmem %s3344_s27, 32 }
  0x55   : > { %p2950_p6 = scmp.ne.s32.totalorder %s3344_s27, %s2949_s26  ;;  %p2957_p3 = scmp.lt.s32.totalorder %s3344_s27, %s3344_s27 }
  0x56   : > { %p2958_p5 = scmp.lt.s32.totalorder %s2956_s14, %s2949_s26 }
  0x57   : > { %p2952_p8 = pnand %p2950_p6, %p3356_p13 }
  0x58   : > { %p2959_p7 = por %p2958_p5, %p2957_p3 }
  0x59   : > { %p2953_p0 = pneg %p2952_p8 }
  0x5b   : > { %p2960_p10 = pnand %p2959_p7, %p2953_p0 }
  0x5d   : > { %2963 = shalt.err (!%p2960_p10)
}
  0x5e   : > { %2764 = dma.hbm_to_vmem [thread:$0]  (!%p3340_p11), %s3947_s8, 16, %s3344_s27, [#allocation10]  }
  0x5f   : > { %s3948_s9 = sld [smem:[#allocation32_spill]] }
  0x65   : > { %s2964_s20 = scalar_lea.hbm %s3948_s9, 16 }
  0x66   : > { %p2965_p9 = scmp.ne.s32.totalorder %s3948_s9, %s2964_s20  ;;  %p2971_p1 = scmp.lt.u32.totalorder %s2964_s20, %s3948_s9 }
  0x68   : > { %p2967_p12 = pnand %p2965_p9, %p3356_p13 }
  0x6a   : > { %p2968_p2 = pneg %p2967_p12 }
  0x6c   : > { %p2973_p4 = pnand %p2971_p1, %p2968_p2 }
  0x6e   : > { %2976 = shalt.err (!%p2973_p4)
}
  0x6f   : > { %s2977_s27 = scalar_lea.vmem %s3346_s3, 16  ;;  %s2984_s14 = scalar_lea.vmem %s3346_s3, 32 }
  0x70   : > { %p2978_p6 = scmp.ne.s32.totalorder %s3346_s3, %s2977_s27  ;;  %p2985_p3 = scmp.lt.s32.totalorder %s3346_s3, %s3346_s3 }
  0x71   : > { %p2986_p5 = scmp.lt.s32.totalorder %s2984_s14, %s2977_s27 }
  0x72   : > { %p2980_p8 = pnand %p2978_p6, %p3356_p13 }
  0x73   : > { %p2987_p7 = por %p2986_p5, %p2985_p3 }
  0x74   : > { %p2981_p0 = pneg %p2980_p8 }
  0x76   : > { %p2988_p10 = pnand %p2987_p7, %p2981_p0 }
  0x78   : > { %2991 = shalt.err (!%p2988_p10)
}
  0x79   : > { %2767 = dma.hbm_to_vmem [thread:$0]  (!%p3340_p11), %s3948_s9, 16, %s3346_s3, [#allocation10]  }
  0x7a   : > { %s89_s2 = sadd.s32 1, %s3134_s29  ;;  %s54_s19 = sadd.s32 1, %s3142_s4 }
  0x7b   : > { %p96_p13 = scmp.ne.s32.totalorder %s3134_s29, %s3130_s28  ;;  %p56_p9 = scmp.ge.s32.totalorder %s54_s19, 2 }
  0x7c   : > { %p97_p12 = scmp.eq.s32.totalorder %s3146_s0, 0  ;;  %p3949_p2 = scmp.eq.s32.totalorder %s3312_s23, 1 }
  0x7d   : > { %p2782_p4 = scmp.lt.s32.totalorder %s3146_s0, 2  ;;  %s3988_s19 = smov (%p56_p9, %s54_s19), 0 }
  0x7e   : > { %p3427_p1 = por %p3949_p2, %p96_p13  ;;  %3951 = sst [smem:[#allocation22_spill]] %s3988_s19 }
  0x7f   : > { %p98_p6 = por %p97_p12, %p96_p13  ;;  %s677_s15 = sand.u32 1, %s3134_s29  }
  0x80   : > { %s3950_s1 = scalar_select %p3427_p1, 1, 0 }
  0x81   : > { %s86_s20 = ssub.s32 %s3142_s4, %s3988_s19  ;;  %s3437_s3 = sshll.u32 %s677_s15, 2 }
  0x82   : > { %p87_p11 = scmp.eq.s32.totalorder %s86_s20, 0  ;;  %s2460_s25 = sshll.u32 %s3142_s4, 6 }
  0x83   : > { %s3953_s27 = sld [smem:[#allocation25_spill]]  ;;  %s681_s18 = scalar_lea.vmem [#allocation3], %s3437_s3 }
  0x84   : > { %s3441_s24 = scalar_select %p87_p11, %s3134_s29, %s89_s2  }
  0x85   : > { %s688_s17 = sshll.u32 %s681_s18, 4  ;;  %p3453_p8 = pnand %p2782_p4, %p98_p6  ;;  %s3449_s17 = int_to_ptr.vmem [resolvable:$true] %s688_s17 }
  0x86   : > { %3952 = sst [smem:[#allocation23_spill]] %s3441_s24  ;;  %s3955_s9 = sld [smem:[#allocation26_spill]] }
  0x87   : > { %s695_s26 = sand.u32 1, %s3146_s0   ;;  %s678_s21 = scalar_lea.sflag [#allocation4], %s677_s15 }
  0x88   : > { %p2994_p3 = pneg %p3453_p8 }
  0x89   : > { %s3446_s14 = scalar_lea.hbm %s3953_s27, %s2460_s25  ;;  %s2997_s24 = scalar_lea.hbm %s3953_s27, 128 }
  0x8a   : > { %s2992_s19 = scalar_lea.hbm %s3446_s14, 64  ;;  %p2998_p10 = scmp.lt.u32.totalorder %s3446_s14, %s3953_s27 }
  0x8b   : > { %p2993_p0 = scmp.ne.s32.totalorder %s3446_s14, %s2992_s19  ;;  %p2999_p13 = scmp.lt.u32.totalorder %s2997_s24, %s2992_s19 }
  0x8c   : > { %s3460_s22 = scalar_lea.hbm %s3955_s9, %s2460_s25  ;;  %p3001_p12 = scmp.lt.u32.totalorder %s2992_s19, %s3446_s14 }
  0x8d   : > { %p2995_p5 = pnand %p2994_p3, %p2993_p0  ;;  %p3000_p9 = por %p2999_p13, %p2998_p10 }
  0x8f   : > { %p2996_p7 = pneg %p2995_p5  ;;  %p3002_p2 = por %p3001_p12, %p3000_p9 }
  0x91   : > { %p3003_p4 = pnand %p3002_p2, %p2996_p7 }
  0x93   : > { %3006 = shalt.err (!%p3003_p4)
}
  0x94   : > { %s3007_s15 = scalar_lea.vmem %s3449_s17, 64  ;;  %s3151_s4 = smov [#allocation3]  }
  0x95   : > { %p3008_p6 = scmp.ne.s32.totalorder %s3449_s17, %s3007_s15  ;;  %s3012_s25 = sshll.u32 %s3151_s4, 4  ;;  %s3013_s25 = int_to_ptr.vmem [resolvable:$false] %s3012_s25 }
  0x96   : > { %s3014_s29 = scalar_lea.vmem %s3013_s25, 128  ;;  %p3015_p5 = scmp.lt.s32.totalorder %s3449_s17, %s3013_s25 }
  0x97   : > { %p3010_p11 = pnand %p3008_p6, %p2994_p3  ;;  %p3016_p10 = scmp.lt.s32.totalorder %s3014_s29, %s3007_s15 }
  0x99   : > { %p3011_p0 = pneg %p3010_p11  ;;  %p3017_p13 = por %p3016_p10, %p3015_p5 }
  0x9b   : > { %p3018_p9 = pnand %p3017_p13, %p3011_p0 }
  0x9d   : > { %3021 = shalt.err (!%p3018_p9)
}
  0x9e   : > { %2771 = dma.hbm_to_vmem [thread:$0]  (!%p3453_p8), %s3446_s14, 64, %s3449_s17, %s678_s21  }
  0x9f   : > { %s699_s19 = scalar_lea.vmem [#allocation6], %s3437_s3  ;;  %s696_s2 = scalar_lea.sflag [#allocation7], %s695_s26 }
  0xa0   : > { %s706_s24 = sshll.u32 %s699_s19, 4  ;;  %s3022_s18 = scalar_lea.hbm %s3460_s22, 64  ;;  %s707_s24 = int_to_ptr.vmem [resolvable:$true] %s706_s24 }
  0xa1   : > { %p3023_p7 = scmp.ne.s32.totalorder %s3460_s22, %s3022_s18  ;;  %s3027_s4 = scalar_lea.hbm %s3955_s9, 128 }
  0xa2   : > { %p3028_p4 = scmp.lt.u32.totalorder %s3460_s22, %s3955_s9  ;;  %p3029_p6 = scmp.lt.u32.totalorder %s3027_s4, %s3022_s18 }
  0xa3   : > { %p3025_p12 = pnand %p3023_p7, %p2994_p3  ;;  %p3031_p0 = scmp.lt.u32.totalorder %s3022_s18, %s3460_s22 }
  0xa4   : > { %p3030_p11 = por %p3029_p6, %p3028_p4 }
  0xa5   : > { %p3026_p2 = pneg %p3025_p12 }
  0xa6   : > { %p3032_p5 = por %p3031_p0, %p3030_p11 }
  0xa8   : > { %p3033_p10 = pnand %p3032_p5, %p3026_p2 }
  0xaa   : > { %3036 = shalt.err (!%p3033_p10)
}
  0xab   : > { %s3037_s21 = scalar_lea.vmem %s707_s24, 64  ;;  %s3152_s3 = smov [#allocation6]  }
  0xac   : > { %p3038_p13 = scmp.ne.s32.totalorder %s707_s24, %s3037_s21  ;;  %s3042_s14 = sshll.u32 %s3152_s3, 4  ;;  %s3043_s14 = int_to_ptr.vmem [resolvable:$false] %s3042_s14 }
  0xad   : > { %s3044_s17 = scalar_lea.vmem %s3043_s14, 128  ;;  %p3045_p12 = scmp.lt.s32.totalorder %s707_s24, %s3043_s14 }
  0xae   : > { %p3040_p9 = pnand %p3038_p13, %p2994_p3  ;;  %p3046_p1 = scmp.lt.s32.totalorder %s3044_s17, %s3037_s21 }
  0xb0   : > { %p3041_p7 = pneg %p3040_p9  ;;  %p3047_p4 = por %p3046_p1, %p3045_p12 }
  0xb2   : > { %p3048_p6 = pnand %p3047_p4, %p3041_p7 }
  0xb4   : > { %3051 = shalt.err (!%p3048_p6)
}
  0xb5   : > { %2774 = dma.hbm_to_vmem [thread:$0]  (!%p3453_p8), %s3460_s22, 64, %s707_s24, %s696_s2  }
  0xb6   : > { %p3956_p2 = scmp.ne.s32.totalorder %s3943_s6, 0 }
  0xb7   : > { %s3513_s26 = sand.u32 (!%p3956_p2), 1, %s3130_s28   ;;  %p3957_p3 = scmp.ne.s32.totalorder (!%p3956_p2), %s3940_s5, 0 }
  0xb8   : > { %715 = sbr.rel (%p3956_p2) target bundleno = 4512 (0x11a0), region = 108  ;;  %s2464_s19 = sshll.u32 (!%p3956_p2), %s3513_s26, 2 }
  0xb9   : > { %s718_s18 = scalar_lea.sflag (!%p3956_p2), [#allocation4], %s3513_s26  ;;  %s721_s8 = scalar_lea.vmem (!%p3956_p2), [#allocation3], %s2464_s19 }
  0xbf   : > { %3105 = dma.done.wait (%p3957_p3), %s718_s18, 64  }
  0xc0   : > { %3107 = vsyncadd (%p3957_p3), %s718_s18, 4294967232  ;;  %s726_s20 = sand.u32 1, %s3312_s23   ;;  %s3522_s6 = scalar_lea.vmem [#allocation6], %s2464_s19 }
  0xc1   : > { %s727_s22 = scalar_lea.sflag [#allocation7], %s726_s20 }
  0xc2   : > { %3109 = dma.done.wait (%p3957_p3), %s727_s22, 64  }
  0xc3   : > { %3111 = vsyncadd (%p3957_p3), %s727_s22, 4294967232  ;;  %p3958_p1 = scmp.eq.s32.totalorder %s3312_s23, 0 }
  0xc5   : > { %3113 = dma.done.wait (%p3958_p1), [#allocation7], 64   ;;  %p3959_p8 = pmov %p3958_p1 }
  0xc6   : > { %p3960_p11 = pmov %p3958_p1 }
  0xc7   : > { %3115 = vsyncadd (%p3959_p8), [#allocation7], 4294967232 }
  0xc8   : > { %3117 = dma.done.wait (%p3960_p11), [#allocation10], 32   ;;  %p3961_p0 = pmov %p3958_p1 }
  0xc9   : > { %p815_p5 = scmp.lt.s32.totalorder %s3138_s30, 1  ;;  %v3153_v0 = vmov 0.0   ;;  %vm3154_vm0 = vmmov 0   ;;  %s3962_s15 = sld [smem:[#allocation24_spill]]  ;;  %vm901_vm1 = vcmask 64512   ;;  %vm852_vm2 = vcmask 261120  }
  0xca   : > { %3119 = vsyncadd (%p3961_p0), [#allocation10], 4294967264  ;;  %2584 = vmatprep.subr.bf16.mxu0 %v3153_v0  ;;  %2588 = vmatprep.mubr.msk.bf16.mxu0 %vm3154_vm0, %v3153_v0  ;;  %s3963_s21 = sld [smem:[#allocation28_spill]]  ;;  %v824_v4 = vld [vmem:[%s721_s8] sm:$0xf]  ;;  %s3155_s17 = smov 120  }
  0xcb   : > { %s816_s5 = scalar_select %p815_p5, %s3138_s30, 1  ;;  %2604 = vmatprep.subr.bf16.mxu1 %v3153_v0  ;;  %2606 = vmatprep.mubr.msk.bf16.mxu1 %vm3154_vm0, %v3153_v0  ;;  %v3556_v5 = vcombine.low %v824_v4, %v824_v4  ;;  %v906_v6 = vsel %vm901_vm1, %v824_v4, 0  ;;  %v826_v24 = vld [vmem:[#allocation8] sm:$0xf]  ;;  %vm968_vm3 = vcmask 1043456   ;;  %vm1128_vm4 = vcmask 130112  }
  0xcc   : > { %s3156_s19 = smov 112   ;;  %s3964_s20 = sld [smem:[#allocation29_spill]]  ;;  %v827_v25 = vunpack.c.l.bf16 %v826_v24  ;;  %vm1244_vm5 = vcmask 195712   ;;  %vm1360_vm6 = vcmask 261312  }
  0xcd   : > { %s2470_s24 = sshll.u32 %s816_s5, 3  ;;  %1016 = vrot.lane.b32.xlu0 %v3556_v5, %s3155_s17  ;;  %1132 = vrot.lane.b32.xlu1 %v3556_v5, %s3156_s19  ;;  %s3157_s22 = smov 104  }
  0xce   : > { %s3158_s5 = smov 96   ;;  %s3160_s2 = smov 72  }
  0xcf   : > { %s821_s4 = scalar_lea.vmem %s3962_s15, %s2470_s24  ;;  %s3159_s24 = smov 80  }
  0xd0   : > { %v2850_v1 = vld [vmem:[%s3963_s21] sm:$0xff]   ;;  %v2851_v2 = vld [vmem:[%s3963_s21 + $0x8] sm:$0xff]   ;;  %s3161_s23 = smov 88   ;;  %s3162_s15 = smov 8  }
  0xd1   : > { %2585 = vmatpush3.bf16.msra.mxu0 %v2850_v1  ;;  %v3553_v3 = vld [vmem:[%s821_s4] sm:$0xff]  ;;  %s3965_s29 = sld [smem:[#allocation30_spill]]  ;;  %s3163_s8 = smov 16  }
  0xd2   : > { %2586 = vmatprep.subr.bf16.mxu0 %v3153_v0  ;;  %v828_v7 = vpack.c.bf16 %v3553_v3, %v3553_v3  ;;  %v2471_v10 = vld [vmem:[%s3964_s20] ss:$0 sm:$0xff]  ;;  %s3164_s20 = smov 24   ;;  %s3967_s18 = sld [smem:[#allocation36_spill]] }
  0xd3   : > { %s3969_s4 = sld [smem:[#allocation34_spill]]  ;;  %s3972_s3 = sld [smem:[#allocation38_spill]] }
  0xd4   : > { %s3973_s25 = sld [smem:[#allocation39_spill]]  ;;  %p3975_p13 = scmp.ne.s32.totalorder %s3950_s1, 0 }
  0xd5   : > { %2587 = vmatpush3.bf16.msra.mxu0 %v2851_v2 }
  0xd6   : > { %2592 = vmatprep.subr.bf16.mxu0 %v3153_v0 }
  0xd7   : > { %s3966_s14 = smov %s3965_s29 }
  0xd8   : > { %2589 = vmatmul.mubr.msk.bf16.vlgmr.msra.gmra.mrb[0].mxu0 %vm852_vm2, %v828_v7 }
  0xd9   : > { %2594 = vmatprep.mubr.msk.bf16.mxu0 %vm3154_vm0, %v3153_v0 }
  0xde   : > { %2593 = vmatpush3.bf16.xpose.msra.mxu0 %v906_v6 }
  0xdf   : > { %2598 = vmatprep.subr.bf16.mxu0 %v3153_v0 }
 0x13f   : > { %v1017_v8 = vpop.permute.xlu0 %1016  ;;  %v1133_v17 = vpop.permute.xlu1 %1132 }
 0x140   : > { %v1022_v9 = vsel %vm901_vm1, %v1017_v8, 0  ;;  %v1138_v18 = vsel %vm901_vm1, %v1133_v17, 0 }
 0x141   : > { %2605 = vmatpush3.bf16.xpose.msra.mxu1 %v1022_v9 }
 0x142   : > { %2616 = vmatprep.subr.bf16.mxu1 %v3153_v0 }
 0x1ab   : > { %v890_v11 = vpop.f32.mrb[0].mxu0 }
 0x1ac   : > { %v891_v12 = vadd.f32 %v2471_v10, %v890_v11  ;;  %v2590_v13 = vpop.f32.mrb[1].mxu0 }
 0x1ad   : > { %v893_v14 = vpop.f32.mrb[2].mxu0 }
 0x1ae   : > { %v900_v15 = vpack.c.bf16 %v891_v12, %v891_v12  ;;  %v2591_v16 = vpop.f32.mrb[3].mxu0 }
 0x1b0   : > { %1130 = vrot.lane.b32.xlu1 %v900_v15, %s3156_s19  ;;  %1014 = vrot.lane.b32.xlu0 %v900_v15, %s3155_s17 }
 0x1b1   : > { %2595 = vmatmul.mubr.msk.bf16.vlgmr.msra.gmra.mrb[4].mxu0 %vm901_vm1, %v900_v15 }
 0x1b2   : > { %2600 = vmatprep.mubr.msk.bf16.mxu0 %vm3154_vm0, %v3153_v0 }
 0x1b4   : > { %1246 = vrot.lane.b32.xlu1 %v900_v15, %s3157_s22  ;;  %1248 = vrot.lane.b32.xlu0 %v3556_v5, %s3157_s22 }
 0x222   : > { %v1015_v19 = vpop.permute.xlu0 %1014  ;;  %v1131_v22 = vpop.permute.xlu1 %1130 }
 0x223   : > { %2607 = vmatmul.mubr.msk.bf16.vlgmr.msra.gmra.mrb[0].mxu1 %vm901_vm1, %v1015_v19 }
 0x224   : > { %2617 = vmatpush3.bf16.xpose.msra.mxu1 %v1138_v18  ;;  %2618 = vmatprep.mubr.msk.bf16.mxu1 %vm3154_vm0, %v3153_v0 }
 0x225   : > { %2628 = vmatprep.subr.bf16.mxu1 %v3153_v0 }
 0x226   : > { %v1249_v20 = vpop.permute.xlu0 %1248  ;;  %v1247_v23 = vpop.permute.xlu1 %1246 }
 0x227   : > { %v1254_v21 = vsel %vm901_vm1, %v1249_v20, 0 }
 0x22b   : > { %2619 = vmatmul.mubr.msk.bf16.vlgmr.msra.gmra.mrb[4].mxu1 %vm901_vm1, %v1131_v22 }
 0x22c   : > { %2629 = vmatpush3.bf16.xpose.msra.mxu1 %v1254_v21  ;;  %2630 = vmatprep.mubr.msk.bf16.mxu1 %vm3154_vm0, %v3153_v0 }
 0x22d   : > { %2640 = vmatprep.subr.bf16.mxu1 %v3153_v0 }
 0x233   : > { %2631 = vmatmul.mubr.msk.bf16.vlgmr.msra.gmra.mrb[8].mxu1 %vm901_vm1, %v1247_v23 }
 0x234   : > { %2644 = vmatprep.mubr.msk.bf16.mxu1 %vm3154_vm0, %v3153_v0 }
 0x284   : > { %v942_v26 = vpop.f32.mrb[4].mxu0 }
 0x285   : > { %v943_v27 = vadd.f32 %v942_v26, %v827_v25  ;;  %v2596_v28 = vpop.f32.mrb[5].mxu0 }
 0x286   : > { %v945_v29 = vpop.f32.mrb[6].mxu0 }
 0x287   : > { %v2597_v30 = vpop.f32.mrb[7].mxu0  ;;  %v948_v31 = vsel %vm901_vm1, %v943_v27, -inf }
 0x288   : > { %949 = vmax.xlane.f32.xlu0 %v948_v31 }
 0x2f6   : > { %v1058_v32 = vpop.f32.mrb[0].mxu1 }
 0x2f7   : > { %v1059_v33 = vadd.f32 %v1058_v32, %v827_v25  ;;  %v2608_v34 = vpop.f32.mrb[1].mxu1 }
 0x2f8   : > { %v1061_v35 = vpop.f32.mrb[2].mxu1 }
 0x2f9   : > { %v2609_v36 = vpop.f32.mrb[3].mxu1  ;;  %v1064_v37 = vsel %vm901_vm1, %v1059_v33, -inf }
 0x2fa   : > { %1065 = vmax.xlane.f32.xlu1 %v1064_v37 }
 0x2fe   : > { %v1174_v38 = vpop.f32.mrb[4].mxu1 }
 0x2ff   : > { %v1175_v39 = vadd.f32 %v1174_v38, %v827_v25  ;;  %v2620_v40 = vpop.f32.mrb[5].mxu1 }
 0x300   : > { %v1177_v41 = vpop.f32.mrb[6].mxu1  ;;  %v2853_v40 = vld [vmem:[%s3965_s29] sm:$0xff]  }
 0x301   : > { %v2621_v42 = vpop.f32.mrb[7].mxu1  ;;  %v1180_v43 = vsel %vm901_vm1, %v1175_v39, -inf  ;;  %2641 = vmatpush3.bf16.msra.mxu1 %v2853_v40  ;;  %v2854_v41 = vld [vmem:[%s3966_s14 + $0x8] sm:$0xff]  }
 0x302   : > { %1181 = vmax.xlane.f32.xlu0 %v1180_v43  ;;  %2642 = vmatprep.subr.bf16.mxu1 %v3153_v0 }
 0x305   : > { %2643 = vmatpush3.bf16.msra.mxu1 %v2854_v41 }
 0x306   : > { %v1290_v44 = vpop.f32.mrb[8].mxu1  ;;  %2656 = vmatprep.subr.bf16.mxu1 %v3153_v0 }
 0x307   : > { %v1291_v45 = vadd.f32 %v1290_v44, %v827_v25  ;;  %v2632_v46 = vpop.f32.mrb[9].mxu1 }
 0x308   : > { %v1293_v47 = vpop.f32.mrb[10].mxu1 }
 0x309   : > { %v2633_v48 = vpop.f32.mrb[11].mxu1  ;;  %v1296_v49 = vsel %vm901_vm1, %v1291_v45, -inf }
 0x30a   : > { %1297 = vmax.xlane.f32.xlu0 %v1296_v49 }
 0x315   : > { %v950_v50 = vpop.xlane.xlu0 %949 }
 0x316   : > { %v951_v51 = vsub.f32 %v943_v27, %v950_v50 }
 0x318   : > { %v952_v52 = vmul.f32 1.442695, %v951_v51 }
 0x31a   : > { %2870 = vpow2.f32 %v952_v52 }
 0x324   : > { %v2871_v53 = vpop.eup %2870 }
 0x325   : > { %v954_v54 = vsel %vm901_vm1, %v2871_v53, 0.0 }
 0x326   : > { %955 = vadd.xlane.f32.xlu1 %v954_v54 }
 0x337   : > { %963 = vrot.lane.b32.xlu1 %v3556_v5, %s3158_s5 }
 0x387   : > { %v1066_v55 = vpop.xlane.xlu1 %1065 }
 0x388   : > { %v1067_v56 = vsub.f32 %v1059_v33, %v1066_v55  ;;  %v2484_v55 = vld [vmem:[%s3887_s7] ss:$0 sm:$0xff] }
 0x38a   : > { %v1068_v57 = vmul.f32 1.442695, %v1067_v56 }
 0x38c   : > { %2872 = vpow2.f32 %v1068_v57 }
 0x38f   : > { %v1182_v58 = vpop.xlane.xlu0 %1181 }
 0x390   : > { %v1183_v59 = vsub.f32 %v1175_v39, %v1182_v58 }
 0x392   : > { %v1184_v60 = vmul.f32 1.442695, %v1183_v59 }
 0x394   : > { %2874 = vpow2.f32 %v1184_v60 }
 0x396   : > { %v2873_v61 = vpop.eup %2872 }
 0x397   : > { %v1298_v62 = vpop.xlane.xlu0 %1297  ;;  %v1070_v63 = vsel %vm901_vm1, %v2873_v61, 0.0 }
 0x398   : > { %v1299_v1 = vsub.f32 %v1291_v45, %v1298_v62  ;;  %1071 = vadd.xlane.f32.xlu0 %v1070_v63 }
 0x39a   : > { %v1300_v2 = vmul.f32 1.442695, %v1299_v1 }
 0x39c   : > { %2876 = vpow2.f32 %v1300_v2 }
 0x39e   : > { %v2875_v4 = vpop.eup %2874 }
 0x39f   : > { %v1186_v6 = vsel %vm901_vm1, %v2875_v4, 0.0 }
 0x3a0   : > { %1187 = vadd.xlane.f32.xlu1 %v1186_v6 }
 0x3a6   : > { %v2877_v7 = vpop.eup %2876 }
 0x3a7   : > { %v1302_v8 = vsel %vm901_vm1, %v2877_v7, 0.0 }
 0x3a8   : > { %1303 = vadd.xlane.f32.xlu0 %v1302_v8  ;;  %v2856_v8 = vld [vmem:[%s3890_s10 + $0x8] sm:$0xff]  }
 0x3b1   : > { %1192 = vrot.lane.b32.xlu1 %v3556_v5, %s3159_s24 }
 0x3b3   : > { %v956_v9 = vpop.xlane.xlu1 %955 }
 0x3b4   : > { %2878 = vrcp.f32 %v956_v9 }
 0x3b5   : > { %1308 = vrot.lane.b32.xlu1 %v3556_v5, %s3160_s2 }
 0x3b7   : > { %v964_v10 = vpop.permute.xlu1 %963 }
 0x3b8   : > { %v970_v11 = vsel %vm968_vm3, %v964_v10, 0 }
 0x3b9   : > { %2599 = vmatpush3.bf16.msra.mxu0 %v970_v11 }
 0x3ba   : > { %2610 = vmatprep.subr.bf16.mxu0 %v3153_v0 }
 0x3be   : > { %v2879_v12 = vpop.eup %2878  ;;  %1076 = vrot.lane.b32.xlu0 %v3556_v5, %s3161_s23 }
 0x3bf   : > { %v958_v13 = vmul.f32 %v2879_v12, %v2871_v53 }
 0x3c1   : > { %v959_v14 = vpack.c.bf16 %v958_v13, %v958_v13 }
 0x3c3   : > { %2601 = vmatmul.mubr.msk.bf16.vlgmr.msra.gmra.mrb[8].mxu0 %vm901_vm1, %v959_v14 }
 0x3c4   : > { %2612 = vmatprep.mubr.msk.bf16.mxu0 %vm3154_vm0, %v3153_v0 }
 0x425   : > { %v1072_v15 = vpop.xlane.xlu0 %1071 }
 0x426   : > { %2880 = vrcp.f32 %v1072_v15  ;;  %v2488_v15 = vld [vmem:[#allocation9] ss:$0 sm:$0xff] }
 0x42d   : > { %v1188_v16 = vpop.xlane.xlu1 %1187 }
 0x42e   : > { %2882 = vrcp.f32 %v1188_v16 }
 0x430   : > { %v2881_v17 = vpop.eup %2880 }
 0x431   : > { %v1074_v19 = vmul.f32 %v2881_v17, %v2873_v61  ;;  %v1193_v21 = vpop.permute.xlu1 %1192  ;;  %v2489_v17 = vld [vmem:[#allocation11] ss:$0 sm:$0xff] }
 0x432   : > { %v1198_v23 = vsel %vm968_vm3, %v1193_v21, 0  ;;  %v2490_v21 = vld [vmem:[%s3891_s11] ss:$0 sm:$0xff] }
 0x433   : > { %v1075_v5 = vpack.c.bf16 %v1074_v19, %v1074_v19 }
 0x435   : > { %v1304_v18 = vpop.xlane.xlu0 %1303  ;;  %v1309_v26 = vpop.permute.xlu1 %1308 }
 0x436   : > { %2884 = vrcp.f32 %v1304_v18  ;;  %v1314_v28 = vsel %vm968_vm3, %v1309_v26, 0 }
 0x438   : > { %v2883_v24 = vpop.eup %2882 }
 0x439   : > { %v1077_v20 = vpop.permute.xlu0 %1076  ;;  %v1190_v25 = vmul.f32 %v2883_v24, %v2875_v4 }
 0x43a   : > { %v1082_v22 = vsel %vm968_vm3, %v1077_v20, 0 }
 0x43b   : > { %2611 = vmatpush3.bf16.msra.mxu0 %v1082_v22  ;;  %v1191_v27 = vpack.c.bf16 %v1190_v25, %v1190_v25 }
 0x43c   : > { %2622 = vmatprep.subr.bf16.mxu0 %v3153_v0 }
 0x43e   : > { %2613 = vmatmul.mubr.msk.bf16.vlgmr.msra.gmra.mrb[12].mxu0 %vm901_vm1, %v1075_v5 }
 0x43f   : > { %2623 = vmatpush3.bf16.msra.mxu0 %v1198_v23  ;;  %2624 = vmatprep.mubr.msk.bf16.mxu0 %vm3154_vm0, %v3153_v0 }
 0x440   : > { %2634 = vmatprep.subr.bf16.mxu0 %v3153_v0  ;;  %v2885_v29 = vpop.eup %2884 }
 0x441   : > { %v1306_v30 = vmul.f32 %v2885_v29, %v2877_v7  ;;  %v2855_v7 = vld [vmem:[%s3890_s10] sm:$0xff]  }
 0x443   : > { %v1307_v31 = vpack.c.bf16 %v1306_v30, %v1306_v30 }
 0x446   : > { %2625 = vmatmul.mubr.msk.bf16.vlgmr.msra.gmra.mrb[16].mxu0 %vm901_vm1, %v1191_v27 }
 0x447   : > { %2635 = vmatpush3.bf16.msra.mxu0 %v1314_v28  ;;  %2636 = vmatprep.mubr.msk.bf16.mxu0 %vm3154_vm0, %v3153_v0 }
 0x448   : > { %2648 = vmatprep.subr.bf16.mxu0 %v3153_v0 }
 0x44e   : > { %2637 = vmatmul.mubr.msk.bf16.vlgmr.msra.gmra.mrb[20].mxu0 %vm901_vm1, %v1307_v31 }
 0x44f   : > { %2652 = vmatprep.mubr.msk.bf16.mxu0 %vm3154_vm0, %v3153_v0  ;;  %2649 = vmatpush3.bf16.msra.mxu0 %v2855_v7 }
 0x450   : > { %2650 = vmatprep.subr.bf16.mxu0 %v3153_v0 }
 0x453   : > { %2651 = vmatpush3.bf16.msra.mxu0 %v2856_v8 }
 0x454   : > { %2662 = vmatprep.subr.bf16.mxu0 %v3153_v0 }
 0x496   : > { %v1006_v32 = vpop.f32.mrb[8].mxu0 }
 0x497   : > { %1012 = vst.msk [vmem:[#allocation2] sm:$0xff] %vm901_vm1, %v1006_v32  ;;  %v2602_v33 = vpop.f32.mrb[9].mxu0 }
 0x498   : > { %v1009_v34 = vpop.f32.mrb[10].mxu0 }
 0x499   : > { %v2603_v35 = vpop.f32.mrb[11].mxu0 }
 0x511   : > { %v1118_v36 = vpop.f32.mrb[12].mxu0 }
 0x512   : > { %1125 = vrot.lane.b32.xlu0 %v1118_v36, %s3162_s15  ;;  %v2614_v37 = vpop.f32.mrb[13].mxu0 }
 0x513   : > { %v1121_v38 = vpop.f32.mrb[14].mxu0 }
 0x514   : > { %v2615_v39 = vpop.f32.mrb[15].mxu0 }
 0x519   : > { %v1234_v42 = vpop.f32.mrb[16].mxu0 }
 0x51a   : > { %1241 = vrot.lane.b32.xlu1 %v1234_v42, %s3163_s8  ;;  %v2626_v43 = vpop.f32.mrb[17].mxu0 }
 0x51b   : > { %v1237_v44 = vpop.f32.mrb[18].mxu0 }
 0x51c   : > { %v2627_v45 = vpop.f32.mrb[19].mxu0 }
 0x521   : > { %v1350_v46 = vpop.f32.mrb[20].mxu0 }
 0x522   : > { %1357 = vrot.lane.b32.xlu0 %v1350_v46, %s3164_s20  ;;  %v2638_v47 = vpop.f32.mrb[21].mxu0 }
 0x523   : > { %v1353_v48 = vpop.f32.mrb[22].mxu0 }
 0x524   : > { %v2639_v49 = vpop.f32.mrb[23].mxu0 }
 0x584   : > { %v1126_v50 = vpop.permute.xlu0 %1125 }
 0x585   : > { %1129 = vst.msk [vmem:[#allocation2] sm:$0xff] %vm1128_vm4, %v1126_v50 }
 0x58c   : > { %v1242_v51 = vpop.permute.xlu1 %1241 }
 0x58d   : > { %1245 = vst.msk [vmem:[#allocation2] sm:$0xff] %vm1244_vm5, %v1242_v51 }
 0x594   : > { %v1358_v52 = vpop.permute.xlu0 %1357 }
 0x595   : > { %1361 = vst.msk [vmem:[#allocation2] sm:$0xff] %vm1360_vm6, %v1358_v52 }
 0x59c   : > { %v1362_v53 = vld [vmem:[#allocation2] sm:$0xff] }
 0x59d   : > { %v1363_v54 = vpack.c.bf16 %v1362_v53, %v1362_v53 }
 0x59f   : > { %2645 = vmatmul.mubr.msk.bf16.vlgmr.msra.gmra.mrb[12].mxu1 %vm852_vm2, %v1363_v54 }
 0x5a0   : > { %2658 = vmatprep.mubr.msk.bf16.mxu1 %vm3154_vm0, %v3153_v0 }
 0x672   : > { %v1420_v56 = vpop.f32.mrb[12].mxu1 }
 0x673   : > { %v1421_v57 = vadd.f32 %v2484_v55, %v1420_v56  ;;  %v2646_v58 = vpop.f32.mrb[13].mxu1 }
 0x674   : > { %v1423_v59 = vpop.f32.mrb[14].mxu1 }
 0x675   : > { %v2647_v60 = vpop.f32.mrb[15].mxu1  ;;  %v1426_v61 = vadd.f32 %v1421_v57, %v3553_v3  ;;  %v825_v3 = vld [vmem:[%s3522_s6] sm:$0xf] }
 0x676   : > { %v3665_v9 = vcombine.low %v825_v3, %v825_v3  ;;  %v1533_v10 = vsel %vm901_vm1, %v825_v3, 0 }
 0x677   : > { %v1429_v62 = vsel %vm852_vm2, %v1426_v61, 0.0  ;;  %2657 = vmatpush3.bf16.xpose.msra.mxu1 %v1533_v10 }
 0x678   : > { %1430 = vadd.xlane.f32.xlu1 %v1429_v62  ;;  %2668 = vmatprep.subr.bf16.mxu1 %v3153_v0 }
 0x705   : > { %v1431_v63 = vpop.xlane.xlu1 %1430 }
 0x706   : > { %v1433_v1 = vmul.f32 0.03125, %v1431_v63 }
 0x708   : > { %v1434_v2 = vsub.f32 %v1426_v61, %v1433_v1 }
 0x70a   : > { %v1435_v4 = vmul.f32 %v1434_v2, %v1434_v2 }
 0x70c   : > { %v1436_v6 = vsel %vm852_vm2, %v1435_v4, 0.0 }
 0x70d   : > { %1437 = vadd.xlane.f32.xlu0 %v1436_v6 }
 0x723   : > { %1642 = vrot.lane.b32.xlu0 %v3665_v9, %s3155_s17 }
 0x79a   : > { %v1438_v11 = vpop.xlane.xlu0 %1437 }
 0x79b   : > { %v1439_v12 = vmul.f32 0.03125, %v1438_v11 }
 0x79d   : > { %v1440_v13 = vadd.f32 1e-05, %v1439_v12 }
 0x79e   : > { %v1643_v24 = vpop.permute.xlu0 %1642 }
 0x79f   : > { %2886 = vrsqrt.f32 %v1440_v13  ;;  %v1648_v28 = vsel %vm901_vm1, %v1643_v24, 0 }
 0x7a9   : > { %v2887_v14 = vpop.eup %2886 }
 0x7aa   : > { %v1442_v16 = vmul.f32 %v2887_v14, %v1434_v2 }
 0x7ac   : > { %v1449_v18 = vmul.f32 %v2488_v15, %v1442_v16 }
 0x7ae   : > { %v3671_v19 = vadd.f32 %v2489_v17, %v1449_v18 }
 0x7b0   : > { %v1457_v20 = vpack.c.bf16 %v3671_v19, %v3671_v19 }
 0x7b2   : > { %2653 = vmatmul.mubr.msk.bf16.vlgmr.msra.gmra.mrb[24].mxu0 %vm852_vm2, %v1457_v20 }
 0x7b3   : > { %2664 = vmatprep.mubr.msk.bf16.mxu0 %vm3154_vm0, %v3153_v0 }
 0x885   : > { %v1518_v22 = vpop.f32.mrb[24].mxu0 }
 0x886   : > { %v1519_v5 = vadd.f32 %v2490_v21, %v1518_v22  ;;  %v2654_v23 = vpop.f32.mrb[25].mxu0 }
 0x887   : > { %v1521_v25 = vpop.f32.mrb[26].mxu0 }
 0x888   : > { %v1528_v26 = vpack.c.bf16 %v1519_v5, %v1519_v5  ;;  %v2655_v27 = vpop.f32.mrb[27].mxu0 }
 0x88a   : > { %1755 = vrot.lane.b32.xlu0 %v1528_v26, %s3156_s19  ;;  %1640 = vrot.lane.b32.xlu1 %v1528_v26, %s3155_s17  ;;  %s2525_s17 = sshll.u32 %s3138_s30, 7  ;;  %s3165_s30 = smov [#allocation12]  }
 0x88b   : > { %2659 = vmatmul.mubr.msk.bf16.vlgmr.msra.gmra.mrb[16].mxu1 %vm901_vm1, %v1528_v26 }
 0x88c   : > { %2669 = vmatpush3.bf16.xpose.msra.mxu1 %v1648_v28  ;;  %2670 = vmatprep.mubr.msk.bf16.mxu1 %vm3154_vm0, %v3153_v0 }
 0x88d   : > { %2680 = vmatprep.subr.bf16.mxu1 %v3153_v0 }
 0x88e   : > { %1870 = vrot.lane.b32.xlu0 %v1528_v26, %s3157_s22  ;;  %1757 = vrot.lane.b32.xlu1 %v3665_v9, %s3156_s19 }
 0x892   : > { %1872 = vrot.lane.b32.xlu1 %v3665_v9, %s3157_s22 }
 0x8fc   : > { %v1641_v29 = vpop.permute.xlu1 %1640  ;;  %v1756_v34 = vpop.permute.xlu0 %1755 }
 0x8fd   : > { %2671 = vmatmul.mubr.msk.bf16.vlgmr.msra.gmra.mrb[20].mxu1 %vm901_vm1, %v1641_v29 }
 0x8fe   : > { %2682 = vmatprep.mubr.msk.bf16.mxu1 %vm3154_vm0, %v3153_v0 }
 0x900   : > { %v1758_v30 = vpop.permute.xlu1 %1757  ;;  %v1871_v35 = vpop.permute.xlu0 %1870 }
 0x901   : > { %v1763_v31 = vsel %vm901_vm1, %v1758_v30, 0 }
 0x902   : > { %2681 = vmatpush3.bf16.xpose.msra.mxu1 %v1763_v31 }
 0x903   : > { %2692 = vmatprep.subr.bf16.mxu1 %v3153_v0 }
 0x904   : > { %v1873_v32 = vpop.permute.xlu1 %1872 }
 0x905   : > { %v1878_v33 = vsel %vm901_vm1, %v1873_v32, 0 }
 0x909   : > { %2683 = vmatmul.mubr.msk.bf16.vlgmr.msra.gmra.mrb[24].mxu1 %vm901_vm1, %v1756_v34 }
 0x90a   : > { %2693 = vmatpush3.bf16.xpose.msra.mxu1 %v1878_v33  ;;  %2694 = vmatprep.mubr.msk.bf16.mxu1 %vm3154_vm0, %v3153_v0 }
 0x90b   : > { %2704 = vmatprep.subr.bf16.mxu1 %v3153_v0 }
 0x911   : > { %2695 = vmatmul.mubr.msk.bf16.vlgmr.msra.gmra.mrb[28].mxu1 %vm901_vm1, %v1871_v35 }
 0x912   : > { %2708 = vmatprep.mubr.msk.bf16.mxu1 %vm3154_vm0, %v3153_v0 }
 0x95e   : > { %v1569_v36 = vpop.f32.mrb[16].mxu1 }
 0x95f   : > { %v2660_v37 = vpop.f32.mrb[17].mxu1  ;;  %v1575_v38 = vsel %vm901_vm1, %v1569_v36, -inf }
 0x960   : > { %1576 = vmax.xlane.f32.xlu1 %v1575_v38  ;;  %v1572_v39 = vpop.f32.mrb[18].mxu1 }
 0x961   : > { %v2661_v40 = vpop.f32.mrb[19].mxu1 }
 0x9d0   : > { %v1684_v41 = vpop.f32.mrb[20].mxu1 }
 0x9d1   : > { %v2672_v42 = vpop.f32.mrb[21].mxu1  ;;  %v1690_v43 = vsel %vm901_vm1, %v1684_v41, -inf }
 0x9d2   : > { %1691 = vmax.xlane.f32.xlu0 %v1690_v43  ;;  %v1687_v44 = vpop.f32.mrb[22].mxu1 }
 0x9d3   : > { %v2673_v45 = vpop.f32.mrb[23].mxu1 }
 0x9dc   : > { %v1799_v46 = vpop.f32.mrb[24].mxu1 }
 0x9dd   : > { %v2684_v47 = vpop.f32.mrb[25].mxu1  ;;  %v1805_v48 = vsel %vm901_vm1, %v1799_v46, -inf }
 0x9de   : > { %1806 = vmax.xlane.f32.xlu0 %v1805_v48  ;;  %v1802_v49 = vpop.f32.mrb[26].mxu1  ;;  %v2859_v47 = vld [vmem:[%s3892_s12 + $0x8] sm:$0xff]  }
 0x9df   : > { %v2685_v50 = vpop.f32.mrb[27].mxu1 }
 0x9e4   : > { %v1914_v51 = vpop.f32.mrb[28].mxu1 }
 0x9e5   : > { %v2696_v52 = vpop.f32.mrb[29].mxu1  ;;  %v1920_v53 = vsel %vm901_vm1, %v1914_v51, -inf }
 0x9e6   : > { %1921 = vmax.xlane.f32.xlu1 %v1920_v53  ;;  %v1917_v54 = vpop.f32.mrb[30].mxu1 }
 0x9e7   : > { %v2697_v55 = vpop.f32.mrb[31].mxu1 }
 0x9ed   : > { %v1577_v56 = vpop.xlane.xlu1 %1576 }
 0x9ee   : > { %v1578_v57 = vsub.f32 %v1569_v36, %v1577_v56 }
 0x9f0   : > { %v1579_v58 = vmul.f32 1.442695, %v1578_v57 }
 0x9f2   : > { %2888 = vpow2.f32 %v1579_v58 }
 0x9fc   : > { %v2889_v59 = vpop.eup %2888 }
 0x9fd   : > { %v1581_v60 = vsel %vm901_vm1, %v2889_v59, 0.0 }
 0x9fe   : > { %1582 = vadd.xlane.f32.xlu0 %v1581_v60 }
 0xa5f   : > { %v1692_v61 = vpop.xlane.xlu0 %1691 }
 0xa60   : > { %v1693_v62 = vsub.f32 %v1684_v41, %v1692_v61  ;;  %v2503_v61 = vld [vmem:[%s3893_s13] ss:$0 sm:$0xff] }
 0xa62   : > { %v1694_v63 = vmul.f32 1.442695, %v1693_v62 }
 0xa64   : > { %2890 = vpow2.f32 %v1694_v63 }
 0xa6b   : > { %v1807_v1 = vpop.xlane.xlu0 %1806 }
 0xa6c   : > { %v1808_v2 = vsub.f32 %v1799_v46, %v1807_v1  ;;  %v2858_v46 = vld [vmem:[%s3892_s12] sm:$0xff]  }
 0xa6d   : > { %2705 = vmatpush3.bf16.msra.mxu1 %v2858_v46 }
 0xa6e   : > { %v2891_v4 = vpop.eup %2890  ;;  %v1809_v6 = vmul.f32 1.442695, %v1808_v2  ;;  %2706 = vmatprep.subr.bf16.mxu1 %v3153_v0 }
 0xa6f   : > { %v1696_v7 = vsel %vm901_vm1, %v2891_v4, 0.0 }
 0xa70   : > { %2892 = vpow2.f32 %v1809_v6  ;;  %1697 = vadd.xlane.f32.xlu1 %v1696_v7 }
 0xa71   : > { %2707 = vmatpush3.bf16.msra.mxu1 %v2859_v47 }
 0xa72   : > { %2720 = vmatprep.subr.bf16.mxu1 %v3153_v0 }
 0xa73   : > { %v1922_v10 = vpop.xlane.xlu1 %1921 }
 0xa74   : > { %v1923_v11 = vsub.f32 %v1914_v51, %v1922_v10 }
 0xa76   : > { %v1924_v12 = vmul.f32 1.442695, %v1923_v11 }
 0xa78   : > { %2894 = vpow2.f32 %v1924_v12 }
 0xa7a   : > { %v2893_v8 = vpop.eup %2892 }
 0xa7b   : > { %v1811_v3 = vsel %vm901_vm1, %v2893_v8, 0.0 }
 0xa7c   : > { %1812 = vadd.xlane.f32.xlu0 %v1811_v3 }
 0xa81   : > { %1702 = vrot.lane.b32.xlu1 %v3665_v9, %s3161_s23 }
 0xa82   : > { %v2895_v13 = vpop.eup %2894 }
 0xa83   : > { %v1926_v14 = vsel %vm901_vm1, %v2895_v13, 0.0 }
 0xa8b   : > { %v1583_v15 = vpop.xlane.xlu0 %1582 }
 0xa8c   : > { %2896 = vrcp.f32 %v1583_v15  ;;  %v2863_v15 = vld [vmem:[%s3967_s18 + $0x8] sm:$0xff]  }
 0xa92   : > { %1590 = vrot.lane.b32.xlu0 %v3665_v9, %s3158_s5 }
 0xa96   : > { %1932 = vrot.lane.b32.xlu0 %v3665_v9, %s3160_s2  ;;  %v2897_v17 = vpop.eup %2896  ;;  %s3974_s2 = sld [smem:[#allocation40_spill]] }
 0xa97   : > { %v1585_v20 = vmul.f32 %v2897_v17, %v2889_v59  ;;  %v2865_v17 = vld [vmem:[%s3967_s18 + $0x18] sm:$0xff]  }
 0xa99   : > { %v1586_v23 = vpack.c.bf16 %v1585_v20, %v1585_v20  ;;  %v2867_v20 = vld [vmem:[%s3967_s18 + $0x28] sm:$0xff]  }
 0xa9c   : > { %s3830_s23 = scalar_lea.hbm %s3974_s2, %s2525_s17 }
 0xaa5   : > { %1927 = vadd.xlane.f32.xlu1 %v1926_v14  ;;  %v2861_v14 = vld [vmem:[%s3896_s16 + $0x8] sm:$0xff]  }
 0xab6   : > { %1817 = vrot.lane.b32.xlu1 %v3665_v9, %s3159_s24  ;;  %s3970_s24 = sld [smem:[#allocation35_spill]] }
 0xafd   : > { %v1698_v16 = vpop.xlane.xlu1 %1697 }
 0xafe   : > { %2898 = vrcp.f32 %v1698_v16  ;;  %v2864_v16 = vld [vmem:[%s3967_s18 + $0x10] sm:$0xff]  }
 0xb01   : > { %v1703_v5 = vpop.permute.xlu1 %1702 }
 0xb02   : > { %v1708_v25 = vsel %vm968_vm3, %v1703_v5, 0 }
 0xb08   : > { %v2899_v24 = vpop.eup %2898 }
 0xb09   : > { %v1813_v18 = vpop.xlane.xlu0 %1812  ;;  %v1700_v9 = vmul.f32 %v2899_v24, %v2891_v4 }
 0xb0a   : > { %2900 = vrcp.f32 %v1813_v18  ;;  %v2866_v18 = vld [vmem:[%s3967_s18 + $0x20] sm:$0xff]  }
 0xb0b   : > { %v1701_v26 = vpack.c.bf16 %v1700_v9, %v1700_v9  ;;  %v2508_v9 = vld [vmem:[%s3969_s4] ss:$0 sm:$0xff] }
 0xb0d   : > { %v1591_v21 = vpop.permute.xlu0 %1590 }
 0xb0e   : > { %v1596_v22 = vsel %vm968_vm3, %v1591_v21, 0 }
 0xb0f   : > { %2663 = vmatpush3.bf16.msra.mxu0 %v1596_v22 }
 0xb10   : > { %2674 = vmatprep.subr.bf16.mxu0 %v3153_v0 }
 0xb11   : > { %v1933_v31 = vpop.permute.xlu0 %1932 }
 0xb12   : > { %2665 = vmatmul.mubr.msk.bf16.vlgmr.msra.gmra.mrb[28].mxu0 %vm901_vm1, %v1586_v23  ;;  %v1938_v34 = vsel %vm968_vm3, %v1933_v31, 0  ;;  %v2509_v31 = vld [vmem:[%s3970_s24] ss:$0 sm:$0xff] }
 0xb13   : > { %2675 = vmatpush3.bf16.msra.mxu0 %v1708_v25  ;;  %2676 = vmatprep.mubr.msk.bf16.mxu0 %vm3154_vm0, %v3153_v0 }
 0xb14   : > { %2686 = vmatprep.subr.bf16.mxu0 %v3153_v0  ;;  %v2901_v27 = vpop.eup %2900 }
 0xb15   : > { %v1815_v29 = vmul.f32 %v2901_v27, %v2893_v8 }
 0xb17   : > { %v1816_v33 = vpack.c.bf16 %v1815_v29, %v1815_v29  ;;  %v2868_v29 = vld [vmem:[%s3967_s18 + $0x30] sm:$0xff]  }
 0xb1a   : > { %2677 = vmatmul.mubr.msk.bf16.vlgmr.msra.gmra.mrb[32].mxu0 %vm901_vm1, %v1701_v26 }
 0xb1b   : > { %2688 = vmatprep.mubr.msk.bf16.mxu0 %vm3154_vm0, %v3153_v0 }
 0xb32   : > { %v1928_v28 = vpop.xlane.xlu1 %1927 }
 0xb33   : > { %2902 = vrcp.f32 %v1928_v28 }
 0xb36   : > { %v1818_v30 = vpop.permute.xlu1 %1817 }
 0xb37   : > { %v1823_v32 = vsel %vm968_vm3, %v1818_v30, 0  ;;  %v2869_v30 = vld [vmem:[%s3967_s18 + $0x38] sm:$0xff]  }
 0xb38   : > { %2687 = vmatpush3.bf16.msra.mxu0 %v1823_v32 }
 0xb39   : > { %2698 = vmatprep.subr.bf16.mxu0 %v3153_v0 }
 0xb3b   : > { %2689 = vmatmul.mubr.msk.bf16.vlgmr.msra.gmra.mrb[36].mxu0 %vm901_vm1, %v1816_v33 }
 0xb3c   : > { %2699 = vmatpush3.bf16.msra.mxu0 %v1938_v34  ;;  %2700 = vmatprep.mubr.msk.bf16.mxu0 %vm3154_vm0, %v3153_v0 }
 0xb3d   : > { %v2903_v35 = vpop.eup %2902  ;;  %2712 = vmatprep.subr.bf16.mxu0 %v3153_v0 }
 0xb3e   : > { %v1930_v36 = vmul.f32 %v2903_v35, %v2895_v13  ;;  %v2860_v13 = vld [vmem:[%s3896_s16] sm:$0xff]  }
 0xb40   : > { %v1931_v37 = vpack.c.bf16 %v1930_v36, %v1930_v36 }
 0xb43   : > { %2701 = vmatmul.mubr.msk.bf16.vlgmr.msra.gmra.mrb[40].mxu0 %vm901_vm1, %v1931_v37 }
 0xb44   : > { %2716 = vmatprep.mubr.msk.bf16.mxu0 %vm3154_vm0, %v3153_v0  ;;  %2713 = vmatpush3.bf16.msra.mxu0 %v2860_v13 }
 0xb45   : > { %2714 = vmatprep.subr.bf16.mxu0 %v3153_v0 }
 0xb48   : > { %2715 = vmatpush3.bf16.msra.mxu0 %v2861_v14 }
 0xbe5   : > { %v1632_v38 = vpop.f32.mrb[28].mxu0 }
 0xbe6   : > { %1638 = vst.msk [vmem:[#allocation2] sm:$0xff] %vm901_vm1, %v1632_v38  ;;  %v2666_v39 = vpop.f32.mrb[29].mxu0 }
 0xbe7   : > { %v1635_v40 = vpop.f32.mrb[30].mxu0 }
 0xbe8   : > { %v2667_v41 = vpop.f32.mrb[31].mxu0 }
 0xbed   : > { %v1744_v42 = vpop.f32.mrb[32].mxu0 }
 0xbee   : > { %1751 = vrot.lane.b32.xlu1 %v1744_v42, %s3162_s15  ;;  %v2678_v43 = vpop.f32.mrb[33].mxu0  ;;  %s3971_s15 = sld [smem:[#allocation37_spill]] }
 0xbef   : > { %v1747_v44 = vpop.f32.mrb[34].mxu0 }
 0xbf0   : > { %v2679_v45 = vpop.f32.mrb[35].mxu0 }
 0xc0e   : > { %v1859_v48 = vpop.f32.mrb[36].mxu0 }
 0xc0f   : > { %1866 = vrot.lane.b32.xlu0 %v1859_v48, %s3163_s8  ;;  %v2690_v49 = vpop.f32.mrb[37].mxu0  ;;  %s2469_s8 = sshll.u32 %s3513_s26, 3 }
 0xc10   : > { %v1862_v50 = vpop.f32.mrb[38].mxu0  ;;  %s814_s19 = scalar_lea.vmem [#allocation12], %s2469_s8  ;;  %s3056_s8 = sshll.u32 %s3165_s30, 4  ;;  %s3057_s8 = int_to_ptr.vmem [resolvable:$false] %s3056_s8 }
 0xc11   : > { %v2691_v51 = vpop.f32.mrb[39].mxu0  ;;  %s2305_s22 = sshll.u32 %s814_s19, 4  ;;  %s3058_s29 = scalar_lea.vmem %s3057_s8, 256  ;;  %s3832_s22 = int_to_ptr.vmem [resolvable:$true] %s2305_s22 }
 0xc12   : > { %p3059_p12 = scmp.lt.s32.totalorder %s3832_s22, %s3057_s8 }
 0xc16   : > { %v1974_v52 = vpop.f32.mrb[40].mxu0 }
 0xc17   : > { %1981 = vrot.lane.b32.xlu1 %v1974_v52, %s3164_s20  ;;  %v2702_v53 = vpop.f32.mrb[41].mxu0  ;;  %s3968_s20 = sld [smem:[#allocation33_spill]] }
 0xc18   : > { %v1977_v54 = vpop.f32.mrb[42].mxu0 }
 0xc19   : > { %v2703_v55 = vpop.f32.mrb[43].mxu0 }
 0xc1a   : > { %v2522_v55 = vld [vmem:[%s3972_s3] ss:$0 sm:$0xff] }
 0xc1d   : > { %v2507_v24 = vld [vmem:[%s3968_s20] ss:$0 sm:$0xff]  ;;  %s3052_s20 = scalar_lea.vmem %s3832_s22, 128 }
 0xc1e   : > { %p3053_p10 = scmp.ne.s32.totalorder %s3832_s22, %s3052_s20  ;;  %p3060_p4 = scmp.lt.s32.totalorder %s3058_s29, %s3052_s20 }
 0xc20   : > { %p3054_p9 = pnand %p3053_p10, %p3975_p13  ;;  %p3061_p6 = por %p3060_p4, %p3059_p12 }
 0xc22   : > { %p3055_p7 = pneg %p3054_p9 }
 0xc24   : > { %p3062_p2 = pnand %p3061_p6, %p3055_p7 }
 0xc60   : > { %v1752_v56 = vpop.permute.xlu1 %1751 }
 0xc61   : > { %1754 = vst.msk [vmem:[#allocation2] sm:$0xff] %vm1128_vm4, %v1752_v56 }
 0xc81   : > { %v1867_v57 = vpop.permute.xlu0 %1866 }
 0xc82   : > { %1869 = vst.msk [vmem:[#allocation2] sm:$0xff] %vm1244_vm5, %v1867_v57  ;;  %v2523_v57 = vld [vmem:[%s3973_s25] ss:$0 sm:$0xff] }
 0xc89   : > { %v1982_v58 = vpop.permute.xlu1 %1981 }
 0xc8a   : > { %1984 = vst.msk [vmem:[#allocation2] sm:$0xff] %vm1360_vm6, %v1982_v58 }
 0xc91   : > { %v1985_v59 = vld [vmem:[#allocation2] sm:$0xff] }
 0xc92   : > { %v1986_v60 = vpack.c.bf16 %v1985_v59, %v1985_v59 }
 0xc94   : > { %2709 = vmatmul.mubr.msk.bf16.vlgmr.msra.gmra.mrb[32].mxu1 %vm852_vm2, %v1986_v60 }
 0xc95   : > { %2736 = vmatprep.mubr.msk.bf16.mxu1 %vm3154_vm0, %v3153_v0 }
 0xd67   : > { %v2043_v62 = vpop.f32.mrb[32].mxu1 }
 0xd68   : > { %v2044_v63 = vadd.f32 %v2503_v61, %v2043_v62  ;;  %v2710_v1 = vpop.f32.mrb[33].mxu1 }
 0xd69   : > { %v2046_v2 = vpop.f32.mrb[34].mxu1 }
 0xd6a   : > { %v2711_v4 = vpop.f32.mrb[35].mxu1  ;;  %v2049_v6 = vadd.f32 %v2044_v63, %v3671_v19  ;;  %v2862_v19 = vld [vmem:[%s3967_s18] sm:$0xff]  }
 0xd6b   : > { %2721 = vmatpush3.bf16.msra.mxu1 %v2862_v19 }
 0xd6c   : > { %v2052_v7 = vsel %vm852_vm2, %v2049_v6, 0.0  ;;  %2722 = vmatprep.subr.bf16.mxu1 %v3153_v0 }
 0xd6d   : > { %2053 = vadd.xlane.f32.xlu0 %v2052_v7 }
 0xd6f   : > { %2723 = vmatpush3.bf16.msra.mxu1 %v2863_v15 }
 0xd70   : > { %2724 = vmatprep.subr.bf16.mxu1 %v3153_v0 }
 0xd73   : > { %2725 = vmatpush3.bf16.msra.mxu1 %v2864_v16 }
 0xd74   : > { %2726 = vmatprep.subr.bf16.mxu1 %v3153_v0 }
 0xd77   : > { %2727 = vmatpush3.bf16.msra.mxu1 %v2865_v17 }
 0xd78   : > { %2728 = vmatprep.subr.bf16.mxu1 %v3153_v0 }
 0xd7b   : > { %2729 = vmatpush3.bf16.msra.mxu1 %v2866_v18 }
 0xd7c   : > { %2730 = vmatprep.subr.bf16.mxu1 %v3153_v0 }
 0xd7f   : > { %2731 = vmatpush3.bf16.msra.mxu1 %v2867_v20 }
 0xd80   : > { %2732 = vmatprep.subr.bf16.mxu1 %v3153_v0 }
 0xd83   : > { %2733 = vmatpush3.bf16.msra.mxu1 %v2868_v29 }
 0xd84   : > { %2734 = vmatprep.subr.bf16.mxu1 %v3153_v0  ;;  %v2513_v0 = vld [vmem:[%s3971_s15] ss:$0 sm:$0xff]  ;;  %s2291_s15 = scalar_lea.sflag [#allocation5], %s3513_s26 }
 0xd87   : > { %2735 = vmatpush3.bf16.msra.mxu1 %v2869_v30 }
 0xdfa   : > { %v2054_v8 = vpop.xlane.xlu0 %2053 }
 0xdfb   : > { %v2055_v3 = vmul.f32 0.03125, %v2054_v8 }
 0xdfd   : > { %v2056_v10 = vsub.f32 %v2049_v6, %v2055_v3 }
 0xdff   : > { %v2057_v11 = vmul.f32 %v2056_v10, %v2056_v10 }
 0xe01   : > { %v2058_v12 = vsel %vm852_vm2, %v2057_v11, 0.0 }
 0xe02   : > { %2059 = vadd.xlane.f32.xlu1 %v2058_v12 }
 0xe8f   : > { %v2060_v21 = vpop.xlane.xlu1 %2059 }
 0xe90   : > { %v2061_v22 = vmul.f32 0.03125, %v2060_v21 }
 0xe92   : > { %v2062_v5 = vadd.f32 1e-05, %v2061_v22 }
 0xe94   : > { %2904 = vrsqrt.f32 %v2062_v5 }
 0xe9e   : > { %v2905_v23 = vpop.eup %2904 }
 0xe9f   : > { %v2064_v25 = vmul.f32 %v2905_v23, %v2056_v10 }
 0xea1   : > { %v2071_v26 = vmul.f32 %v2507_v24, %v2064_v25 }
 0xea3   : > { %v2078_v27 = vadd.f32 %v2508_v9, %v2071_v26 }
 0xea5   : > { %v2079_v28 = vpack.c.bf16 %v2078_v27, %v2078_v27 }
 0xea7   : > { %2717 = vmatmul.mubr.msk.bf16.vlgmr.msra.gmra.mrb[44].mxu0 %vm852_vm2, %v2079_v28 }
 0xf7a   : > { %v2140_v32 = vpop.f32.mrb[44].mxu0 }
 0xf7b   : > { %v2141_v33 = vadd.f32 %v2509_v31, %v2140_v32  ;;  %v2718_v34 = vpop.f32.mrb[45].mxu0 }
 0xf7c   : > { %v2143_v35 = vpop.f32.mrb[46].mxu0 }
 0xf7d   : > { %v2146_v36 = vmax.f32 %v2141_v33, 0.0  ;;  %v2719_v37 = vpop.f32.mrb[47].mxu0 }
 0xf7f   : > { %v2147_v38 = vpack.c.bf16 %v2146_v36, %v2146_v36 }
 0xf81   : > { %2737 = vmatmul.mubr.bf16.vlgmr.msra.gmra.mrb[36].mxu1 %v2147_v38 }
0x1054   : > { %v2253_v39 = vpop.f32.mrb[36].mxu1 }
0x1055   : > { %v2254_v40 = vadd.f32 %v2513_v0, %v2253_v39  ;;  %v2738_v41 = vpop.f32.mrb[37].mxu1 }
0x1056   : > { %v2256_v42 = vpop.f32.mrb[38].mxu1 }
0x1057   : > { %v2739_v43 = vpop.f32.mrb[39].mxu1  ;;  %v2259_v44 = vadd.f32 %v2254_v40, %v2078_v27 }
0x1059   : > { %v2262_v45 = vsel %vm852_vm2, %v2259_v44, 0.0 }
0x105a   : > { %2263 = vadd.xlane.f32.xlu0 %v2262_v45 }
0x10e7   : > { %v2264_v46 = vpop.xlane.xlu0 %2263 }
0x10e8   : > { %v2265_v47 = vmul.f32 0.03125, %v2264_v46 }
0x10ea   : > { %v2266_v48 = vsub.f32 %v2259_v44, %v2265_v47 }
0x10ec   : > { %v2267_v49 = vmul.f32 %v2266_v48, %v2266_v48 }
0x10ee   : > { %v2268_v50 = vsel %vm852_vm2, %v2267_v49, 0.0 }
0x10ef   : > { %2269 = vadd.xlane.f32.xlu0 %v2268_v50 }
0x117c   : > { %v2270_v51 = vpop.xlane.xlu0 %2269 }
0x117d   : > { %v2271_v52 = vmul.f32 0.03125, %v2270_v51 }
0x117f   : > { %v2272_v53 = vadd.f32 1e-05, %v2271_v52 }
0x1181   : > { %2906 = vrsqrt.f32 %v2272_v53 }
0x118b   : > { %v2907_v54 = vpop.eup %2906 }
0x118c   : > { %v2274_v56 = vmul.f32 %v2907_v54, %v2266_v48 }
0x118e   : > { %v2281_v58 = vmul.f32 %v2522_v55, %v2274_v56 }
0x1190   : > { %v2288_v59 = vadd.f32 %v2523_v57, %v2281_v58 }
0x1192   : > { %2289 = vst.msk [vmem:[%s814_s19] sm:$0xff] %vm852_vm2, %v2288_v59 }
0x1193   : > { %3065 = shalt.err (!%p3062_p2)
}
0x1194   : > { %s3066_s26 = scalar_lea.hbm %s3830_s23, 128  ;;  %s3070_s6 = scalar_lea.hbm %s3974_s2, 256 }
0x1195   : > { %p3067_p3 = scmp.ne.s32.totalorder %s3830_s23, %s3066_s26  ;;  %p3071_p11 = scmp.lt.u32.totalorder %s3830_s23, %s3974_s2 }
0x1196   : > { %p3072_p0 = scmp.lt.u32.totalorder %s3070_s6, %s3066_s26  ;;  %p3074_p10 = scmp.lt.u32.totalorder %s3066_s26, %s3830_s23 }
0x1197   : > { %p3068_p1 = pnand %p3067_p3, %p3975_p13 }
0x1198   : > { %p3073_p5 = por %p3072_p0, %p3071_p11 }
0x1199   : > { %p3069_p8 = pneg %p3068_p1 }
0x119a   : > { %p3075_p9 = por %p3074_p10, %p3073_p5 }
0x119c   : > { %p3076_p7 = pnand %p3075_p9, %p3069_p8 }
0x119e   : > { %3079 = shalt.err (!%p3076_p7)
}
0x119f   : > { %2756 = dma.vmem_to_hbm [thread:$0]  (%p3975_p13), %s3832_s22, 128, %s3830_s23, %s2291_s15  }
0x11a0 PF: > { %s3976_s19 = sld [smem:[#allocation18_spill]]  ;;  %s3977_s5 = sld [smem:[#allocation21_spill]] }
0x11a1   : > { %p3979_p4 = scmp.ge.s32.totalorder %s3146_s0, 2 }
0x11a6   : > { %s2317_s24 = sand.u32 1, %s3976_s19   ;;  %p3978_p12 = scmp.ne.s32.totalorder %s3977_s5, 0 }
0x11a7   : > { %s2318_s20 = scalar_lea.sflag [#allocation5], %s2317_s24 }
0x11a8   : > { %p2776_p6 = pnand %p3979_p4, %p3978_p12 }
0x11aa   : > { %3121 = dma.done.wait (!%p2776_p6), %s2318_s20, 128  }
0x11ab   : > { %3123 = vsyncadd (!%p2776_p6), %s2318_s20, 4294967168  ;;  %s42_s0 = sadd.s32 1, %s3146_s0   ;;  %s3980_s30 = sld [smem:[#allocation19_spill]] }
0x11ac   : > { %p39_p2 = scmp.ge.s32.totalorder %s42_s0, 4   ;;  %s3981_s29 = sld [smem:[#allocation23_spill]] }
0x11ad   : > { %s3982_s1 = sld [smem:[#allocation20_spill]]  ;;  %s3983_s4 = sld [smem:[#allocation22_spill]] }
0x11ae   : > { %s3984_s3 = smov %s3130_s28  ;;  %41 = sbr.rel (!%p39_p2) target bundleno = 27 (0x1b), region = 182 }
0x11b1   : > { %s3985_s28 = smov %s3980_s30 }
0x11b3   : > { %s3986_s30 = smov %s3982_s1 }
0x11b5   :  { %2323 = vsyncpa [#allocation4], 1 }
0x11b6   :  { %2325 = vsyncpa [#allocation4 + $0x1], 1 }
0x11b7   :  { %2326 = vsyncpa [#allocation7], 1 }
0x11b8   :  { %2328 = vsyncpa [#allocation7 + $0x1], 1 }
0x11b9   :  { %2329 = vsyncpa [#allocation10], 1 }
0x11ba   :  { %2330 = vsyncpa [#allocation5], 1 }
0x11bb   :  { %2332 = vsyncpa [#allocation5 + $0x1], 1 }

// kernel: tpu_custom_call.1
= control target key start
LH: loop header
LB: loop body
LE: loop exit
PB: predicated region body
PF: predicated region fallthrough
CT: control target
= control target key end

     0   :  { %s3880_s0 = inlined_call_operand.vmem [shape: f32[2,8,32], index: 0, kind: input, shape index: {}]   ;;  %s3881_s1 = inlined_call_operand.hbm [shape: bf16[2,8,64], index: 1, kind: input, shape index: {}]   ;;  %s3882_s2 = inlined_call_operand.hbm [shape: bf16[2,8,64], index: 2, kind: input, shape index: {}]   ;;  %s3883_s3 = inlined_call_operand.hbm [shape: bf16[8,8], index: 3, kind: input, shape index: {}]   ;;  %s3884_s4 = inlined_call_operand.vmem [shape: bf16[32,32], index: 4, kind: input, shape index: {}]   ;;  %s3885_s5 = inlined_call_operand.vmem [shape: f32[1,32], index: 5, kind: input, shape index: {}]   ;;  %s3886_s6 = inlined_call_operand.vmem [shape: bf16[32,32], index: 6, kind: input, shape index: {}]   ;;  %s3887_s7 = inlined_call_operand.vmem [shape: f32[1,32], index: 7, kind: input, shape index: {}]   ;;  %s3888_s8 = inlined_call_operand.hbm [shape: f32[1,32], index: 8, kind: input, shape index: {}]   ;;  %s3889_s9 = inlined_call_operand.hbm [shape: f32[1,32], index: 9, kind: input, shape index: {}]   ;;  %s3890_s10 = inlined_call_operand.vmem [shape: bf16[32,32], index: 10, kind: input, shape index: {}]   ;;  %s3891_s11 = inlined_call_operand.vmem [shape: f32[1,32], index: 11, kind: input, shape index: {}]   ;;  %s3892_s12 = inlined_call_operand.vmem [shape: bf16[32,32], index: 12, kind: input, shape index: {}]   ;;  %s3893_s13 = inlined_call_operand.vmem [shape: f32[1,32], index: 13, kind: input, shape index: {}]   ;;  %s3894_s14 = inlined_call_operand.vmem [shape: f32[1,32], index: 14, kind: input, shape index: {}]   ;;  %s3895_s15 = inlined_call_operand.vmem [shape: f32[1,32], index: 15, kind: input, shape index: {}]   ;;  %s3896_s16 = inlined_call_operand.vmem [shape: bf16[32,128], index: 16, kind: input, shape index: {}]   ;;  %s3897_s17 = inlined_call_operand.vmem [shape: f32[1,128], index: 17, kind: input, shape index: {}]   ;;  %s3898_s18 = inlined_call_operand.vmem [shape: bf16[128,32], index: 18, kind: input, shape index: {}]   ;;  %s3899_s19 = inlined_call_operand.vmem [shape: f32[1,32], index: 19, kind: input, shape index: {}]   ;;  %s3900_s20 = inlined_call_operand.vmem [shape: f32[1,32], index: 20, kind: input, shape index: {}]   ;;  %s3901_s21 = inlined_call_operand.vmem [shape: f32[1,32], index: 21, kind: input, shape index: {}]   ;;  %s3902_s22 = inlined_call_operand.hbm [shape: f32[2,8,32], index: 22, kind: output, shape index: {}]  }
   0x1   :  { %3920 = sst [smem:[#allocation24_spill]] %s3880_s0 }
   0x2   :  { %3921 = sst [smem:[#allocation25_spill]] %s3881_s1 }
   0x3   :  { %3922 = sst [smem:[#allocation26_spill]] %s3882_s2 }
   0x4   :  { %3923 = sst [smem:[#allocation27_spill]] %s3883_s3 }
   0x5   :  { %3924 = sst [smem:[#allocation28_spill]] %s3884_s4 }
   0x6   :  { %3925 = sst [smem:[#allocation29_spill]] %s3885_s5 }
   0x7   :  { %3926 = sst [smem:[#allocation30_spill]] %s3886_s6 }
   0x8   :  { %3927 = sst [smem:[#allocation31_spill]] %s3888_s8 }
   0x9   :  { %3928 = sst [smem:[#allocation32_spill]] %s3889_s9 }
   0xa   :  { %3929 = sst [smem:[#allocation33_spill]] %s3894_s14 }
   0xb   :  { %3930 = sst [smem:[#allocation34_spill]] %s3895_s15 }
   0xc   :  { %3931 = sst [smem:[#allocation35_spill]] %s3897_s17 }
   0xd   :  { %3932 = sst [smem:[#allocation36_spill]] %s3898_s18 }
   0xe   :  { %3933 = sst [smem:[#allocation37_spill]] %s3899_s19 }
   0xf   :  { %3934 = sst [smem:[#allocation38_spill]] %s3900_s20 }
  0x10   :  { %3935 = sst [smem:[#allocation39_spill]] %s3901_s21 }
  0x11   :  { %3936 = sst [smem:[#allocation40_spill]] %s3902_s22 }
  0x12   :  { %27 = vsyncpa [#allocation4], 0 }
  0x13   :  { %29 = vsyncpa [#allocation4 + $0x1], 0 }
  0x14   :  { %30 = vsyncpa [#allocation7], 0 }
  0x15   :  { %32 = vsyncpa [#allocation7 + $0x1], 0 }
  0x16   :  { %33 = vsyncpa [#allocation10], 0 }
  0x17   :  { %34 = vsyncpa [#allocation5], 0 }
  0x18   :  { %36 = vsyncpa [#allocation5 + $0x1], 0  ;;  %s3281_s3 = smov 0   ;;  %s3283_s28 = smov 0  }
  0x19   :  { %s3285_s29 = smov 0   ;;  %s3287_s30 = smov 0  }
  0x1a   :  { %s3289_s4 = smov 0   ;;  %s3291_s0 = smov 0  }
  0x1b LB: > { %3937 = sst [smem:[#allocation18_spill]] %s3126_s3  ;;  %s3312_s23 = sadd.s32 4294967295, %s3146_s0   ;;  %s3146_s0 = sphi %s3291_s0, %s42_s0   ;;  %s3142_s4 = sphi %s3289_s4, %s3983_s4   ;;  %s3138_s30 = sphi %s3287_s30, %s3986_s30   ;;  %s3134_s29 = sphi %s3285_s29, %s3981_s29   ;;  %s3130_s28 = sphi %s3283_s28, %s3985_s28   ;;  %s3126_s3 = sphi %s3281_s3, %s3984_s3  }
  0x1c   : > { %3938 = sst [smem:[#allocation19_spill]] %s3134_s29  ;;  %s2453_s1 = sadd.s32 4294967294, %s3146_s0  }
  0x1d   : > { %3939 = sst [smem:[#allocation20_spill]] %s3142_s4  ;;  %p102_p0 = scmp.ne.s32.totalorder %s3130_s28, %s3126_s3 }
  0x1e   : > { %p3911_p1 = scmp.eq.s32.totalorder %s3312_s23, 0  ;;  %p564_p3 = scmp.eq.s32.totalorder %s2453_s1, 1 }
  0x1f   : > { %p2454_p5 = scmp.ge.s32.totalorder %s3146_s0, 1  ;;  %p571_p7 = scmp.lt.s32.totalorder %s3146_s0, 3 }
  0x20   : > { %p3321_p4 = por %p3911_p1, %p102_p0  ;;  %p3326_p6 = por %p564_p3, %p102_p0 }
  0x21   : > { %p3331_p8 = pnand %p2454_p5, %p571_p7  ;;  %s3148_s25 = smov [#allocation8]  }
  0x22   : > { %s3940_s5 = scalar_select %p3321_p4, 1, 0 }
  0x23   : > { %s3941_s24 = scalar_select %p3326_p6, 1, 0 }
  0x24   : > { %s3943_s6 = scalar_select %p3331_p8, 1, 0 }
  0x25   : > { %3942 = sst [smem:[#allocation21_spill]] %s3941_s24  ;;  %s586_s26 = sshll.u32 %s3148_s25, 4  ;;  %s587_s26 = int_to_ptr.vmem [resolvable:$true] %s586_s26 }
  0x26   : > { %p2758_p10 = pneg %p3331_p8  ;;  %s3149_s2 = smov [#allocation9]  }
  0x27   : > { %s609_s27 = sshll.u32 %s3149_s2, 4  ;;  %s3150_s24 = smov [#allocation11]   ;;  %s3344_s27 = int_to_ptr.vmem [resolvable:$true] %s609_s27 }
  0x28   : > { %p3340_p11 = pnand %p2758_p10, %p3911_p1  ;;  %s620_s3 = sshll.u32 %s3150_s24, 4  ;;  %s3346_s3 = int_to_ptr.vmem [resolvable:$true] %s620_s3 }
  0x29   : > { %s3945_s21 = sld [smem:[#allocation27_spill]] }
  0x2a   : > { %p3356_p13 = pneg %p3340_p11 }
  0x2f   : > { %s2908_s20 = scalar_lea.hbm %s3945_s21, 64 }
  0x30   : > { %p2909_p12 = scmp.ne.s32.totalorder %s3945_s21, %s2908_s20  ;;  %p2915_p5 = scmp.lt.u32.totalorder %s2908_s20, %s3945_s21 }
  0x32   : > { %p2911_p0 = pnand %p3356_p13, %p2909_p12 }
  0x34   : > { %p2912_p3 = pneg %p2911_p0 }
  0x36   : > { %p2917_p7 = pnand %p2915_p5, %p2912_p3 }
  0x38   : > { %2920 = shalt.err (!%p2917_p7)
}
  0x39   : > { %s2921_s22 = scalar_lea.vmem %s587_s26, 64  ;;  %p2929_p2 = scmp.lt.s32.totalorder %s587_s26, %s587_s26 }
  0x3a   : > { %p2922_p10 = scmp.ne.s32.totalorder %s587_s26, %s2921_s22  ;;  %p2930_p6 = scmp.lt.s32.totalorder %s2921_s22, %s2921_s22 }
  0x3c   : > { %p2924_p9 = pnand %p2922_p10, %p3356_p13  ;;  %p2931_p4 = por %p2930_p6, %p2929_p2 }
  0x3e   : > { %p2925_p1 = pneg %p2924_p9 }
  0x40   : > { %p2932_p8 = pnand %p2931_p4, %p2925_p1 }
  0x42   : > { %2935 = shalt.err (!%p2932_p8)
}
  0x43   : > { %2761 = dma.hbm_to_vmem [thread:$0]  (!%p3340_p11), %s3945_s21, 64, %s587_s26, [#allocation7]  }
  0x44   : > { %s3947_s8 = sld [smem:[#allocation31_spill]] }
  0x4a   : > { %s2936_s25 = scalar_lea.hbm %s3947_s8, 16 }
  0x4b   : > { %p2937_p9 = scmp.ne.s32.totalorder %s3947_s8, %s2936_s25  ;;  %p2943_p1 = scmp.lt.u32.totalorder %s2936_s25, %s3947_s8 }
  0x4d   : > { %p2939_p12 = pnand %p2937_p9, %p3356_p13 }
  0x4f   : > { %p2940_p2 = pneg %p2939_p12 }
  0x51   : > { %p2945_p4 = pnand %p2943_p1, %p2940_p2 }
  0x53   : > { %2948 = shalt.err (!%p2945_p4)
}
  0x54   : > { %s2949_s26 = scalar_lea.vmem %s3344_s27, 16  ;;  %s2956_s14 = scalar_lea.vmem %s3344_s27, 32 }
  0x55   : > { %p2950_p6 = scmp.ne.s32.totalorder %s3344_s27, %s2949_s26  ;;  %p2957_p3 = scmp.lt.s32.totalorder %s3344_s27, %s3344_s27 }
  0x56   : > { %p2958_p5 = scmp.lt.s32.totalorder %s2956_s14, %s2949_s26 }
  0x57   : > { %p2952_p8 = pnand %p2950_p6, %p3356_p13 }
  0x58   : > { %p2959_p7 = por %p2958_p5, %p2957_p3 }
  0x59   : > { %p2953_p0 = pneg %p2952_p8 }
  0x5b   : > { %p2960_p10 = pnand %p2959_p7, %p2953_p0 }
  0x5d   : > { %2963 = shalt.err (!%p2960_p10)
}
  0x5e   : > { %2764 = dma.hbm_to_vmem [thread:$0]  (!%p3340_p11), %s3947_s8, 16, %s3344_s27, [#allocation10]  }
  0x5f   : > { %s3948_s9 = sld [smem:[#allocation32_spill]] }
  0x65   : > { %s2964_s20 = scalar_lea.hbm %s3948_s9, 16 }
  0x66   : > { %p2965_p9 = scmp.ne.s32.totalorder %s3948_s9, %s2964_s20  ;;  %p2971_p1 = scmp.lt.u32.totalorder %s2964_s20, %s3948_s9 }
  0x68   : > { %p2967_p12 = pnand %p2965_p9, %p3356_p13 }
  0x6a   : > { %p2968_p2 = pneg %p2967_p12 }
  0x6c   : > { %p2973_p4 = pnand %p2971_p1, %p2968_p2 }
  0x6e   : > { %2976 = shalt.err (!%p2973_p4)
}
  0x6f   : > { %s2977_s27 = scalar_lea.vmem %s3346_s3, 16  ;;  %s2984_s14 = scalar_lea.vmem %s3346_s3, 32 }
  0x70   : > { %p2978_p6 = scmp.ne.s32.totalorder %s3346_s3, %s2977_s27  ;;  %p2985_p3 = scmp.lt.s32.totalorder %s3346_s3, %s3346_s3 }
  0x71   : > { %p2986_p5 = scmp.lt.s32.totalorder %s2984_s14, %s2977_s27 }
  0x72   : > { %p2980_p8 = pnand %p2978_p6, %p3356_p13 }
  0x73   : > { %p2987_p7 = por %p2986_p5, %p2985_p3 }
  0x74   : > { %p2981_p0 = pneg %p2980_p8 }
  0x76   : > { %p2988_p10 = pnand %p2987_p7, %p2981_p0 }
  0x78   : > { %2991 = shalt.err (!%p2988_p10)
}
  0x79   : > { %2767 = dma.hbm_to_vmem [thread:$0]  (!%p3340_p11), %s3948_s9, 16, %s3346_s3, [#allocation10]  }
  0x7a   : > { %s89_s2 = sadd.s32 1, %s3134_s29  ;;  %s54_s19 = sadd.s32 1, %s3142_s4 }
  0x7b   : > { %p96_p13 = scmp.ne.s32.totalorder %s3134_s29, %s3130_s28  ;;  %p56_p9 = scmp.ge.s32.totalorder %s54_s19, 2 }
  0x7c   : > { %p97_p12 = scmp.eq.s32.totalorder %s3146_s0, 0  ;;  %p3949_p2 = scmp.eq.s32.totalorder %s3312_s23, 1 }
  0x7d   : > { %p2782_p4 = scmp.lt.s32.totalorder %s3146_s0, 2  ;;  %s3988_s19 = smov (%p56_p9, %s54_s19), 0 }
  0x7e   : > { %p3427_p1 = por %p3949_p2, %p96_p13  ;;  %3951 = sst [smem:[#allocation22_spill]] %s3988_s19 }
  0x7f   : > { %p98_p6 = por %p97_p12, %p96_p13  ;;  %s677_s15 = sand.u32 1, %s3134_s29  }
  0x80   : > { %s3950_s1 = scalar_select %p3427_p1, 1, 0 }
  0x81   : > { %s86_s20 = ssub.s32 %s3142_s4, %s3988_s19  ;;  %s3437_s3 = sshll.u32 %s677_s15, 2 }
  0x82   : > { %p87_p11 = scmp.eq.s32.totalorder %s86_s20, 0  ;;  %s2460_s25 = sshll.u32 %s3142_s4, 6 }
  0x83   : > { %s3953_s27 = sld [smem:[#allocation25_spill]]  ;;  %s681_s18 = scalar_lea.vmem [#allocation3], %s3437_s3 }
  0x84   : > { %s3441_s24 = scalar_select %p87_p11, %s3134_s29, %s89_s2  }
  0x85   : > { %s688_s17 = sshll.u32 %s681_s18, 4  ;;  %p3453_p8 = pnand %p2782_p4, %p98_p6  ;;  %s3449_s17 = int_to_ptr.vmem [resolvable:$true] %s688_s17 }
  0x86   : > { %3952 = sst [smem:[#allocation23_spill]] %s3441_s24  ;;  %s3955_s9 = sld [smem:[#allocation26_spill]] }
  0x87   : > { %s695_s26 = sand.u32 1, %s3146_s0   ;;  %s678_s21 = scalar_lea.sflag [#allocation4], %s677_s15 }
  0x88   : > { %p2994_p3 = pneg %p3453_p8 }
  0x89   : > { %s3446_s14 = scalar_lea.hbm %s3953_s27, %s2460_s25  ;;  %s2997_s24 = scalar_lea.hbm %s3953_s27, 128 }
  0x8a   : > { %s2992_s19 = scalar_lea.hbm %s3446_s14, 64  ;;  %p2998_p10 = scmp.lt.u32.totalorder %s3446_s14, %s3953_s27 }
  0x8b   : > { %p2993_p0 = scmp.ne.s32.totalorder %s3446_s14, %s2992_s19  ;;  %p2999_p13 = scmp.lt.u32.totalorder %s2997_s24, %s2992_s19 }
  0x8c   : > { %s3460_s22 = scalar_lea.hbm %s3955_s9, %s2460_s25  ;;  %p3001_p12 = scmp.lt.u32.totalorder %s2992_s19, %s3446_s14 }
  0x8d   : > { %p2995_p5 = pnand %p2994_p3, %p2993_p0  ;;  %p3000_p9 = por %p2999_p13, %p2998_p10 }
  0x8f   : > { %p2996_p7 = pneg %p2995_p5  ;;  %p3002_p2 = por %p3001_p12, %p3000_p9 }
  0x91   : > { %p3003_p4 = pnand %p3002_p2, %p2996_p7 }
  0x93   : > { %3006 = shalt.err (!%p3003_p4)
}
  0x94   : > { %s3007_s15 = scalar_lea.vmem %s3449_s17, 64  ;;  %s3151_s4 = smov [#allocation3]  }
  0x95   : > { %p3008_p6 = scmp.ne.s32.totalorder %s3449_s17, %s3007_s15  ;;  %s3012_s25 = sshll.u32 %s3151_s4, 4  ;;  %s3013_s25 = int_to_ptr.vmem [resolvable:$false] %s3012_s25 }
  0x96   : > { %s3014_s29 = scalar_lea.vmem %s3013_s25, 128  ;;  %p3015_p5 = scmp.lt.s32.totalorder %s3449_s17, %s3013_s25 }
  0x97   : > { %p3010_p11 = pnand %p3008_p6, %p2994_p3  ;;  %p3016_p10 = scmp.lt.s32.totalorder %s3014_s29, %s3007_s15 }
  0x99   : > { %p3011_p0 = pneg %p3010_p11  ;;  %p3017_p13 = por %p3016_p10, %p3015_p5 }
  0x9b   : > { %p3018_p9 = pnand %p3017_p13, %p3011_p0 }
  0x9d   : > { %3021 = shalt.err (!%p3018_p9)
}
  0x9e   : > { %2771 = dma.hbm_to_vmem [thread:$0]  (!%p3453_p8), %s3446_s14, 64, %s3449_s17, %s678_s21  }
  0x9f   : > { %s699_s19 = scalar_lea.vmem [#allocation6], %s3437_s3  ;;  %s696_s2 = scalar_lea.sflag [#allocation7], %s695_s26 }
  0xa0   : > { %s706_s24 = sshll.u32 %s699_s19, 4  ;;  %s3022_s18 = scalar_lea.hbm %s3460_s22, 64  ;;  %s707_s24 = int_to_ptr.vmem [resolvable:$true] %s706_s24 }
  0xa1   : > { %p3023_p7 = scmp.ne.s32.totalorder %s3460_s22, %s3022_s18  ;;  %s3027_s4 = scalar_lea.hbm %s3955_s9, 128 }
  0xa2   : > { %p3028_p4 = scmp.lt.u32.totalorder %s3460_s22, %s3955_s9  ;;  %p3029_p6 = scmp.lt.u32.totalorder %s3027_s4, %s3022_s18 }
  0xa3   : > { %p3025_p12 = pnand %p3023_p7, %p2994_p3  ;;  %p3031_p0 = scmp.lt.u32.totalorder %s3022_s18, %s3460_s22 }
  0xa4   : > { %p3030_p11 = por %p3029_p6, %p3028_p4 }
  0xa5   : > { %p3026_p2 = pneg %p3025_p12 }
  0xa6   : > { %p3032_p5 = por %p3031_p0, %p3030_p11 }
  0xa8   : > { %p3033_p10 = pnand %p3032_p5, %p3026_p2 }
  0xaa   : > { %3036 = shalt.err (!%p3033_p10)
}
  0xab   : > { %s3037_s21 = scalar_lea.vmem %s707_s24, 64  ;;  %s3152_s3 = smov [#allocation6]  }
  0xac   : > { %p3038_p13 = scmp.ne.s32.totalorder %s707_s24, %s3037_s21  ;;  %s3042_s14 = sshll.u32 %s3152_s3, 4  ;;  %s3043_s14 = int_to_ptr.vmem [resolvable:$false] %s3042_s14 }
  0xad   : > { %s3044_s17 = scalar_lea.vmem %s3043_s14, 128  ;;  %p3045_p12 = scmp.lt.s32.totalorder %s707_s24, %s3043_s14 }
  0xae   : > { %p3040_p9 = pnand %p3038_p13, %p2994_p3  ;;  %p3046_p1 = scmp.lt.s32.totalorder %s3044_s17, %s3037_s21 }
  0xb0   : > { %p3041_p7 = pneg %p3040_p9  ;;  %p3047_p4 = por %p3046_p1, %p3045_p12 }
  0xb2   : > { %p3048_p6 = pnand %p3047_p4, %p3041_p7 }
  0xb4   : > { %3051 = shalt.err (!%p3048_p6)
}
  0xb5   : > { %2774 = dma.hbm_to_vmem [thread:$0]  (!%p3453_p8), %s3460_s22, 64, %s707_s24, %s696_s2  }
  0xb6   : > { %p3956_p2 = scmp.ne.s32.totalorder %s3943_s6, 0 }
  0xb7   : > { %s3513_s26 = sand.u32 (!%p3956_p2), 1, %s3130_s28   ;;  %p3957_p3 = scmp.ne.s32.totalorder (!%p3956_p2), %s3940_s5, 0 }
  0xb8   : > { %715 = sbr.rel (%p3956_p2) target bundleno = 4512 (0x11a0), region = 108  ;;  %s2464_s19 = sshll.u32 (!%p3956_p2), %s3513_s26, 2 }
  0xb9   : > { %s718_s18 = scalar_lea.sflag (!%p3956_p2), [#allocation4], %s3513_s26  ;;  %s721_s8 = scalar_lea.vmem (!%p3956_p2), [#allocation3], %s2464_s19 }
  0xbf   : > { %3105 = dma.done.wait (%p3957_p3), %s718_s18, 64  }
  0xc0   : > { %3107 = vsyncadd (%p3957_p3), %s718_s18, 4294967232  ;;  %s726_s20 = sand.u32 1, %s3312_s23   ;;  %s3522_s6 = scalar_lea.vmem [#allocation6], %s2464_s19 }
  0xc1   : > { %s727_s22 = scalar_lea.sflag [#allocation7], %s726_s20 }
  0xc2   : > { %3109 = dma.done.wait (%p3957_p3), %s727_s22, 64  }
  0xc3   : > { %3111 = vsyncadd (%p3957_p3), %s727_s22, 4294967232  ;;  %p3958_p1 = scmp.eq.s32.totalorder %s3312_s23, 0 }
  0xc5   : > { %3113 = dma.done.wait (%p3958_p1), [#allocation7], 64   ;;  %p3959_p8 = pmov %p3958_p1 }
  0xc6   : > { %p3960_p11 = pmov %p3958_p1 }
  0xc7   : > { %3115 = vsyncadd (%p3959_p8), [#allocation7], 4294967232 }
  0xc8   : > { %3117 = dma.done.wait (%p3960_p11), [#allocation10], 32   ;;  %p3961_p0 = pmov %p3958_p1 }
  0xc9   : > { %p815_p5 = scmp.lt.s32.totalorder %s3138_s30, 1  ;;  %v3153_v0 = vmov 0.0   ;;  %vm3154_vm0 = vmmov 0   ;;  %s3962_s15 = sld [smem:[#allocation24_spill]]  ;;  %vm901_vm1 = vcmask 64512   ;;  %vm852_vm2 = vcmask 261120  }
  0xca   : > { %3119 = vsyncadd (%p3961_p0), [#allocation10], 4294967264  ;;  %2584 = vmatprep.subr.bf16.mxu0 %v3153_v0  ;;  %2588 = vmatprep.mubr.msk.bf16.mxu0 %vm3154_vm0, %v3153_v0  ;;  %s3963_s21 = sld [smem:[#allocation28_spill]]  ;;  %v824_v4 = vld [vmem:[%s721_s8] sm:$0xf]  ;;  %s3155_s17 = smov 120  }
  0xcb   : > { %s816_s5 = scalar_select %p815_p5, %s3138_s30, 1  ;;  %2604 = vmatprep.subr.bf16.mxu1 %v3153_v0  ;;  %2606 = vmatprep.mubr.msk.bf16.mxu1 %vm3154_vm0, %v3153_v0  ;;  %v3556_v5 = vcombine.low %v824_v4, %v824_v4  ;;  %v906_v6 = vsel %vm901_vm1, %v824_v4, 0  ;;  %v826_v24 = vld [vmem:[#allocation8] sm:$0xf]  ;;  %vm968_vm3 = vcmask 1043456   ;;  %vm1128_vm4 = vcmask 130112  }
  0xcc   : > { %s3156_s19 = smov 112   ;;  %s3964_s20 = sld [smem:[#allocation29_spill]]  ;;  %v827_v25 = vunpack.c.l.bf16 %v826_v24  ;;  %vm1244_vm5 = vcmask 195712   ;;  %vm1360_vm6 = vcmask 261312  }
  0xcd   : > { %s2470_s24 = sshll.u32 %s816_s5, 3  ;;  %1016 = vrot.lane.b32.xlu0 %v3556_v5, %s3155_s17  ;;  %1132 = vrot.lane.b32.xlu1 %v3556_v5, %s3156_s19  ;;  %s3157_s22 = smov 104  }
  0xce   : > { %s3158_s5 = smov 96   ;;  %s3160_s2 = smov 72  }
  0xcf   : > { %s821_s4 = scalar_lea.vmem %s3962_s15, %s2470_s24  ;;  %s3159_s24 = smov 80  }
  0xd0   : > { %v2850_v1 = vld [vmem:[%s3963_s21] sm:$0xff]   ;;  %v2851_v2 = vld [vmem:[%s3963_s21 + $0x8] sm:$0xff]   ;;  %s3161_s23 = smov 88   ;;  %s3162_s15 = smov 8  }
  0xd1   : > { %2585 = vmatpush3.bf16.msra.mxu0 %v2850_v1  ;;  %v3553_v3 = vld [vmem:[%s821_s4] sm:$0xff]  ;;  %s3965_s29 = sld [smem:[#allocation30_spill]]  ;;  %s3163_s8 = smov 16  }
  0xd2   : > { %2586 = vmatprep.subr.bf16.mxu0 %v3153_v0  ;;  %v828_v7 = vpack.c.bf16 %v3553_v3, %v3553_v3  ;;  %v2471_v10 = vld [vmem:[%s3964_s20] ss:$0 sm:$0xff]  ;;  %s3164_s20 = smov 24   ;;  %s3967_s18 = sld [smem:[#allocation36_spill]] }
  0xd3   : > { %s3969_s4 = sld [smem:[#allocation34_spill]]  ;;  %s3972_s3 = sld [smem:[#allocation38_spill]] }
  0xd4   : > { %s3973_s25 = sld [smem:[#allocation39_spill]]  ;;  %p3975_p13 = scmp.ne.s32.totalorder %s3950_s1, 0 }
  0xd5   : > { %2587 = vmatpush3.bf16.msra.mxu0 %v2851_v2 }
  0xd6   : > { %2592 = vmatprep.subr.bf16.mxu0 %v3153_v0 }
  0xd7   : > { %s3966_s14 = smov %s3965_s29 }
  0xd8   : > { %2589 = vmatmul.mubr.msk.bf16.vlgmr.msra.gmra.mrb[0].mxu0 %vm852_vm2, %v828_v7 }
  0xd9   : > { %2594 = vmatprep.mubr.msk.bf16.mxu0 %vm3154_vm0, %v3153_v0 }
  0xde   : > { %2593 = vmatpush3.bf16.xpose.msra.mxu0 %v906_v6 }
  0xdf   : > { %2598 = vmatprep.subr.bf16.mxu0 %v3153_v0 }
 0x13f   : > { %v1017_v8 = vpop.permute.xlu0 %1016  ;;  %v1133_v17 = vpop.permute.xlu1 %1132 }
 0x140   : > { %v1022_v9 = vsel %vm901_vm1, %v1017_v8, 0  ;;  %v1138_v18 = vsel %vm901_vm1, %v1133_v17, 0 }
 0x141   : > { %2605 = vmatpush3.bf16.xpose.msra.mxu1 %v1022_v9 }
 0x142   : > { %2616 = vmatprep.subr.bf16.mxu1 %v3153_v0 }
 0x1ab   : > { %v890_v11 = vpop.f32.mrb[0].mxu0 }
 0x1ac   : > { %v891_v12 = vadd.f32 %v2471_v10, %v890_v11  ;;  %v2590_v13 = vpop.f32.mrb[1].mxu0 }
 0x1ad   : > { %v893_v14 = vpop.f32.mrb[2].mxu0 }
 0x1ae   : > { %v900_v15 = vpack.c.bf16 %v891_v12, %v891_v12  ;;  %v2591_v16 = vpop.f32.mrb[3].mxu0 }
 0x1b0   : > { %1130 = vrot.lane.b32.xlu1 %v900_v15, %s3156_s19  ;;  %1014 = vrot.lane.b32.xlu0 %v900_v15, %s3155_s17 }
 0x1b1   : > { %2595 = vmatmul.mubr.msk.bf16.vlgmr.msra.gmra.mrb[4].mxu0 %vm901_vm1, %v900_v15 }
 0x1b2   : > { %2600 = vmatprep.mubr.msk.bf16.mxu0 %vm3154_vm0, %v3153_v0 }
 0x1b4   : > { %1246 = vrot.lane.b32.xlu1 %v900_v15, %s3157_s22  ;;  %1248 = vrot.lane.b32.xlu0 %v3556_v5, %s3157_s22 }
 0x222   : > { %v1015_v19 = vpop.permute.xlu0 %1014  ;;  %v1131_v22 = vpop.permute.xlu1 %1130 }
 0x223   : > { %2607 = vmatmul.mubr.msk.bf16.vlgmr.msra.gmra.mrb[0].mxu1 %vm901_vm1, %v1015_v19 }
 0x224   : > { %2617 = vmatpush3.bf16.xpose.msra.mxu1 %v1138_v18  ;;  %2618 = vmatprep.mubr.msk.bf16.mxu1 %vm3154_vm0, %v3153_v0 }
 0x225   : > { %2628 = vmatprep.subr.bf16.mxu1 %v3153_v0 }
 0x226   : > { %v1249_v20 = vpop.permute.xlu0 %1248  ;;  %v1247_v23 = vpop.permute.xlu1 %1246 }
 0x227   : > { %v1254_v21 = vsel %vm901_vm1, %v1249_v20, 0 }
 0x22b   : > { %2619 = vmatmul.mubr.msk.bf16.vlgmr.msra.gmra.mrb[4].mxu1 %vm901_vm1, %v1131_v22 }
 0x22c   : > { %2629 = vmatpush3.bf16.xpose.msra.mxu1 %v1254_v21  ;;  %2630 = vmatprep.mubr.msk.bf16.mxu1 %vm3154_vm0, %v3153_v0 }
 0x22d   : > { %2640 = vmatprep.subr.bf16.mxu1 %v3153_v0 }
 0x233   : > { %2631 = vmatmul.mubr.msk.bf16.vlgmr.msra.gmra.mrb[8].mxu1 %vm901_vm1, %v1247_v23 }
 0x234   : > { %2644 = vmatprep.mubr.msk.bf16.mxu1 %vm3154_vm0, %v3153_v0 }
 0x284   : > { %v942_v26 = vpop.f32.mrb[4].mxu0 }
 0x285   : > { %v943_v27 = vadd.f32 %v942_v26, %v827_v25  ;;  %v2596_v28 = vpop.f32.mrb[5].mxu0 }
 0x286   : > { %v945_v29 = vpop.f32.mrb[6].mxu0 }
 0x287   : > { %v2597_v30 = vpop.f32.mrb[7].mxu0  ;;  %v948_v31 = vsel %vm901_vm1, %v943_v27, -inf }
 0x288   : > { %949 = vmax.xlane.f32.xlu0 %v948_v31 }
 0x2f6   : > { %v1058_v32 = vpop.f32.mrb[0].mxu1 }
 0x2f7   : > { %v1059_v33 = vadd.f32 %v1058_v32, %v827_v25  ;;  %v2608_v34 = vpop.f32.mrb[1].mxu1 }
 0x2f8   : > { %v1061_v35 = vpop.f32.mrb[2].mxu1 }
 0x2f9   : > { %v2609_v36 = vpop.f32.mrb[3].mxu1  ;;  %v1064_v37 = vsel %vm901_vm1, %v1059_v33, -inf }
 0x2fa   : > { %1065 = vmax.xlane.f32.xlu1 %v1064_v37 }
 0x2fe   : > { %v1174_v38 = vpop.f32.mrb[4].mxu1 }
 0x2ff   : > { %v1175_v39 = vadd.f32 %v1174_v38, %v827_v25  ;;  %v2620_v40 = vpop.f32.mrb[5].mxu1 }
 0x300   : > { %v1177_v41 = vpop.f32.mrb[6].mxu1  ;;  %v2853_v40 = vld [vmem:[%s3965_s29] sm:$0xff]  }
 0x301   : > { %v2621_v42 = vpop.f32.mrb[7].mxu1  ;;  %v1180_v43 = vsel %vm901_vm1, %v1175_v39, -inf  ;;  %2641 = vmatpush3.bf16.msra.mxu1 %v2853_v40  ;;  %v2854_v41 = vld [vmem:[%s3966_s14 + $0x8] sm:$0xff]  }
 0x302   : > { %1181 = vmax.xlane.f32.xlu0 %v1180_v43  ;;  %2642 = vmatprep.subr.bf16.mxu1 %v3153_v0 }
 0x305   : > { %2643 = vmatpush3.bf16.msra.mxu1 %v2854_v41 }
 0x306   : > { %v1290_v44 = vpop.f32.mrb[8].mxu1  ;;  %2656 = vmatprep.subr.bf16.mxu1 %v3153_v0 }
 0x307   : > { %v1291_v45 = vadd.f32 %v1290_v44, %v827_v25  ;;  %v2632_v46 = vpop.f32.mrb[9].mxu1 }
 0x308   : > { %v1293_v47 = vpop.f32.mrb[10].mxu1 }
 0x309   : > { %v2633_v48 = vpop.f32.mrb[11].mxu1  ;;  %v1296_v49 = vsel %vm901_vm1, %v1291_v45, -inf }
 0x30a   : > { %1297 = vmax.xlane.f32.xlu0 %v1296_v49 }
 0x315   : > { %v950_v50 = vpop.xlane.xlu0 %949 }
 0x316   : > { %v951_v51 = vsub.f32 %v943_v27, %v950_v50 }
 0x318   : > { %v952_v52 = vmul.f32 1.442695, %v951_v51 }
 0x31a   : > { %2870 = vpow2.f32 %v952_v52 }
 0x324   : > { %v2871_v53 = vpop.eup %2870 }
 0x325   : > { %v954_v54 = vsel %vm901_vm1, %v2871_v53, 0.0 }
 0x326   : > { %955 = vadd.xlane.f32.xlu1 %v954_v54 }
 0x337   : > { %963 = vrot.lane.b32.xlu1 %v3556_v5, %s3158_s5 }
 0x387   : > { %v1066_v55 = vpop.xlane.xlu1 %1065 }
 0x388   : > { %v1067_v56 = vsub.f32 %v1059_v33, %v1066_v55  ;;  %v2484_v55 = vld [vmem:[%s3887_s7] ss:$0 sm:$0xff] }
 0x38a   : > { %v1068_v57 = vmul.f32 1.442695, %v1067_v56 }
 0x38c   : > { %2872 = vpow2.f32 %v1068_v57 }
 0x38f   : > { %v1182_v58 = vpop.xlane.xlu0 %1181 }
 0x390   : > { %v1183_v59 = vsub.f32 %v1175_v39, %v1182_v58 }
 0x392   : > { %v1184_v60 = vmul.f32 1.442695, %v1183_v59 }
 0x394   : > { %2874 = vpow2.f32 %v1184_v60 }
 0x396   : > { %v2873_v61 = vpop.eup %2872 }
 0x397   : > { %v1298_v62 = vpop.xlane.xlu0 %1297  ;;  %v1070_v63 = vsel %vm901_vm1, %v2873_v61, 0.0 }
 0x398   : > { %v1299_v1 = vsub.f32 %v1291_v45, %v1298_v62  ;;  %1071 = vadd.xlane.f32.xlu0 %v1070_v63 }
 0x39a   : > { %v1300_v2 = vmul.f32 1.442695, %v1299_v1 }
 0x39c   : > { %2876 = vpow2.f32 %v1300_v2 }
 0x39e   : > { %v2875_v4 = vpop.eup %2874 }
 0x39f   : > { %v1186_v6 = vsel %vm901_vm1, %v2875_v4, 0.0 }
 0x3a0   : > { %1187 = vadd.xlane.f32.xlu1 %v1186_v6 }
 0x3a6   : > { %v2877_v7 = vpop.eup %2876 }
 0x3a7   : > { %v1302_v8 = vsel %vm901_vm1, %v2877_v7, 0.0 }
 0x3a8   : > { %1303 = vadd.xlane.f32.xlu0 %v1302_v8  ;;  %v2856_v8 = vld [vmem:[%s3890_s10 + $0x8] sm:$0xff]  }
 0x3b1   : > { %1192 = vrot.lane.b32.xlu1 %v3556_v5, %s3159_s24 }
 0x3b3   : > { %v956_v9 = vpop.xlane.xlu1 %955 }
 0x3b4   : > { %2878 = vrcp.f32 %v956_v9 }
 0x3b5   : > { %1308 = vrot.lane.b32.xlu1 %v3556_v5, %s3160_s2 }
 0x3b7   : > { %v964_v10 = vpop.permute.xlu1 %963 }
 0x3b8   : > { %v970_v11 = vsel %vm968_vm3, %v964_v10, 0 }
 0x3b9   : > { %2599 = vmatpush3.bf16.msra.mxu0 %v970_v11 }
 0x3ba   : > { %2610 = vmatprep.subr.bf16.mxu0 %v3153_v0 }
 0x3be   : > { %v2879_v12 = vpop.eup %2878  ;;  %1076 = vrot.lane.b32.xlu0 %v3556_v5, %s3161_s23 }
 0x3bf   : > { %v958_v13 = vmul.f32 %v2879_v12, %v2871_v53 }
 0x3c1   : > { %v959_v14 = vpack.c.bf16 %v958_v13, %v958_v13 }
 0x3c3   : > { %2601 = vmatmul.mubr.msk.bf16.vlgmr.msra.gmra.mrb[8].mxu0 %vm901_vm1, %v959_v14 }
 0x3c4   : > { %2612 = vmatprep.mubr.msk.bf16.mxu0 %vm3154_vm0, %v3153_v0 }
 0x425   : > { %v1072_v15 = vpop.xlane.xlu0 %1071 }
 0x426   : > { %2880 = vrcp.f32 %v1072_v15  ;;  %v2488_v15 = vld [vmem:[#allocation9] ss:$0 sm:$0xff] }
 0x42d   : > { %v1188_v16 = vpop.xlane.xlu1 %1187 }
 0x42e   : > { %2882 = vrcp.f32 %v1188_v16 }
 0x430   : > { %v2881_v17 = vpop.eup %2880 }
 0x431   : > { %v1074_v19 = vmul.f32 %v2881_v17, %v2873_v61  ;;  %v1193_v21 = vpop.permute.xlu1 %1192  ;;  %v2489_v17 = vld [vmem:[#allocation11] ss:$0 sm:$0xff] }
 0x432   : > { %v1198_v23 = vsel %vm968_vm3, %v1193_v21, 0  ;;  %v2490_v21 = vld [vmem:[%s3891_s11] ss:$0 sm:$0xff] }
 0x433   : > { %v1075_v5 = vpack.c.bf16 %v1074_v19, %v1074_v19 }
 0x435   : > { %v1304_v18 = vpop.xlane.xlu0 %1303  ;;  %v1309_v26 = vpop.permute.xlu1 %1308 }
 0x436   : > { %2884 = vrcp.f32 %v1304_v18  ;;  %v1314_v28 = vsel %vm968_vm3, %v1309_v26, 0 }
 0x438   : > { %v2883_v24 = vpop.eup %2882 }
 0x439   : > { %v1077_v20 = vpop.permute.xlu0 %1076  ;;  %v1190_v25 = vmul.f32 %v2883_v24, %v2875_v4 }
 0x43a   : > { %v1082_v22 = vsel %vm968_vm3, %v1077_v20, 0 }
 0x43b   : > { %2611 = vmatpush3.bf16.msra.mxu0 %v1082_v22  ;;  %v1191_v27 = vpack.c.bf16 %v1190_v25, %v1190_v25 }
 0x43c   : > { %2622 = vmatprep.subr.bf16.mxu0 %v3153_v0 }
 0x43e   : > { %2613 = vmatmul.mubr.msk.bf16.vlgmr.msra.gmra.mrb[12].mxu0 %vm901_vm1, %v1075_v5 }
 0x43f   : > { %2623 = vmatpush3.bf16.msra.mxu0 %v1198_v23  ;;  %2624 = vmatprep.mubr.msk.bf16.mxu0 %vm3154_vm0, %v3153_v0 }
 0x440   : > { %2634 = vmatprep.subr.bf16.mxu0 %v3153_v0  ;;  %v2885_v29 = vpop.eup %2884 }
 0x441   : > { %v1306_v30 = vmul.f32 %v2885_v29, %v2877_v7  ;;  %v2855_v7 = vld [vmem:[%s3890_s10] sm:$0xff]  }
 0x443   : > { %v1307_v31 = vpack.c.bf16 %v1306_v30, %v1306_v30 }
 0x446   : > { %2625 = vmatmul.mubr.msk.bf16.vlgmr.msra.gmra.mrb[16].mxu0 %vm901_vm1, %v1191_v27 }
 0x447   : > { %2635 = vmatpush3.bf16.msra.mxu0 %v1314_v28  ;;  %2636 = vmatprep.mubr.msk.bf16.mxu0 %vm3154_vm0, %v3153_v0 }
 0x448   : > { %2648 = vmatprep.subr.bf16.mxu0 %v3153_v0 }
 0x44e   : > { %2637 = vmatmul.mubr.msk.bf16.vlgmr.msra.gmra.mrb[20].mxu0 %vm901_vm1, %v1307_v31 }
 0x44f   : > { %2652 = vmatprep.mubr.msk.bf16.mxu0 %vm3154_vm0, %v3153_v0  ;;  %2649 = vmatpush3.bf16.msra.mxu0 %v2855_v7 }
 0x450   : > { %2650 = vmatprep.subr.bf16.mxu0 %v3153_v0 }
 0x453   : > { %2651 = vmatpush3.bf16.msra.mxu0 %v2856_v8 }
 0x454   : > { %2662 = vmatprep.subr.bf16.mxu0 %v3153_v0 }
 0x496   : > { %v1006_v32 = vpop.f32.mrb[8].mxu0 }
 0x497   : > { %1012 = vst.msk [vmem:[#allocation2] sm:$0xff] %vm901_vm1, %v1006_v32  ;;  %v2602_v33 = vpop.f32.mrb[9].mxu0 }
 0x498   : > { %v1009_v34 = vpop.f32.mrb[10].mxu0 }
 0x499   : > { %v2603_v35 = vpop.f32.mrb[11].mxu0 }
 0x511   : > { %v1118_v36 = vpop.f32.mrb[12].mxu0 }
 0x512   : > { %1125 = vrot.lane.b32.xlu0 %v1118_v36, %s3162_s15  ;;  %v2614_v37 = vpop.f32.mrb[13].mxu0 }
 0x513   : > { %v1121_v38 = vpop.f32.mrb[14].mxu0 }
 0x514   : > { %v2615_v39 = vpop.f32.mrb[15].mxu0 }
 0x519   : > { %v1234_v42 = vpop.f32.mrb[16].mxu0 }
 0x51a   : > { %1241 = vrot.lane.b32.xlu1 %v1234_v42, %s3163_s8  ;;  %v2626_v43 = vpop.f32.mrb[17].mxu0 }
 0x51b   : > { %v1237_v44 = vpop.f32.mrb[18].mxu0 }
 0x51c   : > { %v2627_v45 = vpop.f32.mrb[19].mxu0 }
 0x521   : > { %v1350_v46 = vpop.f32.mrb[20].mxu0 }
 0x522   : > { %1357 = vrot.lane.b32.xlu0 %v1350_v46, %s3164_s20  ;;  %v2638_v47 = vpop.f32.mrb[21].mxu0 }
 0x523   : > { %v1353_v48 = vpop.f32.mrb[22].mxu0 }
 0x524   : > { %v2639_v49 = vpop.f32.mrb[23].mxu0 }
 0x584   : > { %v1126_v50 = vpop.permute.xlu0 %1125 }
 0x585   : > { %1129 = vst.msk [vmem:[#allocation2] sm:$0xff] %vm1128_vm4, %v1126_v50 }
 0x58c   : > { %v1242_v51 = vpop.permute.xlu1 %1241 }
 0x58d   : > { %1245 = vst.msk [vmem:[#allocation2] sm:$0xff] %vm1244_vm5, %v1242_v51 }
 0x594   : > { %v1358_v52 = vpop.permute.xlu0 %1357 }
 0x595   : > { %1361 = vst.msk [vmem:[#allocation2] sm:$0xff] %vm1360_vm6, %v1358_v52 }
 0x59c   : > { %v1362_v53 = vld [vmem:[#allocation2] sm:$0xff] }
 0x59d   : > { %v1363_v54 = vpack.c.bf16 %v1362_v53, %v1362_v53 }
 0x59f   : > { %2645 = vmatmul.mubr.msk.bf16.vlgmr.msra.gmra.mrb[12].mxu1 %vm852_vm2, %v1363_v54 }
 0x5a0   : > { %2658 = vmatprep.mubr.msk.bf16.mxu1 %vm3154_vm0, %v3153_v0 }
 0x672   : > { %v1420_v56 = vpop.f32.mrb[12].mxu1 }
 0x673   : > { %v1421_v57 = vadd.f32 %v2484_v55, %v1420_v56  ;;  %v2646_v58 = vpop.f32.mrb[13].mxu1 }
 0x674   : > { %v1423_v59 = vpop.f32.mrb[14].mxu1 }
 0x675   : > { %v2647_v60 = vpop.f32.mrb[15].mxu1  ;;  %v1426_v61 = vadd.f32 %v1421_v57, %v3553_v3  ;;  %v825_v3 = vld [vmem:[%s3522_s6] sm:$0xf] }
 0x676   : > { %v3665_v9 = vcombine.low %v825_v3, %v825_v3  ;;  %v1533_v10 = vsel %vm901_vm1, %v825_v3, 0 }
 0x677   : > { %v1429_v62 = vsel %vm852_vm2, %v1426_v61, 0.0  ;;  %2657 = vmatpush3.bf16.xpose.msra.mxu1 %v1533_v10 }
 0x678   : > { %1430 = vadd.xlane.f32.xlu1 %v1429_v62  ;;  %2668 = vmatprep.subr.bf16.mxu1 %v3153_v0 }
 0x705   : > { %v1431_v63 = vpop.xlane.xlu1 %1430 }
 0x706   : > { %v1433_v1 = vmul.f32 0.03125, %v1431_v63 }
 0x708   : > { %v1434_v2 = vsub.f32 %v1426_v61, %v1433_v1 }
 0x70a   : > { %v1435_v4 = vmul.f32 %v1434_v2, %v1434_v2 }
 0x70c   : > { %v1436_v6 = vsel %vm852_vm2, %v1435_v4, 0.0 }
 0x70d   : > { %1437 = vadd.xlane.f32.xlu0 %v1436_v6 }
 0x723   : > { %1642 = vrot.lane.b32.xlu0 %v3665_v9, %s3155_s17 }
 0x79a   : > { %v1438_v11 = vpop.xlane.xlu0 %1437 }
 0x79b   : > { %v1439_v12 = vmul.f32 0.03125, %v1438_v11 }
 0x79d   : > { %v1440_v13 = vadd.f32 1e-05, %v1439_v12 }
 0x79e   : > { %v1643_v24 = vpop.permute.xlu0 %1642 }
 0x79f   : > { %2886 = vrsqrt.f32 %v1440_v13  ;;  %v1648_v28 = vsel %vm901_vm1, %v1643_v24, 0 }
 0x7a9   : > { %v2887_v14 = vpop.eup %2886 }
 0x7aa   : > { %v1442_v16 = vmul.f32 %v2887_v14, %v1434_v2 }
 0x7ac   : > { %v1449_v18 = vmul.f32 %v2488_v15, %v1442_v16 }
 0x7ae   : > { %v3671_v19 = vadd.f32 %v2489_v17, %v1449_v18 }
 0x7b0   : > { %v1457_v20 = vpack.c.bf16 %v3671_v19, %v3671_v19 }
 0x7b2   : > { %2653 = vmatmul.mubr.msk.bf16.vlgmr.msra.gmra.mrb[24].mxu0 %vm852_vm2, %v1457_v20 }
 0x7b3   : > { %2664 = vmatprep.mubr.msk.bf16.mxu0 %vm3154_vm0, %v3153_v0 }
 0x885   : > { %v1518_v22 = vpop.f32.mrb[24].mxu0 }
 0x886   : > { %v1519_v5 = vadd.f32 %v2490_v21, %v1518_v22  ;;  %v2654_v23 = vpop.f32.mrb[25].mxu0 }
 0x887   : > { %v1521_v25 = vpop.f32.mrb[26].mxu0 }
 0x888   : > { %v1528_v26 = vpack.c.bf16 %v1519_v5, %v1519_v5  ;;  %v2655_v27 = vpop.f32.mrb[27].mxu0 }
 0x88a   : > { %1755 = vrot.lane.b32.xlu0 %v1528_v26, %s3156_s19  ;;  %1640 = vrot.lane.b32.xlu1 %v1528_v26, %s3155_s17  ;;  %s2525_s17 = sshll.u32 %s3138_s30, 7  ;;  %s3165_s30 = smov [#allocation12]  }
 0x88b   : > { %2659 = vmatmul.mubr.msk.bf16.vlgmr.msra.gmra.mrb[16].mxu1 %vm901_vm1, %v1528_v26 }
 0x88c   : > { %2669 = vmatpush3.bf16.xpose.msra.mxu1 %v1648_v28  ;;  %2670 = vmatprep.mubr.msk.bf16.mxu1 %vm3154_vm0, %v3153_v0 }
 0x88d   : > { %2680 = vmatprep.subr.bf16.mxu1 %v3153_v0 }
 0x88e   : > { %1870 = vrot.lane.b32.xlu0 %v1528_v26, %s3157_s22  ;;  %1757 = vrot.lane.b32.xlu1 %v3665_v9, %s3156_s19 }
 0x892   : > { %1872 = vrot.lane.b32.xlu1 %v3665_v9, %s3157_s22 }
 0x8fc   : > { %v1641_v29 = vpop.permute.xlu1 %1640  ;;  %v1756_v34 = vpop.permute.xlu0 %1755 }
 0x8fd   : > { %2671 = vmatmul.mubr.msk.bf16.vlgmr.msra.gmra.mrb[20].mxu1 %vm901_vm1, %v1641_v29 }
 0x8fe   : > { %2682 = vmatprep.mubr.msk.bf16.mxu1 %vm3154_vm0, %v3153_v0 }
 0x900   : > { %v1758_v30 = vpop.permute.xlu1 %1757  ;;  %v1871_v35 = vpop.permute.xlu0 %1870 }
 0x901   : > { %v1763_v31 = vsel %vm901_vm1, %v1758_v30, 0 }
 0x902   : > { %2681 = vmatpush3.bf16.xpose.msra.mxu1 %v1763_v31 }
 0x903   : > { %2692 = vmatprep.subr.bf16.mxu1 %v3153_v0 }
 0x904   : > { %v1873_v32 = vpop.permute.xlu1 %1872 }
 0x905   : > { %v1878_v33 = vsel %vm901_vm1, %v1873_v32, 0 }
 0x909   : > { %2683 = vmatmul.mubr.msk.bf16.vlgmr.msra.gmra.mrb[24].mxu1 %vm901_vm1, %v1756_v34 }
 0x90a   : > { %2693 = vmatpush3.bf16.xpose.msra.mxu1 %v1878_v33  ;;  %2694 = vmatprep.mubr.msk.bf16.mxu1 %vm3154_vm0, %v3153_v0 }
 0x90b   : > { %2704 = vmatprep.subr.bf16.mxu1 %v3153_v0 }
 0x911   : > { %2695 = vmatmul.mubr.msk.bf16.vlgmr.msra.gmra.mrb[28].mxu1 %vm901_vm1, %v1871_v35 }
 0x912   : > { %2708 = vmatprep.mubr.msk.bf16.mxu1 %vm3154_vm0, %v3153_v0 }
 0x95e   : > { %v1569_v36 = vpop.f32.mrb[16].mxu1 }
 0x95f   : > { %v2660_v37 = vpop.f32.mrb[17].mxu1  ;;  %v1575_v38 = vsel %vm901_vm1, %v1569_v36, -inf }
 0x960   : > { %1576 = vmax.xlane.f32.xlu1 %v1575_v38  ;;  %v1572_v39 = vpop.f32.mrb[18].mxu1 }
 0x961   : > { %v2661_v40 = vpop.f32.mrb[19].mxu1 }
 0x9d0   : > { %v1684_v41 = vpop.f32.mrb[20].mxu1 }
 0x9d1   : > { %v2672_v42 = vpop.f32.mrb[21].mxu1  ;;  %v1690_v43 = vsel %vm901_vm1, %v1684_v41, -inf }
 0x9d2   : > { %1691 = vmax.xlane.f32.xlu0 %v1690_v43  ;;  %v1687_v44 = vpop.f32.mrb[22].mxu1 }
 0x9d3   : > { %v2673_v45 = vpop.f32.mrb[23].mxu1 }
 0x9dc   : > { %v1799_v46 = vpop.f32.mrb[24].mxu1 }
 0x9dd   : > { %v2684_v47 = vpop.f32.mrb[25].mxu1  ;;  %v1805_v48 = vsel %vm901_vm1, %v1799_v46, -inf }
 0x9de   : > { %1806 = vmax.xlane.f32.xlu0 %v1805_v48  ;;  %v1802_v49 = vpop.f32.mrb[26].mxu1  ;;  %v2859_v47 = vld [vmem:[%s3892_s12 + $0x8] sm:$0xff]  }
 0x9df   : > { %v2685_v50 = vpop.f32.mrb[27].mxu1 }
 0x9e4   : > { %v1914_v51 = vpop.f32.mrb[28].mxu1 }
 0x9e5   : > { %v2696_v52 = vpop.f32.mrb[29].mxu1  ;;  %v1920_v53 = vsel %vm901_vm1, %v1914_v51, -inf }
 0x9e6   : > { %1921 = vmax.xlane.f32.xlu1 %v1920_v53  ;;  %v1917_v54 = vpop.f32.mrb[30].mxu1 }
 0x9e7   : > { %v2697_v55 = vpop.f32.mrb[31].mxu1 }
 0x9ed   : > { %v1577_v56 = vpop.xlane.xlu1 %1576 }
 0x9ee   : > { %v1578_v57 = vsub.f32 %v1569_v36, %v1577_v56 }
 0x9f0   : > { %v1579_v58 = vmul.f32 1.442695, %v1578_v57 }
 0x9f2   : > { %2888 = vpow2.f32 %v1579_v58 }
 0x9fc   : > { %v2889_v59 = vpop.eup %2888 }
 0x9fd   : > { %v1581_v60 = vsel %vm901_vm1, %v2889_v59, 0.0 }
 0x9fe   : > { %1582 = vadd.xlane.f32.xlu0 %v1581_v60 }
 0xa5f   : > { %v1692_v61 = vpop.xlane.xlu0 %1691 }
 0xa60   : > { %v1693_v62 = vsub.f32 %v1684_v41, %v1692_v61  ;;  %v2503_v61 = vld [vmem:[%s3893_s13] ss:$0 sm:$0xff] }
 0xa62   : > { %v1694_v63 = vmul.f32 1.442695, %v1693_v62 }
 0xa64   : > { %2890 = vpow2.f32 %v1694_v63 }
 0xa6b   : > { %v1807_v1 = vpop.xlane.xlu0 %1806 }
 0xa6c   : > { %v1808_v2 = vsub.f32 %v1799_v46, %v1807_v1  ;;  %v2858_v46 = vld [vmem:[%s3892_s12] sm:$0xff]  }
 0xa6d   : > { %2705 = vmatpush3.bf16.msra.mxu1 %v2858_v46 }
 0xa6e   : > { %v2891_v4 = vpop.eup %2890  ;;  %v1809_v6 = vmul.f32 1.442695, %v1808_v2  ;;  %2706 = vmatprep.subr.bf16.mxu1 %v3153_v0 }
 0xa6f   : > { %v1696_v7 = vsel %vm901_vm1, %v2891_v4, 0.0 }
 0xa70   : > { %2892 = vpow2.f32 %v1809_v6  ;;  %1697 = vadd.xlane.f32.xlu1 %v1696_v7 }
 0xa71   : > { %2707 = vmatpush3.bf16.msra.mxu1 %v2859_v47 }
 0xa72   : > { %2720 = vmatprep.subr.bf16.mxu1 %v3153_v0 }
 0xa73   : > { %v1922_v10 = vpop.xlane.xlu1 %1921 }
 0xa74   : > { %v1923_v11 = vsub.f32 %v1914_v51, %v1922_v10 }
 0xa76   : > { %v1924_v12 = vmul.f32 1.442695, %v1923_v11 }
 0xa78   : > { %2894 = vpow2.f32 %v1924_v12 }
 0xa7a   : > { %v2893_v8 = vpop.eup %2892 }
 0xa7b   : > { %v1811_v3 = vsel %vm901_vm1, %v2893_v8, 0.0 }
 0xa7c   : > { %1812 = vadd.xlane.f32.xlu0 %v1811_v3 }
 0xa81   : > { %1702 = vrot.lane.b32.xlu1 %v3665_v9, %s3161_s23 }
 0xa82   : > { %v2895_v13 = vpop.eup %2894 }
 0xa83   : > { %v1926_v14 = vsel %vm901_vm1, %v2895_v13, 0.0 }
 0xa8b   : > { %v1583_v15 = vpop.xlane.xlu0 %1582 }
 0xa8c   : > { %2896 = vrcp.f32 %v1583_v15  ;;  %v2863_v15 = vld [vmem:[%s3967_s18 + $0x8] sm:$0xff]  }
 0xa92   : > { %1590 = vrot.lane.b32.xlu0 %v3665_v9, %s3158_s5 }
 0xa96   : > { %1932 = vrot.lane.b32.xlu0 %v3665_v9, %s3160_s2  ;;  %v2897_v17 = vpop.eup %2896  ;;  %s3974_s2 = sld [smem:[#allocation40_spill]] }
 0xa97   : > { %v1585_v20 = vmul.f32 %v2897_v17, %v2889_v59  ;;  %v2865_v17 = vld [vmem:[%s3967_s18 + $0x18] sm:$0xff]  }
 0xa99   : > { %v1586_v23 = vpack.c.bf16 %v1585_v20, %v1585_v20  ;;  %v2867_v20 = vld [vmem:[%s3967_s18 + $0x28] sm:$0xff]  }
 0xa9c   : > { %s3830_s23 = scalar_lea.hbm %s3974_s2, %s2525_s17 }
 0xaa5   : > { %1927 = vadd.xlane.f32.xlu1 %v1926_v14  ;;  %v2861_v14 = vld [vmem:[%s3896_s16 + $0x8] sm:$0xff]  }
 0xab6   : > { %1817 = vrot.lane.b32.xlu1 %v3665_v9, %s3159_s24  ;;  %s3970_s24 = sld [smem:[#allocation35_spill]] }
 0xafd   : > { %v1698_v16 = vpop.xlane.xlu1 %1697 }
 0xafe   : > { %2898 = vrcp.f32 %v1698_v16  ;;  %v2864_v16 = vld [vmem:[%s3967_s18 + $0x10] sm:$0xff]  }
 0xb01   : > { %v1703_v5 = vpop.permute.xlu1 %1702 }
 0xb02   : > { %v1708_v25 = vsel %vm968_vm3, %v1703_v5, 0 }
 0xb08   : > { %v2899_v24 = vpop.eup %2898 }
 0xb09   : > { %v1813_v18 = vpop.xlane.xlu0 %1812  ;;  %v1700_v9 = vmul.f32 %v2899_v24, %v2891_v4 }
 0xb0a   : > { %2900 = vrcp.f32 %v1813_v18  ;;  %v2866_v18 = vld [vmem:[%s3967_s18 + $0x20] sm:$0xff]  }
 0xb0b   : > { %v1701_v26 = vpack.c.bf16 %v1700_v9, %v1700_v9  ;;  %v2508_v9 = vld [vmem:[%s3969_s4] ss:$0 sm:$0xff] }
 0xb0d   : > { %v1591_v21 = vpop.permute.xlu0 %1590 }
 0xb0e   : > { %v1596_v22 = vsel %vm968_vm3, %v1591_v21, 0 }
 0xb0f   : > { %2663 = vmatpush3.bf16.msra.mxu0 %v1596_v22 }
 0xb10   : > { %2674 = vmatprep.subr.bf16.mxu0 %v3153_v0 }
 0xb11   : > { %v1933_v31 = vpop.permute.xlu0 %1932 }
 0xb12   : > { %2665 = vmatmul.mubr.msk.bf16.vlgmr.msra.gmra.mrb[28].mxu0 %vm901_vm1, %v1586_v23  ;;  %v1938_v34 = vsel %vm968_vm3, %v1933_v31, 0  ;;  %v2509_v31 = vld [vmem:[%s3970_s24] ss:$0 sm:$0xff] }
 0xb13   : > { %2675 = vmatpush3.bf16.msra.mxu0 %v1708_v25  ;;  %2676 = vmatprep.mubr.msk.bf16.mxu0 %vm3154_vm0, %v3153_v0 }
 0xb14   : > { %2686 = vmatprep.subr.bf16.mxu0 %v3153_v0  ;;  %v2901_v27 = vpop.eup %2900 }
 0xb15   : > { %v1815_v29 = vmul.f32 %v2901_v27, %v2893_v8 }
 0xb17   : > { %v1816_v33 = vpack.c.bf16 %v1815_v29, %v1815_v29  ;;  %v2868_v29 = vld [vmem:[%s3967_s18 + $0x30] sm:$0xff]  }
 0xb1a   : > { %2677 = vmatmul.mubr.msk.bf16.vlgmr.msra.gmra.mrb[32].mxu0 %vm901_vm1, %v1701_v26 }
 0xb1b   : > { %2688 = vmatprep.mubr.msk.bf16.mxu0 %vm3154_vm0, %v3153_v0 }
 0xb32   : > { %v1928_v28 = vpop.xlane.xlu1 %1927 }
 0xb33   : > { %2902 = vrcp.f32 %v1928_v28 }
 0xb36   : > { %v1818_v30 = vpop.permute.xlu1 %1817 }
 0xb37   : > { %v1823_v32 = vsel %vm968_vm3, %v1818_v30, 0  ;;  %v2869_v30 = vld [vmem:[%s3967_s18 + $0x38] sm:$0xff]  }
 0xb38   : > { %2687 = vmatpush3.bf16.msra.mxu0 %v1823_v32 }
 0xb39   : > { %2698 = vmatprep.subr.bf16.mxu0 %v3153_v0 }
 0xb3b   : > { %2689 = vmatmul.mubr.msk.bf16.vlgmr.msra.gmra.mrb[36].mxu0 %vm901_vm1, %v1816_v33 }
 0xb3c   : > { %2699 = vmatpush3.bf16.msra.mxu0 %v1938_v34  ;;  %2700 = vmatprep.mubr.msk.bf16.mxu0 %vm3154_vm0, %v3153_v0 }
 0xb3d   : > { %v2903_v35 = vpop.eup %2902  ;;  %2712 = vmatprep.subr.bf16.mxu0 %v3153_v0 }
 0xb3e   : > { %v1930_v36 = vmul.f32 %v2903_v35, %v2895_v13  ;;  %v2860_v13 = vld [vmem:[%s3896_s16] sm:$0xff]  }
 0xb40   : > { %v1931_v37 = vpack.c.bf16 %v1930_v36, %v1930_v36 }
 0xb43   : > { %2701 = vmatmul.mubr.msk.bf16.vlgmr.msra.gmra.mrb[40].mxu0 %vm901_vm1, %v1931_v37 }
 0xb44   : > { %2716 = vmatprep.mubr.msk.bf16.mxu0 %vm3154_vm0, %v3153_v0  ;;  %2713 = vmatpush3.bf16.msra.mxu0 %v2860_v13 }
 0xb45   : > { %2714 = vmatprep.subr.bf16.mxu0 %v3153_v0 }
 0xb48   : > { %2715 = vmatpush3.bf16.msra.mxu0 %v2861_v14 }
 0xbe5   : > { %v1632_v38 = vpop.f32.mrb[28].mxu0 }
 0xbe6   : > { %1638 = vst.msk [vmem:[#allocation2] sm:$0xff] %vm901_vm1, %v1632_v38  ;;  %v2666_v39 = vpop.f32.mrb[29].mxu0 }
 0xbe7   : > { %v1635_v40 = vpop.f32.mrb[30].mxu0 }
 0xbe8   : > { %v2667_v41 = vpop.f32.mrb[31].mxu0 }
 0xbed   : > { %v1744_v42 = vpop.f32.mrb[32].mxu0 }
 0xbee   : > { %1751 = vrot.lane.b32.xlu1 %v1744_v42, %s3162_s15  ;;  %v2678_v43 = vpop.f32.mrb[33].mxu0  ;;  %s3971_s15 = sld [smem:[#allocation37_spill]] }
 0xbef   : > { %v1747_v44 = vpop.f32.mrb[34].mxu0 }
 0xbf0   : > { %v2679_v45 = vpop.f32.mrb[35].mxu0 }
 0xc0e   : > { %v1859_v48 = vpop.f32.mrb[36].mxu0 }
 0xc0f   : > { %1866 = vrot.lane.b32.xlu0 %v1859_v48, %s3163_s8  ;;  %v2690_v49 = vpop.f32.mrb[37].mxu0  ;;  %s2469_s8 = sshll.u32 %s3513_s26, 3 }
 0xc10   : > { %v1862_v50 = vpop.f32.mrb[38].mxu0  ;;  %s814_s19 = scalar_lea.vmem [#allocation12], %s2469_s8  ;;  %s3056_s8 = sshll.u32 %s3165_s30, 4  ;;  %s3057_s8 = int_to_ptr.vmem [resolvable:$false] %s3056_s8 }
 0xc11   : > { %v2691_v51 = vpop.f32.mrb[39].mxu0  ;;  %s2305_s22 = sshll.u32 %s814_s19, 4  ;;  %s3058_s29 = scalar_lea.vmem %s3057_s8, 256  ;;  %s3832_s22 = int_to_ptr.vmem [resolvable:$true] %s2305_s22 }
 0xc12   : > { %p3059_p12 = scmp.lt.s32.totalorder %s3832_s22, %s3057_s8 }
 0xc16   : > { %v1974_v52 = vpop.f32.mrb[40].mxu0 }
 0xc17   : > { %1981 = vrot.lane.b32.xlu1 %v1974_v52, %s3164_s20  ;;  %v2702_v53 = vpop.f32.mrb[41].mxu0  ;;  %s3968_s20 = sld [smem:[#allocation33_spill]] }
 0xc18   : > { %v1977_v54 = vpop.f32.mrb[42].mxu0 }
 0xc19   : > { %v2703_v55 = vpop.f32.mrb[43].mxu0 }
 0xc1a   : > { %v2522_v55 = vld [vmem:[%s3972_s3] ss:$0 sm:$0xff] }
 0xc1d   : > { %v2507_v24 = vld [vmem:[%s3968_s20] ss:$0 sm:$0xff]  ;;  %s3052_s20 = scalar_lea.vmem %s3832_s22, 128 }
 0xc1e   : > { %p3053_p10 = scmp.ne.s32.totalorder %s3832_s22, %s3052_s20  ;;  %p3060_p4 = scmp.lt.s32.totalorder %s3058_s29, %s3052_s20 }
 0xc20   : > { %p3054_p9 = pnand %p3053_p10, %p3975_p13  ;;  %p3061_p6 = por %p3060_p4, %p3059_p12 }
 0xc22   : > { %p3055_p7 = pneg %p3054_p9 }
 0xc24   : > { %p3062_p2 = pnand %p3061_p6, %p3055_p7 }
 0xc60   : > { %v1752_v56 = vpop.permute.xlu1 %1751 }
 0xc61   : > { %1754 = vst.msk [vmem:[#allocation2] sm:$0xff] %vm1128_vm4, %v1752_v56 }
 0xc81   : > { %v1867_v57 = vpop.permute.xlu0 %1866 }
 0xc82   : > { %1869 = vst.msk [vmem:[#allocation2] sm:$0xff] %vm1244_vm5, %v1867_v57  ;;  %v2523_v57 = vld [vmem:[%s3973_s25] ss:$0 sm:$0xff] }
 0xc89   : > { %v1982_v58 = vpop.permute.xlu1 %1981 }
 0xc8a   : > { %1984 = vst.msk [vmem:[#allocation2] sm:$0xff] %vm1360_vm6, %v1982_v58 }
 0xc91   : > { %v1985_v59 = vld [vmem:[#allocation2] sm:$0xff] }
 0xc92   : > { %v1986_v60 = vpack.c.bf16 %v1985_v59, %v1985_v59 }
 0xc94   : > { %2709 = vmatmul.mubr.msk.bf16.vlgmr.msra.gmra.mrb[32].mxu1 %vm852_vm2, %v1986_v60 }
 0xc95   : > { %2736 = vmatprep.mubr.msk.bf16.mxu1 %vm3154_vm0, %v3153_v0 }
 0xd67   : > { %v2043_v62 = vpop.f32.mrb[32].mxu1 }
 0xd68   : > { %v2044_v63 = vadd.f32 %v2503_v61, %v2043_v62  ;;  %v2710_v1 = vpop.f32.mrb[33].mxu1 }
 0xd69   : > { %v2046_v2 = vpop.f32.mrb[34].mxu1 }
 0xd6a   : > { %v2711_v4 = vpop.f32.mrb[35].mxu1  ;;  %v2049_v6 = vadd.f32 %v2044_v63, %v3671_v19  ;;  %v2862_v19 = vld [vmem:[%s3967_s18] sm:$0xff]  }
 0xd6b   : > { %2721 = vmatpush3.bf16.msra.mxu1 %v2862_v19 }
 0xd6c   : > { %v2052_v7 = vsel %vm852_vm2, %v2049_v6, 0.0  ;;  %2722 = vmatprep.subr.bf16.mxu1 %v3153_v0 }
 0xd6d   : > { %2053 = vadd.xlane.f32.xlu0 %v2052_v7 }
 0xd6f   : > { %2723 = vmatpush3.bf16.msra.mxu1 %v2863_v15 }
 0xd70   : > { %2724 = vmatprep.subr.bf16.mxu1 %v3153_v0 }
 0xd73   : > { %2725 = vmatpush3.bf16.msra.mxu1 %v2864_v16 }
 0xd74   : > { %2726 = vmatprep.subr.bf16.mxu1 %v3153_v0 }
 0xd77   : > { %2727 = vmatpush3.bf16.msra.mxu1 %v2865_v17 }
 0xd78   : > { %2728 = vmatprep.subr.bf16.mxu1 %v3153_v0 }
 0xd7b   : > { %2729 = vmatpush3.bf16.msra.mxu1 %v2866_v18 }
 0xd7c   : > { %2730 = vmatprep.subr.bf16.mxu1 %v3153_v0 }
 0xd7f   : > { %2731 = vmatpush3.bf16.msra.mxu1 %v2867_v20 }
 0xd80   : > { %2732 = vmatprep.subr.bf16.mxu1 %v3153_v0 }
 0xd83   : > { %2733 = vmatpush3.bf16.msra.mxu1 %v2868_v29 }
 0xd84   : > { %2734 = vmatprep.subr.bf16.mxu1 %v3153_v0  ;;  %v2513_v0 = vld [vmem:[%s3971_s15] ss:$0 sm:$0xff]  ;;  %s2291_s15 = scalar_lea.sflag [#allocation5], %s3513_s26 }
 0xd87   : > { %2735 = vmatpush3.bf16.msra.mxu1 %v2869_v30 }
 0xdfa   : > { %v2054_v8 = vpop.xlane.xlu0 %2053 }
 0xdfb   : > { %v2055_v3 = vmul.f32 0.03125, %v2054_v8 }
 0xdfd   : > { %v2056_v10 = vsub.f32 %v2049_v6, %v2055_v3 }
 0xdff   : > { %v2057_v11 = vmul.f32 %v2056_v10, %v2056_v10 }
 0xe01   : > { %v2058_v12 = vsel %vm852_vm2, %v2057_v11, 0.0 }
 0xe02   : > { %2059 = vadd.xlane.f32.xlu1 %v2058_v12 }
 0xe8f   : > { %v2060_v21 = vpop.xlane.xlu1 %2059 }
 0xe90   : > { %v2061_v22 = vmul.f32 0.03125, %v2060_v21 }
 0xe92   : > { %v2062_v5 = vadd.f32 1e-05, %v2061_v22 }
 0xe94   : > { %2904 = vrsqrt.f32 %v2062_v5 }
 0xe9e   : > { %v2905_v23 = vpop.eup %2904 }
 0xe9f   : > { %v2064_v25 = vmul.f32 %v2905_v23, %v2056_v10 }
 0xea1   : > { %v2071_v26 = vmul.f32 %v2507_v24, %v2064_v25 }
 0xea3   : > { %v2078_v27 = vadd.f32 %v2508_v9, %v2071_v26 }
 0xea5   : > { %v2079_v28 = vpack.c.bf16 %v2078_v27, %v2078_v27 }
 0xea7   : > { %2717 = vmatmul.mubr.msk.bf16.vlgmr.msra.gmra.mrb[44].mxu0 %vm852_vm2, %v2079_v28 }
 0xf7a   : > { %v2140_v32 = vpop.f32.mrb[44].mxu0 }
 0xf7b   : > { %v2141_v33 = vadd.f32 %v2509_v31, %v2140_v32  ;;  %v2718_v34 = vpop.f32.mrb[45].mxu0 }
 0xf7c   : > { %v2143_v35 = vpop.f32.mrb[46].mxu0 }
 0xf7d   : > { %v2146_v36 = vmax.f32 %v2141_v33, 0.0  ;;  %v2719_v37 = vpop.f32.mrb[47].mxu0 }
 0xf7f   : > { %v2147_v38 = vpack.c.bf16 %v2146_v36, %v2146_v36 }
 0xf81   : > { %2737 = vmatmul.mubr.bf16.vlgmr.msra.gmra.mrb[36].mxu1 %v2147_v38 }
0x1054   : > { %v2253_v39 = vpop.f32.mrb[36].mxu1 }
0x1055   : > { %v2254_v40 = vadd.f32 %v2513_v0, %v2253_v39  ;;  %v2738_v41 = vpop.f32.mrb[37].mxu1 }
0x1056   : > { %v2256_v42 = vpop.f32.mrb[38].mxu1 }
0x1057   : > { %v2739_v43 = vpop.f32.mrb[39].mxu1  ;;  %v2259_v44 = vadd.f32 %v2254_v40, %v2078_v27 }
0x1059   : > { %v2262_v45 = vsel %vm852_vm2, %v2259_v44, 0.0 }
0x105a   : > { %2263 = vadd.xlane.f32.xlu0 %v2262_v45 }
0x10e7   : > { %v2264_v46 = vpop.xlane.xlu0 %2263 }
0x10e8   : > { %v2265_v47 = vmul.f32 0.03125, %v2264_v46 }
0x10ea   : > { %v2266_v48 = vsub.f32 %v2259_v44, %v2265_v47 }
0x10ec   : > { %v2267_v49 = vmul.f32 %v2266_v48, %v2266_v48 }
0x10ee   : > { %v2268_v50 = vsel %vm852_vm2, %v2267_v49, 0.0 }
0x10ef   : > { %2269 = vadd.xlane.f32.xlu0 %v2268_v50 }
0x117c   : > { %v2270_v51 = vpop.xlane.xlu0 %2269 }
0x117d   : > { %v2271_v52 = vmul.f32 0.03125, %v2270_v51 }
0x117f   : > { %v2272_v53 = vadd.f32 1e-05, %v2271_v52 }
0x1181   : > { %2906 = vrsqrt.f32 %v2272_v53 }
0x118b   : > { %v2907_v54 = vpop.eup %2906 }
0x118c   : > { %v2274_v56 = vmul.f32 %v2907_v54, %v2266_v48 }
0x118e   : > { %v2281_v58 = vmul.f32 %v2522_v55, %v2274_v56 }
0x1190   : > { %v2288_v59 = vadd.f32 %v2523_v57, %v2281_v58 }
0x1192   : > { %2289 = vst.msk [vmem:[%s814_s19] sm:$0xff] %vm852_vm2, %v2288_v59 }
0x1193   : > { %3065 = shalt.err (!%p3062_p2)
}
0x1194   : > { %s3066_s26 = scalar_lea.hbm %s3830_s23, 128  ;;  %s3070_s6 = scalar_lea.hbm %s3974_s2, 256 }
0x1195   : > { %p3067_p3 = scmp.ne.s32.totalorder %s3830_s23, %s3066_s26  ;;  %p3071_p11 = scmp.lt.u32.totalorder %s3830_s23, %s3974_s2 }
0x1196   : > { %p3072_p0 = scmp.lt.u32.totalorder %s3070_s6, %s3066_s26  ;;  %p3074_p10 = scmp.lt.u32.totalorder %s3066_s26, %s3830_s23 }
0x1197   : > { %p3068_p1 = pnand %p3067_p3, %p3975_p13 }
0x1198   : > { %p3073_p5 = por %p3072_p0, %p3071_p11 }
0x1199   : > { %p3069_p8 = pneg %p3068_p1 }
0x119a   : > { %p3075_p9 = por %p3074_p10, %p3073_p5 }
0x119c   : > { %p3076_p7 = pnand %p3075_p9, %p3069_p8 }
0x119e   : > { %3079 = shalt.err (!%p3076_p7)
}
0x119f   : > { %2756 = dma.vmem_to_hbm [thread:$0]  (%p3975_p13), %s3832_s22, 128, %s3830_s23, %s2291_s15  }
0x11a0 PF: > { %s3976_s19 = sld [smem:[#allocation18_spill]]  ;;  %s3977_s5 = sld [smem:[#allocation21_spill]] }
0x11a1   : > { %p3979_p4 = scmp.ge.s32.totalorder %s3146_s0, 2 }
0x11a6   : > { %s2317_s24 = sand.u32 1, %s3976_s19   ;;  %p3978_p12 = scmp.ne.s32.totalorder %s3977_s5, 0 }
0x11a7   : > { %s2318_s20 = scalar_lea.sflag [#allocation5], %s2317_s24 }
0x11a8   : > { %p2776_p6 = pnand %p3979_p4, %p3978_p12 }
0x11aa   : > { %3121 = dma.done.wait (!%p2776_p6), %s2318_s20, 128  }
0x11ab   : > { %3123 = vsyncadd (!%p2776_p6), %s2318_s20, 4294967168  ;;  %s42_s0 = sadd.s32 1, %s3146_s0   ;;  %s3980_s30 = sld [smem:[#allocation19_spill]] }
0x11ac   : > { %p39_p2 = scmp.ge.s32.totalorder %s42_s0, 4   ;;  %s3981_s29 = sld [smem:[#allocation23_spill]] }
0x11ad   : > { %s3982_s1 = sld [smem:[#allocation20_spill]]  ;;  %s3983_s4 = sld [smem:[#allocation22_spill]] }
0x11ae   : > { %s3984_s3 = smov %s3130_s28  ;;  %41 = sbr.rel (!%p39_p2) target bundleno = 27 (0x1b), region = 182 }
0x11b1   : > { %s3985_s28 = smov %s3980_s30 }
0x11b3   : > { %s3986_s30 = smov %s3982_s1 }
0x11b5   :  { %2323 = vsyncpa [#allocation4], 1 }
0x11b6   :  { %2325 = vsyncpa [#allocation4 + $0x1], 1 }
0x11b7   :  { %2326 = vsyncpa [#allocation7], 1 }
0x11b8   :  { %2328 = vsyncpa [#allocation7 + $0x1], 1 }
0x11b9   :  { %2329 = vsyncpa [#allocation10], 1 }
0x11ba   :  { %2330 = vsyncpa [#allocation5], 1 }
0x11bb   :  { %2332 = vsyncpa [#allocation5 + $0x1], 1 }

</bundles_post_ra>
